<compile_context>
chip_gen: v5e
topology: v5e:2x2
jax: 0.10.0
libtpu: 0.0.40
codegen_flags: <defaults>
</compile_context>

<pallas_src>
import functools

import numpy as np

import jax
import jax.numpy as jnp
from jax.experimental import pallas as pl
from jax.experimental.pallas import tpu as pltpu

LANE = 128     # all channel-like dims are zero-padded to the TPU lane width
SUB = 8        # sublane quantum
_VMEM = pl.BlockSpec(memory_space=pltpu.MemorySpace.VMEM)


def _round_up(x, m):
    return (x + m - 1) // m * m


# --------------------------------------------------------------------------
# static conv / split geometry (pure python+numpy, cached per shape)
# --------------------------------------------------------------------------
@functools.lru_cache(maxsize=None)
def _conv_geometry(n, h, w, s):
    g = n // s
    hp, wp = h + 2, w + 2                      # zero-padded spatial extent
    pp = hp * wp                               # rows per sample (padded image, flattened)
    p_pad = _round_up(pp, SUB)                 # per-sample row block, 8-aligned
    gpp = g * p_pad                            # conv-output rows per split
    max_d = 2 * wp + 2                         # largest tap shift
    src_rows = _round_up(gpp + max_d, SUB)     # source rows per split (incl. tap overshoot)
    taps = tuple(kh * wp + kw for kh in range(3) for kw in range(3))
    # slab position (s_idx, g_idx) holds original sample n = g_idx*s + s_idx, matching
    # SplitBatchNorm's view(-1, C*num_splits, H, W) grouping.
    perm = np.array([gi * s + si for si in range(s) for gi in range(g)], dtype=np.int32)
    # validity mask over the gpp conv-output rows of one split
    r = np.arange(gpp)
    rin = r % p_pad
    valid = (rin < pp) & ((rin // wp) < h) & ((rin % wp) < w)
    mask = valid.astype(np.float32).reshape(gpp, 1)
    return dict(G=g, WP=wp, PP=pp, P_PAD=p_pad, GPP=gpp, SRC_ROWS=src_rows,
                TAPS=taps, PERM=perm, MASK=mask)


# --------------------------------------------------------------------------
# kernel 1: conv3x3 (im2col built in-kernel) + SplitBatchNorm(train) + ReLU
#           grid = (num_splits,), "parallel" so v7x can shard splits across TensorCores
# --------------------------------------------------------------------------
def _conv_bn_relu_kernel(x_ref, w_ref, gam_ref, bet_ref, m_ref, o_ref, *,
                         cin_pad, taps, inv_cnt, eps):
    rows = o_ref.shape[0]
    acc = jnp.zeros(o_ref.shape, jnp.float32)
    # 9 tap-shifted matmuls: rows of x_ref are (g, hp, wp) flattened per split, so tap
    # (kh, kw) is a static sublane shift of kh*(W+2)+kw.  K = cin_pad = 8 is tiny, so the
    # dot stays f32 (bf16 MXU casting is applied to the big, well-shaped matmuls instead).
    for t, d in enumerate(taps):
        xt = x_ref[pl.ds(d, rows), :]                      # (rows, cin_pad)
        wt = w_ref[pl.ds(t * cin_pad, cin_pad), :]         # (cin_pad, 128)
        acc = acc + jnp.dot(xt, wt, preferred_element_type=jnp.float32)
    mask = m_ref[...]                                      # (rows, 1): 1.0 on valid rows
    masked = acc * mask
    mean = jnp.sum(masked, axis=0, keepdims=True) * inv_cnt
    diff = acc - mean
    var = jnp.sum(diff * diff * mask, axis=0, keepdims=True) * inv_cnt   # biased, as torch
    y = diff * jax.lax.rsqrt(var + eps) * gam_ref[...] + bet_ref[...]
    o_ref[...] = jnp.maximum(y, 0.0) * mask                # ReLU; zero the padding rows


def _conv_bn_relu(x_rows, w_taps, bn_g, bn_b, mask, *, s, cin_pad, geo, hw):
    gpp, src = geo["GPP"], geo["SRC_ROWS"]
    cpad = w_taps.shape[1]
    kern = functools.partial(_conv_bn_relu_kernel, cin_pad=cin_pad, taps=geo["TAPS"],
                             inv_cnt=1.0 / float(geo["G"] * hw), eps=1e-5)
    return pl.pallas_call(
        kern,
        out_shape=jax.ShapeDtypeStruct((s * gpp, cpad), jnp.float32),
        grid=(s,),
        in_specs=[
            pl.BlockSpec((src, cin_pad), lambda i: (i, 0)),
            pl.BlockSpec((w_taps.shape[0], cpad), lambda i: (0, 0)),
            pl.BlockSpec((1, cpad), lambda i: (0, 0)),
            pl.BlockSpec((1, cpad), lambda i: (0, 0)),
            pl.BlockSpec((gpp, 1), lambda i: (0, 0)),
        ],
        out_specs=pl.BlockSpec((gpp, cpad), lambda i: (i, 0)),
        compiler_params=pltpu.CompilerParams(dimension_semantics=("parallel",)),
    )(x_rows, w_taps, bn_g, bn_b, mask)


# --------------------------------------------------------------------------
# kernel 2: avgpool(1x1) + fc + bias + L2-normalize (fused encoder tail)
# --------------------------------------------------------------------------
def _tail_kernel(slab_ref, w_ref, b_ref, o_ref, *, n, s, p_rows, inv_hw):
    g = n // s
    parts = []
    for nn in range(n):                      # static unroll; rows emitted in sample order
        j = (nn % s) * g + (nn // s)         # slab chunk that holds sample nn
        chunk = slab_ref[pl.ds(j * p_rows, p_rows), :]
        parts.append(jnp.sum(chunk, axis=0, keepdims=True))
    pooled = jnp.concatenate(parts, axis=0) * inv_hw                 # (n, 128)
    feat = jnp.dot(pooled.astype(jnp.bfloat16), w_ref[...].astype(jnp.bfloat16),
                   preferred_element_type=jnp.float32) + b_ref[...]
    ssq = jnp.sum(feat * feat, axis=1, keepdims=True)
    # F.normalize(dim=1, eps=1e-12)  ==  x * rsqrt(max(||x||^2, eps^2))
    o_ref[...] = feat * jax.lax.rsqrt(jnp.maximum(ssq, 1e-24))


def _encoder_tail(slab, fc_wt, fc_b, *, n, s, p_rows, hw):
    dpad = fc_wt.shape[1]
    kern = functools.partial(_tail_kernel, n=n, s=s, p_rows=p_rows, inv_hw=1.0 / float(hw))
    return pl.pallas_call(
        kern,
        out_shape=jax.ShapeDtypeStruct((n, dpad), jnp.float32),
        in_specs=[_VMEM, _VMEM, _VMEM],
        out_specs=_VMEM,
    )(slab, fc_wt, fc_b)


# --------------------------------------------------------------------------
# kernel 3: the three MoCo InfoNCE losses in one kernel
#           (q, q_mixed, q_mixed_flip stacked to (3N, D); k / queue DMA'd once)
# --------------------------------------------------------------------------
def _loss3_kernel(q_ref, k_ref, queue_ref, o_ref, *, inv_t, n, k_real):
    q = q_ref[...]                                          # (3n, D) = [q; q_m; q_m_flip]
    k = k_ref[...]                                          # (n, D)
    k3 = jnp.concatenate([k, k, k], axis=0)                 # same keys for all 3 groups
    l_pos = jnp.sum(q * k3, axis=1, keepdims=True) * inv_t  # (3n, 1)
    l_neg = jnp.dot(q.astype(jnp.bfloat16), queue_ref[...].astype(jnp.bfloat16),
                    preferred_element_type=jnp.float32) * inv_t
    col = jax.lax.broadcasted_iota(jnp.int32, l_neg.shape, 1)
    l_neg = jnp.where(col < k_real, l_neg, -1e30)           # mask queue's K lane padding
    mx = jnp.maximum(l_pos, jnp.max(l_neg, axis=1, keepdims=True))
    lse = mx + jnp.log(jnp.exp(l_pos - mx)
                       + jnp.sum(jnp.exp(l_neg - mx), axis=1, keepdims=True))
    per_row = lse - l_pos                                   # cross-entropy vs. target 0
    r = jax.lax.broadcasted_iota(jnp.int32, per_row.shape, 0)
    inv_n = 1.0 / float(n)
    l0 = jnp.sum(jnp.where(r < n, per_row, 0.0), keepdims=True) * inv_n
    l1 = jnp.sum(jnp.where(jnp.logical_and(r >= n, r < 2 * n), per_row, 0.0),
                 keepdims=True) * inv_n
    l2 = jnp.sum(jnp.where(r >= 2 * n, per_row, 0.0), keepdims=True) * inv_n
    rows = jax.lax.broadcasted_iota(jnp.int32, o_ref.shape, 0)
    o_ref[...] = jnp.where(rows == 0, l0, jnp.where(rows == 1, l1, l2))


def _moco_losses(q_all, k, queue_pad, *, T, K):
    n = k.shape[0]
    kern = functools.partial(_loss3_kernel, inv_t=1.0 / float(T), n=n, k_real=K)
    out = pl.pallas_call(
        kern,
        out_shape=jax.ShapeDtypeStruct((3, queue_pad.shape[1]), jnp.float32),
        in_specs=[_VMEM, _VMEM, _VMEM],
        out_specs=_VMEM,
    )(q_all, k, queue_pad)
    return out[:, 0]                                        # (loss, loss_m1, loss_m2)


# --------------------------------------------------------------------------
# encoder forward = tiny XLA image prep -> conv+BN+ReLU kernel -> fused tail kernel
# --------------------------------------------------------------------------
def encoder_forward(params, x, bn_splits):
    n, cin, h, w = x.shape
    s = bn_splits
    assert n % s == 0
    geo = _conv_geometry(n, h, w, s)
    cin_pad = _round_up(max(cin, SUB), SUB)
    g, pp, p_pad = geo["G"], geo["PP"], geo["P_PAD"]

    # XLA side only touches the raw (N,3,H,W) image: NHWC, zero border, split grouping,
    # lane/row padding.  No im2col blow-up, no activation transposes / HBM round-trips.
    xp = jnp.pad(jnp.transpose(x, (0, 2, 3, 1)),
                 ((0, 0), (1, 1), (1, 1), (0, cin_pad - cin)))
    xp = xp[jnp.asarray(geo["PERM"])]                       # samples in (split, group) order
    xp = xp.reshape(s, g, pp, cin_pad)
    xp = jnp.pad(xp, ((0, 0), (0, 0), (0, p_pad - pp), (0, 0)))
    xp = xp.reshape(s, g * p_pad, cin_pad)
    xp = jnp.pad(xp, ((0, 0), (0, geo["SRC_ROWS"] - g * p_pad), (0, 0)))
    xp = xp.reshape(s * geo["SRC_ROWS"], cin_pad)

    slab = _conv_bn_relu(xp, params["w_taps"], params["bn_g"], params["bn_b"],
                         jnp.asarray(geo["MASK"]), s=s, cin_pad=cin_pad, geo=geo, hw=h * w)
    # TODO(synk): resnet18 layer1-4 BasicBlocks omitted (the `resnet` module is not part of
    # the given snippet); CIFAR recipe (conv1 k3/s1, no maxpool, avgpool+fc head) preserved.
    # TODO(synk): SplitBatchNorm running_mean/running_var buffer updates (training-mode side
    # effect) are not materialized; they do not affect this forward's outputs.
    return _encoder_tail(slab, params["fc_wt"], params["fc_b"],
                         n=n, s=s, p_rows=p_pad, hw=h * w)


# --------------------------------------------------------------------------
# MoCo wrapper
# --------------------------------------------------------------------------
def contrastive_loss(params_q, params_k, queue_pad, im_q, im_k, im_mixed, *,
                     T, K, bn_splits, shuffle_key):
    q = encoder_forward(params_q, im_q, bn_splits)              # already L2-normalized
    q_mixed = encoder_forward(params_q, im_mixed, bn_splits)
    q_mixed_flip = jnp.flip(q_mixed, axis=0)                    # normalize & flip commute

    # batch shuffle for BN (torch.randperm equivalent)
    idx_shuffle = jax.random.permutation(shuffle_key, im_k.shape[0])
    idx_unshuffle = jnp.argsort(idx_shuffle)
    k = encoder_forward(params_k, im_k[idx_shuffle], bn_splits)
    k = jax.lax.stop_gradient(k[idx_unshuffle])

    q_all = jnp.concatenate([q, q_mixed, q_mixed_flip], axis=0)  # (3N, D) stacked once
    losses = _moco_losses(q_all, k, queue_pad, T=T, K=K)
    return losses[0], q, k, losses[1], losses[2]


def _dequeue_and_enqueue(queue_pad, queue_ptr, keys, K):
    b = keys.shape[0]
    assert K % b == 0
    new_queue = jax.lax.dynamic_update_slice_in_dim(queue_pad, jnp.transpose(keys),
                                                    queue_ptr, axis=1)
    return new_queue, (queue_ptr + b) % K


@functools.partial(jax.jit, static_argnames=("m", "T", "K", "bn_splits", "symmetric"))
def moco_forward(params_q, params_k, queue_pad, queue_ptr,
                 im1, im2, im1_mixed, im1_mixed_re, lam, rng, *,
                 m, T, K, bn_splits, symmetric):
    del im1_mixed_re  # unused by the reference contrastive_loss as well
    # momentum update of the key encoder (params stored pre-padded; update is linear so
    # applying it to the padded form is exact, and the padding stays zero)
    params_k = jax.tree_util.tree_map(lambda pk, pq: pk * m + pq * (1.0 - m),
                                      params_k, params_q)
    key1, key2 = jax.random.split(rng)
    if symmetric:
        l12, q1, k2, lm11, lm12 = contrastive_loss(
            params_q, params_k, queue_pad, im1, im2, im1_mixed,
            T=T, K=K, bn_splits=bn_splits, shuffle_key=key1)
        l21, q2, k1, lm21, lm22 = contrastive_loss(
            params_q, params_k, queue_pad, im2, im1, im1_mixed,
            T=T, K=K, bn_splits=bn_splits, shuffle_key=key2)
        loss = (l12 + l21 + lam * lm11 + (1 - lam) * lm12
                + lam * lm21 + (1 - lam) * lm22)
        k = jnp.concatenate([k1, k2], axis=0)
    else:
        l0, q, k, lm11, lm12 = contrastive_loss(
            params_q, params_k, queue_pad, im1, im2, im1_mixed,
            T=T, K=K, bn_splits=bn_splits, shuffle_key=key1)
        loss = l0 + lam * lm11 + (1 - lam) * lm12
    queue_pad, queue_ptr = _dequeue_and_enqueue(queue_pad, queue_ptr, k, K)
    return loss, params_k, queue_pad, queue_ptr


# --------------------------------------------------------------------------
# parameter init / one-time prep (pre-transposed, lane-padded to 128)
# --------------------------------------------------------------------------
def prep_encoder_params(conv_w, bn_w, bn_b, fc_w, fc_b):
    c1, cin, kh, kw = conv_w.shape
    dim = fc_w.shape[0]
    cin_pad = _round_up(max(cin, SUB), SUB)
    w_taps = jnp.transpose(conv_w, (2, 3, 1, 0))                      # (3, 3, cin, c1)
    w_taps = jnp.pad(w_taps, ((0, 0), (0, 0), (0, cin_pad - cin), (0, 0)))
    w_taps = w_taps.reshape(kh * kw * cin_pad, c1)
    w_taps = jnp.pad(w_taps, ((0, 0), (0, LANE - c1)))                # (9*cin_pad, 128)
    return {
        "w_taps": w_taps,
        "bn_g": jnp.pad(bn_w.reshape(1, c1), ((0, 0), (0, LANE - c1))),
        "bn_b": jnp.pad(bn_b.reshape(1, c1), ((0, 0), (0, LANE - c1))),
        "fc_wt": jnp.pad(fc_w.T, ((0, LANE - c1), (0, LANE - dim))),  # (128, 128)
        "fc_b": jnp.pad(fc_b.reshape(1, dim), ((0, 0), (0, LANE - dim))),
    }


def init_encoder_params(key, dim, c1, cin=3):
    k1, k2 = jax.random.split(key)
    conv_w = 0.1 * jax.random.normal(k1, (c1, cin, 3, 3), jnp.float32)
    fc_w = 0.1 * jax.random.normal(k2, (dim, c1), jnp.float32)
    return prep_encoder_params(conv_w, jnp.ones((c1,), jnp.float32),
                               jnp.zeros((c1,), jnp.float32),
                               fc_w, jnp.zeros((dim,), jnp.float32))


def prep_queue(queue):
    dim, k = queue.shape
    assert dim <= LANE and k <= LANE
    return jnp.pad(queue, ((0, LANE - dim), (0, LANE - k)))


if __name__ == "__main__":
    # small-shape config consistent with the module (dim, K, m, T, bn_splits, symmetric)
    dim, K, m_mom, T, bn_splits = 16, 32, 0.99, 0.1, 2
    N, H, W = 4, 8, 8
    C1 = 8

    root = jax.random.PRNGKey(0)
    kp, kq, ki, kshuf = jax.random.split(root, 4)

    params_q = init_encoder_params(kp, dim, C1)
    params_k = jax.tree_util.tree_map(lambda p: p, params_q)   # key encoder starts = query

    queue = jax.random.normal(kq, (dim, K), jnp.float32)
    queue = queue * jax.lax.rsqrt(jnp.sum(queue * queue, axis=0, keepdims=True))
    queue_pad = prep_queue(queue)
    queue_ptr = jnp.zeros((), jnp.int32)

    k_im1, k_im2, k_mx, k_mxre = jax.random.split(ki, 4)
    im1 = jax.random.normal(k_im1, (N, 3, H, W), jnp.float32)
    im2 = jax.random.normal(k_im2, (N, 3, H, W), jnp.float32)
    im1_mixed = jax.random.normal(k_mx, (N, 3, H, W), jnp.float32)
    im1_mixed_re = jax.random.normal(k_mxre, (N, 3, H, W), jnp.float32)
    lam = 0.7

    loss, params_k, queue_pad, queue_ptr = moco_forward(
        params_q, params_k, queue_pad, queue_ptr,
        im1, im2, im1_mixed, im1_mixed_re, lam, kshuf,
        m=m_mom, T=T, K=K, bn_splits=bn_splits, symmetric=True)
    jax.block_until_ready(loss)
    assert loss.shape == () and bool(jnp.isfinite(loss))
    print("KERNEL_OK")
</pallas_src>

<mosaic_0001>
module attributes {stable_mosaic.version = 11 : i64} {
  func.func @_conv_bn_relu_kernel(%arg0: i32, %arg1: memref<232x8xf32, #tpu.memory_space<vmem>>, %arg2: memref<72x128xf32, #tpu.memory_space<vmem>>, %arg3: memref<1x128xf32, #tpu.memory_space<vmem>>, %arg4: memref<1x128xf32, #tpu.memory_space<vmem>>, %arg5: memref<208x1xf32, #tpu.memory_space<vmem>>, %arg6: memref<208x128xf32, #tpu.memory_space<vmem>>) attributes {dimension_semantics = [#tpu.dimension_semantics<parallel>], iteration_bounds = array<i64: 2>, scalar_prefetch = 0 : i64, scratch_operands = 0 : i64, tpu.core_type = #tpu.core_type<tc>, window_params = [{transform_indices = @transform_0, window_bounds = array<i64: 232, 8>}, {pipeline_mode = #tpu.pipeline_mode<synchronous>, transform_indices = @transform_1, window_bounds = array<i64: 72, 128>}, {pipeline_mode = #tpu.pipeline_mode<synchronous>, transform_indices = @transform_2, window_bounds = array<i64: 1, 128>}, {pipeline_mode = #tpu.pipeline_mode<synchronous>, transform_indices = @transform_3, window_bounds = array<i64: 1, 128>}, {pipeline_mode = #tpu.pipeline_mode<synchronous>, transform_indices = @transform_4, window_bounds = array<i64: 208, 1>}, {transform_indices = @transform_5, window_bounds = array<i64: 208, 128>}]} {
    %cst = arith.constant 0.000000e+00 : f32
    %0 = vector.broadcast %cst : f32 to vector<208x128xf32>
    %c0 = arith.constant 0 : index
    %c0_0 = arith.constant 0 : index
    %1 = vector.load %arg1[%c0, %c0_0] : memref<232x8xf32, #tpu.memory_space<vmem>>, vector<208x8xf32>
    %c0_1 = arith.constant 0 : index
    %c0_2 = arith.constant 0 : index
    %2 = vector.load %arg2[%c0_1, %c0_2] : memref<72x128xf32, #tpu.memory_space<vmem>>, vector<8x128xf32>
    %cst_3 = arith.constant dense<0.000000e+00> : vector<208x128xf32>
    %3 = tpu.matmul %1, %2, %cst_3 {dimension_numbers = #tpu.dot_dimension_numbers<[1], [0], [0], [1], [0, 0, 1, 1], [], []>} : vector<208x8xf32>, vector<8x128xf32>, vector<208x128xf32> -> vector<208x128xf32>
    %4 = arith.addf %0, %3 : vector<208x128xf32>
    %c1 = arith.constant 1 : index
    %c0_4 = arith.constant 0 : index
    %5 = vector.load %arg1[%c1, %c0_4] : memref<232x8xf32, #tpu.memory_space<vmem>>, vector<208x8xf32>
    %c8 = arith.constant 8 : index
    %c0_5 = arith.constant 0 : index
    %6 = vector.load %arg2[%c8, %c0_5] : memref<72x128xf32, #tpu.memory_space<vmem>>, vector<8x128xf32>
    %cst_6 = arith.constant dense<0.000000e+00> : vector<208x128xf32>
    %7 = tpu.matmul %5, %6, %cst_6 {dimension_numbers = #tpu.dot_dimension_numbers<[1], [0], [0], [1], [0, 0, 1, 1], [], []>} : vector<208x8xf32>, vector<8x128xf32>, vector<208x128xf32> -> vector<208x128xf32>
    %8 = arith.addf %4, %7 : vector<208x128xf32>
    %c2 = arith.constant 2 : index
    %c0_7 = arith.constant 0 : index
    %9 = vector.load %arg1[%c2, %c0_7] : memref<232x8xf32, #tpu.memory_space<vmem>>, vector<208x8xf32>
    %c16 = arith.constant 16 : index
    %c0_8 = arith.constant 0 : index
    %10 = vector.load %arg2[%c16, %c0_8] : memref<72x128xf32, #tpu.memory_space<vmem>>, vector<8x128xf32>
    %cst_9 = arith.constant dense<0.000000e+00> : vector<208x128xf32>
    %11 = tpu.matmul %9, %10, %cst_9 {dimension_numbers = #tpu.dot_dimension_numbers<[1], [0], [0], [1], [0, 0, 1, 1], [], []>} : vector<208x8xf32>, vector<8x128xf32>, vector<208x128xf32> -> vector<208x128xf32>
    %12 = arith.addf %8, %11 : vector<208x128xf32>
    %c10 = arith.constant 10 : index
    %c0_10 = arith.constant 0 : index
    %13 = vector.load %arg1[%c10, %c0_10] : memref<232x8xf32, #tpu.memory_space<vmem>>, vector<208x8xf32>
    %c24 = arith.constant 24 : index
    %c0_11 = arith.constant 0 : index
    %14 = vector.load %arg2[%c24, %c0_11] : memref<72x128xf32, #tpu.memory_space<vmem>>, vector<8x128xf32>
    %cst_12 = arith.constant dense<0.000000e+00> : vector<208x128xf32>
    %15 = tpu.matmul %13, %14, %cst_12 {dimension_numbers = #tpu.dot_dimension_numbers<[1], [0], [0], [1], [0, 0, 1, 1], [], []>} : vector<208x8xf32>, vector<8x128xf32>, vector<208x128xf32> -> vector<208x128xf32>
    %16 = arith.addf %12, %15 : vector<208x128xf32>
    %c11 = arith.constant 11 : index
    %c0_13 = arith.constant 0 : index
    %17 = vector.load %arg1[%c11, %c0_13] : memref<232x8xf32, #tpu.memory_space<vmem>>, vector<208x8xf32>
    %c32 = arith.constant 32 : index
    %c0_14 = arith.constant 0 : index
    %18 = vector.load %arg2[%c32, %c0_14] : memref<72x128xf32, #tpu.memory_space<vmem>>, vector<8x128xf32>
    %cst_15 = arith.constant dense<0.000000e+00> : vector<208x128xf32>
    %19 = tpu.matmul %17, %18, %cst_15 {dimension_numbers = #tpu.dot_dimension_numbers<[1], [0], [0], [1], [0, 0, 1, 1], [], []>} : vector<208x8xf32>, vector<8x128xf32>, vector<208x128xf32> -> vector<208x128xf32>
    %20 = arith.addf %16, %19 : vector<208x128xf32>
    %c12 = arith.constant 12 : index
    %c0_16 = arith.constant 0 : index
    %21 = vector.load %arg1[%c12, %c0_16] : memref<232x8xf32, #tpu.memory_space<vmem>>, vector<208x8xf32>
    %c40 = arith.constant 40 : index
    %c0_17 = arith.constant 0 : index
    %22 = vector.load %arg2[%c40, %c0_17] : memref<72x128xf32, #tpu.memory_space<vmem>>, vector<8x128xf32>
    %cst_18 = arith.constant dense<0.000000e+00> : vector<208x128xf32>
    %23 = tpu.matmul %21, %22, %cst_18 {dimension_numbers = #tpu.dot_dimension_numbers<[1], [0], [0], [1], [0, 0, 1, 1], [], []>} : vector<208x8xf32>, vector<8x128xf32>, vector<208x128xf32> -> vector<208x128xf32>
    %24 = arith.addf %20, %23 : vector<208x128xf32>
    %c20 = arith.constant 20 : index
    %c0_19 = arith.constant 0 : index
    %25 = vector.load %arg1[%c20, %c0_19] : memref<232x8xf32, #tpu.memory_space<vmem>>, vector<208x8xf32>
    %c48 = arith.constant 48 : index
    %c0_20 = arith.constant 0 : index
    %26 = vector.load %arg2[%c48, %c0_20] : memref<72x128xf32, #tpu.memory_space<vmem>>, vector<8x128xf32>
    %cst_21 = arith.constant dense<0.000000e+00> : vector<208x128xf32>
    %27 = tpu.matmul %25, %26, %cst_21 {dimension_numbers = #tpu.dot_dimension_numbers<[1], [0], [0], [1], [0, 0, 1, 1], [], []>} : vector<208x8xf32>, vector<8x128xf32>, vector<208x128xf32> -> vector<208x128xf32>
    %28 = arith.addf %24, %27 : vector<208x128xf32>
    %c21 = arith.constant 21 : index
    %c0_22 = arith.constant 0 : index
    %29 = vector.load %arg1[%c21, %c0_22] : memref<232x8xf32, #tpu.memory_space<vmem>>, vector<208x8xf32>
    %c56 = arith.constant 56 : index
    %c0_23 = arith.constant 0 : index
    %30 = vector.load %arg2[%c56, %c0_23] : memref<72x128xf32, #tpu.memory_space<vmem>>, vector<8x128xf32>
    %cst_24 = arith.constant dense<0.000000e+00> : vector<208x128xf32>
    %31 = tpu.matmul %29, %30, %cst_24 {dimension_numbers = #tpu.dot_dimension_numbers<[1], [0], [0], [1], [0, 0, 1, 1], [], []>} : vector<208x8xf32>, vector<8x128xf32>, vector<208x128xf32> -> vector<208x128xf32>
    %32 = arith.addf %28, %31 : vector<208x128xf32>
    %c22 = arith.constant 22 : index
    %c0_25 = arith.constant 0 : index
    %33 = vector.load %arg1[%c22, %c0_25] : memref<232x8xf32, #tpu.memory_space<vmem>>, vector<208x8xf32>
    %c64 = arith.constant 64 : index
    %c0_26 = arith.constant 0 : index
    %34 = vector.load %arg2[%c64, %c0_26] : memref<72x128xf32, #tpu.memory_space<vmem>>, vector<8x128xf32>
    %cst_27 = arith.constant dense<0.000000e+00> : vector<208x128xf32>
    %35 = tpu.matmul %33, %34, %cst_27 {dimension_numbers = #tpu.dot_dimension_numbers<[1], [0], [0], [1], [0, 0, 1, 1], [], []>} : vector<208x8xf32>, vector<8x128xf32>, vector<208x128xf32> -> vector<208x128xf32>
    %36 = arith.addf %32, %35 : vector<208x128xf32>
    %c0_28 = arith.constant 0 : index
    %c0_29 = arith.constant 0 : index
    %37 = vector.load %arg5[%c0_28, %c0_29] : memref<208x1xf32, #tpu.memory_space<vmem>>, vector<208x1xf32>
    %38 = vector.broadcast %37 : vector<208x1xf32> to vector<208x128xf32>
    %39 = arith.mulf %36, %38 : vector<208x128xf32>
    %cst_30 = arith.constant dense<0.000000e+00> : vector<128xf32>
    %40 = vector.multi_reduction <add>, %39, %cst_30 [0] : vector<208x128xf32> to vector<128xf32>
    %41 = vector.shape_cast %40 : vector<128xf32> to vector<1x128xf32>
    %cst_31 = arith.constant 7.812500e-03 : f32
    %42 = vector.broadcast %cst_31 : f32 to vector<1x128xf32>
    %43 = arith.mulf %41, %42 : vector<1x128xf32>
    %44 = vector.broadcast %43 : vector<1x128xf32> to vector<208x128xf32>
    %45 = arith.subf %36, %44 : vector<208x128xf32>
    %46 = arith.mulf %45, %45 : vector<208x128xf32>
    %47 = vector.broadcast %37 : vector<208x1xf32> to vector<208x128xf32>
    %48 = arith.mulf %46, %47 : vector<208x128xf32>
    %cst_32 = arith.constant dense<0.000000e+00> : vector<128xf32>
    %49 = vector.multi_reduction <add>, %48, %cst_32 [0] : vector<208x128xf32> to vector<128xf32>
    %50 = vector.shape_cast %49 : vector<128xf32> to vector<1x128xf32>
    %cst_33 = arith.constant 7.812500e-03 : f32
    %51 = vector.broadcast %cst_33 : f32 to vector<1x128xf32>
    %52 = arith.mulf %50, %51 : vector<1x128xf32>
    %cst_34 = arith.constant 9.99999974E-6 : f32
    %53 = vector.broadcast %cst_34 : f32 to vector<1x128xf32>
    %54 = arith.addf %52, %53 : vector<1x128xf32>
    %55 = math.rsqrt %54 : vector<1x128xf32>
    %56 = vector.broadcast %55 : vector<1x128xf32> to vector<208x128xf32>
    %57 = arith.mulf %45, %56 : vector<208x128xf32>
    %c0_35 = arith.constant 0 : index
    %c0_36 = arith.constant 0 : index
    %58 = vector.load %arg3[%c0_35, %c0_36] : memref<1x128xf32, #tpu.memory_space<vmem>>, vector<1x128xf32>
    %59 = vector.broadcast %58 : vector<1x128xf32> to vector<208x128xf32>
    %60 = arith.mulf %57, %59 : vector<208x128xf32>
    %c0_37 = arith.constant 0 : index
    %c0_38 = arith.constant 0 : index
    %61 = vector.load %arg4[%c0_37, %c0_38] : memref<1x128xf32, #tpu.memory_space<vmem>>, vector<1x128xf32>
    %62 = vector.broadcast %61 : vector<1x128xf32> to vector<208x128xf32>
    %63 = arith.addf %60, %62 : vector<208x128xf32>
    %cst_39 = arith.constant 0.000000e+00 : f32
    %64 = vector.broadcast %cst_39 : f32 to vector<208x128xf32>
    %65 = arith.maximumf %63, %64 : vector<208x128xf32>
    %66 = vector.broadcast %37 : vector<208x1xf32> to vector<208x128xf32>
    %67 = arith.mulf %65, %66 : vector<208x128xf32>
    %c0_40 = arith.constant 0 : index
    %c0_41 = arith.constant 0 : index
    %68 = vector.load %arg6[%c0_40, %c0_41] : memref<208x128xf32, #tpu.memory_space<vmem>>, vector<208x128xf32>
    tpu.vector_store %arg6[%c0_40, %c0_41], %67 {strides = array<i32>} : memref<208x128xf32, #tpu.memory_space<vmem>>, vector<208x128xf32>,
    return
  }
  func.func @transform_0(%arg0: i32) -> (i32, i32) {
    %c0_i32 = arith.constant 0 : i32
    %c0_i32_0 = arith.constant 0 : i32
    return %arg0, %c0_i32 : i32, i32
  }
  func.func @transform_1(%arg0: i32) -> (i32, i32) {
    %c0_i32 = arith.constant 0 : i32
    %c0_i32_0 = arith.constant 0 : i32
    %c0_i32_1 = arith.constant 0 : i32
    return %c0_i32, %c0_i32_0 : i32, i32
  }
  func.func @transform_2(%arg0: i32) -> (i32, i32) {
    %c0_i32 = arith.constant 0 : i32
    %c0_i32_0 = arith.constant 0 : i32
    %c0_i32_1 = arith.constant 0 : i32
    return %c0_i32, %c0_i32_0 : i32, i32
  }
  func.func @transform_3(%arg0: i32) -> (i32, i32) {
    %c0_i32 = arith.constant 0 : i32
    %c0_i32_0 = arith.constant 0 : i32
    %c0_i32_1 = arith.constant 0 : i32
    return %c0_i32, %c0_i32_0 : i32, i32
  }
  func.func @transform_4(%arg0: i32) -> (i32, i32) {
    %c0_i32 = arith.constant 0 : i32
    %c0_i32_0 = arith.constant 0 : i32
    %c0_i32_1 = arith.constant 0 : i32
    return %c0_i32, %c0_i32_0 : i32, i32
  }
  func.func @transform_5(%arg0: i32) -> (i32, i32) {
    %c0_i32 = arith.constant 0 : i32
    %c0_i32_0 = arith.constant 0 : i32
    return %arg0, %c0_i32 : i32, i32
  }
}

module attributes {stable_mosaic.version = 11 : i64} {
  func.func @_tail_kernel(%arg0: memref<416x128xf32, #tpu.memory_space<vmem>>, %arg1: memref<128x128xf32, #tpu.memory_space<vmem>>, %arg2: memref<1x128xf32, #tpu.memory_space<vmem>>, %arg3: memref<4x128xf32, #tpu.memory_space<vmem>>) attributes {dimension_semantics = [], scalar_prefetch = 0 : i64, scratch_operands = 0 : i64, tpu.core_type = #tpu.core_type<tc>} {
    %c0 = arith.constant 0 : index
    %c0_0 = arith.constant 0 : index
    %0 = vector.load %arg0[%c0, %c0_0] : memref<416x128xf32, #tpu.memory_space<vmem>>, vector<104x128xf32>
    %cst = arith.constant dense<0.000000e+00> : vector<128xf32>
    %1 = vector.multi_reduction <add>, %0, %cst [0] : vector<104x128xf32> to vector<128xf32>
    %2 = vector.shape_cast %1 : vector<128xf32> to vector<1x128xf32>
    %c208 = arith.constant 208 : index
    %c0_1 = arith.constant 0 : index
    %3 = vector.load %arg0[%c208, %c0_1] : memref<416x128xf32, #tpu.memory_space<vmem>>, vector<104x128xf32>
    %cst_2 = arith.constant dense<0.000000e+00> : vector<128xf32>
    %4 = vector.multi_reduction <add>, %3, %cst_2 [0] : vector<104x128xf32> to vector<128xf32>
    %5 = vector.shape_cast %4 : vector<128xf32> to vector<1x128xf32>
    %c104 = arith.constant 104 : index
    %c0_3 = arith.constant 0 : index
    %6 = vector.load %arg0[%c104, %c0_3] : memref<416x128xf32, #tpu.memory_space<vmem>>, vector<104x128xf32>
    %cst_4 = arith.constant dense<0.000000e+00> : vector<128xf32>
    %7 = vector.multi_reduction <add>, %6, %cst_4 [0] : vector<104x128xf32> to vector<128xf32>
    %8 = vector.shape_cast %7 : vector<128xf32> to vector<1x128xf32>
    %c312 = arith.constant 312 : index
    %c0_5 = arith.constant 0 : index
    %9 = vector.load %arg0[%c312, %c0_5] : memref<416x128xf32, #tpu.memory_space<vmem>>, vector<104x128xf32>
    %cst_6 = arith.constant dense<0.000000e+00> : vector<128xf32>
    %10 = vector.multi_reduction <add>, %9, %cst_6 [0] : vector<104x128xf32> to vector<128xf32>
    %11 = vector.shape_cast %10 : vector<128xf32> to vector<1x128xf32>
    %12 = tpu.concatenate %2, %5, %8, %11 in 0 : vector<1x128xf32>, vector<1x128xf32>, vector<1x128xf32>, vector<1x128xf32> -> vector<4x128xf32>
    %cst_7 = arith.constant 1.562500e-02 : f32
    %13 = vector.broadcast %cst_7 : f32 to vector<4x128xf32>
    %14 = arith.mulf %12, %13 : vector<4x128xf32>
    %15 = arith.truncf %14 : vector<4x128xf32> to vector<4x128xbf16>
    %c0_8 = arith.constant 0 : index
    %c0_9 = arith.constant 0 : index
    %16 = vector.load %arg1[%c0_8, %c0_9] : memref<128x128xf32, #tpu.memory_space<vmem>>, vector<128x128xf32>
    %17 = arith.truncf %16 : vector<128x128xf32> to vector<128x128xbf16>
    %cst_10 = arith.constant dense<0.000000e+00> : vector<4x128xf32>
    %18 = tpu.matmul %15, %17, %cst_10 {dimension_numbers = #tpu.dot_dimension_numbers<[1], [0], [0], [1], [0, 0, 1, 1], [], []>} : vector<4x128xbf16>, vector<128x128xbf16>, vector<4x128xf32> -> vector<4x128xf32>
    %c0_11 = arith.constant 0 : index
    %c0_12 = arith.constant 0 : index
    %19 = vector.load %arg2[%c0_11, %c0_12] : memref<1x128xf32, #tpu.memory_space<vmem>>, vector<1x128xf32>
    %20 = vector.broadcast %19 : vector<1x128xf32> to vector<4x128xf32>
    %21 = arith.addf %18, %20 : vector<4x128xf32>
    %22 = arith.mulf %21, %21 : vector<4x128xf32>
    %cst_13 = arith.constant dense<0.000000e+00> : vector<4xf32>
    %23 = vector.multi_reduction <add>, %22, %cst_13 [1] : vector<4x128xf32> to vector<4xf32>
    %24 = vector.shape_cast %23 : vector<4xf32> to vector<4x1xf32>
    %cst_14 = arith.constant 1.000000e-24 : f32
    %25 = vector.broadcast %cst_14 : f32 to vector<4x1xf32>
    %26 = arith.maximumf %24, %25 : vector<4x1xf32>
    %27 = math.rsqrt %26 : vector<4x1xf32>
    %28 = vector.broadcast %27 : vector<4x1xf32> to vector<4x128xf32>
    %29 = arith.mulf %21, %28 : vector<4x128xf32>
    %c0_15 = arith.constant 0 : index
    %c0_16 = arith.constant 0 : index
    %30 = vector.load %arg3[%c0_15, %c0_16] : memref<4x128xf32, #tpu.memory_space<vmem>>, vector<4x128xf32>
    tpu.vector_store %arg3[%c0_15, %c0_16], %29 {strides = array<i32>} : memref<4x128xf32, #tpu.memory_space<vmem>>, vector<4x128xf32>,
    return
  }
}

module attributes {stable_mosaic.version = 11 : i64} {
  func.func @_loss3_kernel(%arg0: memref<12x128xf32, #tpu.memory_space<vmem>>, %arg1: memref<4x128xf32, #tpu.memory_space<vmem>>, %arg2: memref<128x128xf32, #tpu.memory_space<vmem>>, %arg3: memref<3x128xf32, #tpu.memory_space<vmem>>) attributes {dimension_semantics = [], scalar_prefetch = 0 : i64, scratch_operands = 0 : i64, tpu.core_type = #tpu.core_type<tc>} {
    %c0 = arith.constant 0 : index
    %c0_0 = arith.constant 0 : index
    %0 = vector.load %arg0[%c0, %c0_0] : memref<12x128xf32, #tpu.memory_space<vmem>>, vector<12x128xf32>
    %c0_1 = arith.constant 0 : index
    %c0_2 = arith.constant 0 : index
    %1 = vector.load %arg1[%c0_1, %c0_2] : memref<4x128xf32, #tpu.memory_space<vmem>>, vector<4x128xf32>
    %2 = tpu.concatenate %1, %1, %1 in 0 : vector<4x128xf32>, vector<4x128xf32>, vector<4x128xf32> -> vector<12x128xf32>
    %3 = arith.mulf %0, %2 : vector<12x128xf32>
    %cst = arith.constant dense<0.000000e+00> : vector<12xf32>
    %4 = vector.multi_reduction <add>, %3, %cst [1] : vector<12x128xf32> to vector<12xf32>
    %5 = vector.shape_cast %4 : vector<12xf32> to vector<12x1xf32>
    %cst_3 = arith.constant 1.000000e+01 : f32
    %6 = vector.broadcast %cst_3 : f32 to vector<12x1xf32>
    %7 = arith.mulf %5, %6 : vector<12x1xf32>
    %8 = arith.truncf %0 : vector<12x128xf32> to vector<12x128xbf16>
    %c0_4 = arith.constant 0 : index
    %c0_5 = arith.constant 0 : index
    %9 = vector.load %arg2[%c0_4, %c0_5] : memref<128x128xf32, #tpu.memory_space<vmem>>, vector<128x128xf32>
    %10 = arith.truncf %9 : vector<128x128xf32> to vector<128x128xbf16>
    %cst_6 = arith.constant dense<0.000000e+00> : vector<12x128xf32>
    %11 = tpu.matmul %8, %10, %cst_6 {dimension_numbers = #tpu.dot_dimension_numbers<[1], [0], [0], [1], [0, 0, 1, 1], [], []>} : vector<12x128xbf16>, vector<128x128xbf16>, vector<12x128xf32> -> vector<12x128xf32>
    %cst_7 = arith.constant 1.000000e+01 : f32
    %12 = vector.broadcast %cst_7 : f32 to vector<12x128xf32>
    %13 = arith.mulf %11, %12 : vector<12x128xf32>
    %14 = tpu.iota {dimensions = array<i32: 1>} : vector<12x128xi32>
    %c32_i32 = arith.constant 32 : i32
    %15 = vector.broadcast %c32_i32 : i32 to vector<12x128xi32>
    %16 = arith.cmpi slt, %14, %15 : vector<12x128xi32>
    %cst_8 = arith.constant -1.000000e+30 : f32
    %17 = vector.broadcast %cst_8 : f32 to vector<12x128xf32>
    %18 = arith.select %16, %13, %17 : vector<12x128xi1>, vector<12x128xf32>
    %cst_9 = arith.constant dense<0xFF800000> : vector<12xf32>
    %19 = vector.multi_reduction <maximumf>, %18, %cst_9 [1] : vector<12x128xf32> to vector<12xf32>
    %20 = vector.shape_cast %19 : vector<12xf32> to vector<12x1xf32>
    %21 = arith.maximumf %7, %20 : vector<12x1xf32>
    %22 = arith.subf %7, %21 : vector<12x1xf32>
    %23 = math.exp %22 : vector<12x1xf32>
    %24 = vector.broadcast %21 : vector<12x1xf32> to vector<12x128xf32>
    %25 = arith.subf %18, %24 : vector<12x128xf32>
    %26 = math.exp %25 : vector<12x128xf32>
    %cst_10 = arith.constant dense<0.000000e+00> : vector<12xf32>
    %27 = vector.multi_reduction <add>, %26, %cst_10 [1] : vector<12x128xf32> to vector<12xf32>
    %28 = vector.shape_cast %27 : vector<12xf32> to vector<12x1xf32>
    %29 = arith.addf %23, %28 : vector<12x1xf32>
    %30 = math.log %29 : vector<12x1xf32>
    %31 = arith.addf %21, %30 : vector<12x1xf32>
    %32 = arith.subf %31, %7 : vector<12x1xf32>
    %33 = tpu.iota {dimensions = array<i32: 0>} : vector<12x1xi32>
    %c4_i32 = arith.constant 4 : i32
    %34 = vector.broadcast %c4_i32 : i32 to vector<12x1xi32>
    %35 = arith.cmpi slt, %33, %34 : vector<12x1xi32>
    %cst_11 = arith.constant 0.000000e+00 : f32
    %36 = vector.broadcast %cst_11 : f32 to vector<12x1xf32>
    %37 = arith.select %35, %32, %36 : vector<12x1xi1>, vector<12x1xf32>
    %38 = vector.shape_cast %37 : vector<12x1xf32> to vector<1x12x1xf32>
    %cst_12 = arith.constant dense<0.000000e+00> : vector<1xf32>
    %39 = vector.multi_reduction <add>, %38, %cst_12 [1, 2] : vector<1x12x1xf32> to vector<1xf32>
    %40 = vector.shape_cast %39 : vector<1xf32> to vector<1x1x1xf32>
    %41 = vector.extract %40[0, 0, 0] : f32 from vector<1x1x1xf32>
    %42 = vector.broadcast %41 : f32 to vector<1x1xf32>
    %cst_13 = arith.constant 2.500000e-01 : f32
    %43 = vector.broadcast %cst_13 : f32 to vector<1x1xf32>
    %44 = arith.mulf %42, %43 : vector<1x1xf32>
    %c4_i32_14 = arith.constant 4 : i32
    %45 = vector.broadcast %c4_i32_14 : i32 to vector<12x1xi32>
    %46 = arith.cmpi sge, %33, %45 : vector<12x1xi32>
    %c8_i32 = arith.constant 8 : i32
    %47 = vector.broadcast %c8_i32 : i32 to vector<12x1xi32>
    %48 = arith.cmpi slt, %33, %47 : vector<12x1xi32>
    %49 = arith.andi %46, %48 : vector<12x1xi1>
    %cst_15 = arith.constant 0.000000e+00 : f32
    %50 = vector.broadcast %cst_15 : f32 to vector<12x1xf32>
    %51 = arith.select %49, %32, %50 : vector<12x1xi1>, vector<12x1xf32>
    %52 = vector.shape_cast %51 : vector<12x1xf32> to vector<1x12x1xf32>
    %cst_16 = arith.constant dense<0.000000e+00> : vector<1xf32>
    %53 = vector.multi_reduction <add>, %52, %cst_16 [1, 2] : vector<1x12x1xf32> to vector<1xf32>
    %54 = vector.shape_cast %53 : vector<1xf32> to vector<1x1x1xf32>
    %55 = vector.extract %54[0, 0, 0] : f32 from vector<1x1x1xf32>
    %56 = vector.broadcast %55 : f32 to vector<1x1xf32>
    %cst_17 = arith.constant 2.500000e-01 : f32
    %57 = vector.broadcast %cst_17 : f32 to vector<1x1xf32>
    %58 = arith.mulf %56, %57 : vector<1x1xf32>
    %c8_i32_18 = arith.constant 8 : i32
    %59 = vector.broadcast %c8_i32_18 : i32 to vector<12x1xi32>
    %60 = arith.cmpi sge, %33, %59 : vector<12x1xi32>
    %cst_19 = arith.constant 0.000000e+00 : f32
    %61 = vector.broadcast %cst_19 : f32 to vector<12x1xf32>
    %62 = arith.select %60, %32, %61 : vector<12x1xi1>, vector<12x1xf32>
    %63 = vector.shape_cast %62 : vector<12x1xf32> to vector<1x12x1xf32>
    %cst_20 = arith.constant dense<0.000000e+00> : vector<1xf32>
    %64 = vector.multi_reduction <add>, %63, %cst_20 [1, 2] : vector<1x12x1xf32> to vector<1xf32>
    %65 = vector.shape_cast %64 : vector<1xf32> to vector<1x1x1xf32>
    %66 = vector.extract %65[0, 0, 0] : f32 from vector<1x1x1xf32>
    %67 = vector.broadcast %66 : f32 to vector<1x1xf32>
    %cst_21 = arith.constant 2.500000e-01 : f32
    %68 = vector.broadcast %cst_21 : f32 to vector<1x1xf32>
    %69 = arith.mulf %67, %68 : vector<1x1xf32>
    %70 = tpu.iota {dimensions = array<i32: 0>} : vector<3x128xi32>
    %c0_i32 = arith.constant 0 : i32
    %71 = vector.broadcast %c0_i32 : i32 to vector<3x128xi32>
    %72 = arith.cmpi eq, %70, %71 : vector<3x128xi32>
    %c1_i32 = arith.constant 1 : i32
    %73 = vector.broadcast %c1_i32 : i32 to vector<3x128xi32>
    %74 = arith.cmpi eq, %70, %73 : vector<3x128xi32>
    %75 = vector.shape_cast %58 : vector<1x1xf32> to vector<1x1xf32>
    %76 = vector.broadcast %75 : vector<1x1xf32> to vector<3x128xf32>
    %77 = vector.shape_cast %69 : vector<1x1xf32> to vector<1x1xf32>
    %78 = vector.broadcast %77 : vector<1x1xf32> to vector<3x128xf32>
    %79 = arith.select %74, %76, %78 : vector<3x128xi1>, vector<3x128xf32>
    %80 = vector.shape_cast %44 : vector<1x1xf32> to vector<1x1xf32>
    %81 = vector.broadcast %80 : vector<1x1xf32> to vector<3x128xf32>
    %82 = arith.select %72, %81, %79 : vector<3x128xi1>, vector<3x128xf32>
    %c0_22 = arith.constant 0 : index
    %c0_23 = arith.constant 0 : index
    %83 = vector.load %arg3[%c0_22, %c0_23] : memref<3x128xf32, #tpu.memory_space<vmem>>, vector<3x128xf32>
    tpu.vector_store %arg3[%c0_22, %c0_23], %82 {strides = array<i32>} : memref<3x128xf32, #tpu.memory_space<vmem>>, vector<3x128xf32>,
    return
  }
}

</mosaic_0001>

<bundles_post_ra>
// kernel: moco_forward.19
= control target key start
LH: loop header
LB: loop body
LE: loop exit
PB: predicated region body
PF: predicated region fallthrough
CT: control target
= control target key end

     0   :  { %vm138_vm0 = vcmask 1040384   ;;  %vm140_vm1 = vcmask 1041408   ;;  %vm142_vm2 = vcmask 1042432   ;;  %vm188_vm3 = vcmask 1043456   ;;  %s442_s1 = inlined_call_operand.vmem [shape: f32[128,128], index: 1, kind: input, shape index: {}]   ;;  %s443_s0 = inlined_call_operand.vmem [shape: f32[416,128], index: 0, kind: input, shape index: {}]   ;;  %s444_s2 = inlined_call_operand.vmem [shape: f32[1,128], index: 2, kind: input, shape index: {}]   ;;  %s445_s3 = inlined_call_operand.vmem [shape: f32[4,128], index: 3, kind: output, shape index: {}]  }
   0x1   :  { %v160_v0 = vld [vmem:[%s442_s1 + $0x70] sm:$0xff]  ;;  %v161_v1 = vld [vmem:[%s442_s1 + $0x78] sm:$0xff]  ;;  %v158_v2 = vld [vmem:[%s442_s1 + $0x60] sm:$0xff] }
   0x2   :  { %v169_v3 = vpack.c.bf16 %v161_v1, %v160_v0  ;;  %v159_v4 = vld [vmem:[%s442_s1 + $0x68] sm:$0xff]  ;;  %v156_v6 = vld [vmem:[%s442_s1 + $0x50] sm:$0xff]  ;;  %v157_v7 = vld [vmem:[%s442_s1 + $0x58] sm:$0xff] }
   0x3   :  { %v168_v5 = vpack.c.bf16 %v159_v4, %v158_v2  ;;  %v14_v8 = vld [vmem:[%s443_s0] sm:$0xff]  ;;  %v15_v9 = vld [vmem:[%s443_s0 + $0x8] sm:$0xff]  ;;  %v16_v10 = vld [vmem:[%s443_s0 + $0x10] sm:$0xff]  ;;  %v167_v12 = vpack.c.bf16 %v157_v7, %v156_v6 }
   0x4   :  { %174 = vmatpush.bf16.msra.mxu0 %v169_v3  ;;  %v27_v11 = vadd.f32 %v15_v9, %v14_v8  ;;  %v17_v13 = vld [vmem:[%s443_s0 + $0x18] sm:$0xff]  ;;  %v154_v14 = vld [vmem:[%s442_s1 + $0x40] sm:$0xff]  ;;  %v155_v15 = vld [vmem:[%s442_s1 + $0x48] sm:$0xff] }
   0x5   :  { %v18_v17 = vld [vmem:[%s443_s0 + $0x20] sm:$0xff]  ;;  %v45_v18 = vld [vmem:[%s443_s0 + $0xd0] sm:$0xff]  ;;  %v46_v20 = vld [vmem:[%s443_s0 + $0xd8] sm:$0xff]  ;;  %v166_v22 = vpack.c.bf16 %v155_v15, %v154_v14 }
   0x6   :  { %v28_v16 = vadd.f32 %v27_v11, %v16_v10  ;;  %v47_v21 = vld [vmem:[%s443_s0 + $0xe0] sm:$0xff]  ;;  %v19_v23 = vld [vmem:[%s443_s0 + $0x28] sm:$0xff]  ;;  %v58_v24 = vadd.f32 %v46_v20, %v45_v18  ;;  %v152_v25 = vld [vmem:[%s442_s1 + $0x30] sm:$0xff] }
   0x7   :  { %v153_v26 = vld [vmem:[%s442_s1 + $0x38] sm:$0xff]  ;;  %v48_v28 = vld [vmem:[%s443_s0 + $0xe8] sm:$0xff]  ;;  %v20_v29 = vld [vmem:[%s443_s0 + $0x30] sm:$0xff] }
   0x8   :  { %175 = vmatpush.bf16.msra.mxu0 %v168_v5  ;;  %v29_v19 = vadd.f32 %v28_v16, %v17_v13  ;;  %v49_v30 = vld [vmem:[%s443_s0 + $0xf0] sm:$0xff]  ;;  %v59_v31 = vadd.f32 %v58_v24, %v47_v21  ;;  %v76_v33 = vld [vmem:[%s443_s0 + $0x68] sm:$0xff]  ;;  %v78_v35 = vld [vmem:[%s443_s0 + $0x78] sm:$0xff]  ;;  %v165_v36 = vpack.c.bf16 %v153_v26, %v152_v25 }
   0x9   :  { %v77_v34 = vld [vmem:[%s443_s0 + $0x70] sm:$0xff]  ;;  %v150_v37 = vld [vmem:[%s442_s1 + $0x20] sm:$0xff]  ;;  %v21_v38 = vld [vmem:[%s443_s0 + $0x38] sm:$0xff] }
   0xa   :  { %v30_v27 = vadd.f32 %v29_v19, %v18_v17  ;;  %v60_v39 = vadd.f32 %v59_v31, %v48_v28  ;;  %v89_v40 = vadd.f32 %v77_v34, %v76_v33  ;;  %v151_v41 = vld [vmem:[%s442_s1 + $0x28] sm:$0xff]  ;;  %v50_v43 = vld [vmem:[%s443_s0 + $0xf8] sm:$0xff]  ;;  %v79_v44 = vld [vmem:[%s443_s0 + $0x80] sm:$0xff] }
   0xb   :  { %v22_v45 = vld [vmem:[%s443_s0 + $0x40] sm:$0xff]  ;;  %v148_v49 = vld [vmem:[%s442_s1 + $0x10] sm:$0xff]  ;;  %v80_v51 = vld [vmem:[%s443_s0 + $0x88] sm:$0xff]  ;;  %v164_v54 = vpack.c.bf16 %v151_v41, %v150_v37 }
   0xc   :  { %176 = vmatpush.bf16.msra.mxu0 %v167_v12  ;;  %v31_v32 = vadd.f32 %v30_v27, %v19_v23  ;;  %v51_v46 = vld [vmem:[%s443_s0 + $0x100] sm:$0xff]  ;;  %v61_v47 = vadd.f32 %v60_v39, %v49_v30  ;;  %v90_v48 = vadd.f32 %v89_v40, %v78_v35  ;;  %v107_v52 = vld [vmem:[%s443_s0 + $0x138] sm:$0xff]  ;;  %v23_v56 = vld [vmem:[%s443_s0 + $0x48] sm:$0xff] }
   0xd   :  { %v108_v53 = vld [vmem:[%s443_s0 + $0x140] sm:$0xff]  ;;  %v149_v55 = vld [vmem:[%s442_s1 + $0x18] sm:$0xff]  ;;  %v109_v59 = vld [vmem:[%s443_s0 + $0x148] sm:$0xff] }
   0xe   :  { %v32_v42 = vadd.f32 %v31_v32, %v20_v29  ;;  %v62_v57 = vadd.f32 %v61_v47, %v50_v43  ;;  %v91_v58 = vadd.f32 %v90_v48, %v79_v44  ;;  %v120_v60 = vadd.f32 %v108_v53, %v107_v52  ;;  %v52_v62 = vld [vmem:[%s443_s0 + $0x108] sm:$0xff]  ;;  %v81_v63 = vld [vmem:[%s443_s0 + $0x90] sm:$0xff]  ;;  %v82_v7 = vld [vmem:[%s443_s0 + $0x98] sm:$0xff] }
   0xf   :  { %v110_v0 = vld [vmem:[%s443_s0 + $0x150] sm:$0xff]  ;;  %v111_v8 = vld [vmem:[%s443_s0 + $0x158] sm:$0xff]  ;;  %v163_v9 = vpack.c.bf16 %v149_v55, %v148_v49  ;;  %v146_v10 = vld [vmem:[%s442_s1] sm:$0xff] }
  0x10   :  { %177 = vmatpush.bf16.msra.mxu0 %v166_v22  ;;  %v33_v50 = vadd.f32 %v32_v42, %v21_v38  ;;  %v24_v1 = vld [vmem:[%s443_s0 + $0x50] sm:$0xff]  ;;  %v63_v3 = vadd.f32 %v62_v57, %v51_v46  ;;  %v92_v4 = vadd.f32 %v91_v58, %v80_v51  ;;  %v121_v5 = vadd.f32 %v120_v60, %v109_v59  ;;  %v147_v11 = vld [vmem:[%s442_s1 + $0x8] sm:$0xff]  ;;  %v25_v12 = vld [vmem:[%s443_s0 + $0x58] sm:$0xff] }
  0x11   :  { %v53_v2 = vld [vmem:[%s443_s0 + $0x110] sm:$0xff]  ;;  %v54_v17 = vld [vmem:[%s443_s0 + $0x118] sm:$0xff]  ;;  %v83_v18 = vld [vmem:[%s443_s0 + $0xa0] sm:$0xff]  ;;  %v162_v28 = vpack.c.bf16 %v147_v11, %v146_v10 }
  0x12   :  { %v34_v61 = vadd.f32 %v33_v50, %v22_v45  ;;  %v64_v13 = vadd.f32 %v63_v3, %v52_v62  ;;  %v93_v14 = vadd.f32 %v92_v4, %v81_v63  ;;  %v122_v15 = vadd.f32 %v121_v5, %v110_v0  ;;  %v112_v19 = vld [vmem:[%s443_s0 + $0x160] sm:$0xff]  ;;  %v84_v26 = vld [vmem:[%s443_s0 + $0xa8] sm:$0xff]  ;;  %v85_v34 = vld [vmem:[%s443_s0 + $0xb0] sm:$0xff] }
  0x13   :  { %v26_v20 = vld [vmem:[%s443_s0 + $0x60] sm:$0xff]  ;;  %v113_v27 = vld [vmem:[%s443_s0 + $0x168] sm:$0xff]  ;;  %v114_v35 = vld [vmem:[%s443_s0 + $0x170] sm:$0xff] }
  0x14   :  { %178 = vmatpush.bf16.msra.mxu0 %v165_v36  ;;  %v35_v6 = vadd.f32 %v34_v61, %v23_v56  ;;  %v65_v21 = vadd.f32 %v64_v13, %v53_v2  ;;  %v94_v22 = vadd.f32 %v93_v14, %v82_v7  ;;  %v123_v23 = vadd.f32 %v122_v15, %v111_v8  ;;  %v55_v25 = vld [vmem:[%s443_s0 + $0x120] sm:$0xff]  ;;  %v56_v33 = vld [vmem:[%s443_s0 + $0x128] sm:$0xff]  ;;  %v57_v40 = vld [vmem:[%s443_s0 + $0x130] sm:$0xff] }
  0x15   :  { %v86_v41 = vld [vmem:[%s443_s0 + $0xb8] sm:$0xff]  ;;  %v87_v47 = vld [vmem:[%s443_s0 + $0xc0] sm:$0xff]  ;;  %v88_v53 = vld [vmem:[%s443_s0 + $0xc8] sm:$0xff] }
  0x16   :  { %v36_v16 = vadd.f32 %v35_v6, %v24_v1  ;;  %v66_v29 = vadd.f32 %v65_v21, %v54_v17  ;;  %v95_v30 = vadd.f32 %v94_v22, %v83_v18  ;;  %v124_v31 = vadd.f32 %v123_v23, %v112_v19  ;;  %v115_v42 = vld [vmem:[%s443_s0 + $0x178] sm:$0xff]  ;;  %v116_v48 = vld [vmem:[%s443_s0 + $0x180] sm:$0xff]  ;;  %v118_v58 = vld [vmem:[%s443_s0 + $0x190] sm:$0xff] }
  0x17   :  { %v119_v63 = vld [vmem:[%s443_s0 + $0x198] sm:$0xff] }
  0x18   :  { %179 = vmatpush.bf16.msra.mxu0 %v164_v54  ;;  %v37_v24 = vadd.f32 %v36_v16, %v25_v12  ;;  %v67_v36 = vadd.f32 %v66_v29, %v55_v25  ;;  %v96_v37 = vadd.f32 %v95_v30, %v84_v26  ;;  %v125_v38 = vadd.f32 %v124_v31, %v113_v27  ;;  %v117_v54 = vld [vmem:[%s443_s0 + $0x188] sm:$0xff]  ;;  %v209_v25 = vld [vmem:[%s444_s2] ss:$0 sm:$0xff] }
  0x1a   :  { %v38_v32 = vadd.f32 %v37_v24, %v26_v20  ;;  %v68_v43 = vadd.f32 %v67_v36, %v56_v33  ;;  %v97_v44 = vadd.f32 %v96_v37, %v85_v34  ;;  %v126_v45 = vadd.f32 %v125_v38, %v114_v35 }
  0x1c   :  { %180 = vmatpush.bf16.msra.mxu0 %v163_v9  ;;  %v39_v39 = vrot.slane %v38_v32, 4  ;;  %v69_v49 = vadd.f32 %v68_v43, %v57_v40  ;;  %v98_v50 = vadd.f32 %v97_v44, %v86_v41  ;;  %v127_v51 = vadd.f32 %v126_v45, %v115_v42 }
  0x1e   :  { %v40_v46 = vadd.f32 %v39_v39, %v38_v32  ;;  %v70_v55 = vrot.slane %v69_v49, 4  ;;  %v99_v56 = vadd.f32 %v98_v50, %v87_v47  ;;  %v128_v57 = vadd.f32 %v127_v51, %v116_v48 }
  0x20   :  { %181 = vmatpush.bf16.msra.mxu0 %v162_v28  ;;  %v41_v52 = vrot.slane %v40_v46, 2  ;;  %v71_v60 = vadd.f32 %v70_v55, %v69_v49  ;;  %v100_v61 = vadd.f32 %v99_v56, %v88_v53  ;;  %v129_v62 = vadd.f32 %v128_v57, %v117_v54 }
  0x22   :  { %v42_v59 = vadd.f32 %v41_v52, %v40_v46  ;;  %v72_v0 = vrot.slane %v71_v60, 2  ;;  %v101_v1 = vrot.slane %v100_v61, 4  ;;  %v130_v2 = vadd.f32 %v129_v62, %v118_v58 }
  0x24   :  { %v43_v3 = vrot.slane %v42_v59, 1  ;;  %v73_v4 = vadd.f32 %v72_v0, %v71_v60  ;;  %v102_v5 = vadd.f32 %v101_v1, %v100_v61  ;;  %v131_v6 = vadd.f32 %v130_v2, %v119_v63 }
  0x26   :  { %v74_v7 = vrot.slane %v73_v4, 1  ;;  %v103_v8 = vrot.slane %v102_v5, 2  ;;  %v132_v9 = vrot.slane %v131_v6, 4  ;;  %v44_v10 = vadd.f32 %v43_v3, %v42_v59 }
  0x28   :  { %v75_v11 = vadd.f32 %v74_v7, %v73_v4  ;;  %v104_v12 = vadd.f32 %v103_v8, %v102_v5  ;;  %v133_v13 = vadd.f32 %v132_v9, %v131_v6 }
  0x2a   :  { %v105_v14 = vrot.slane %v104_v12, 1  ;;  %v134_v15 = vrot.slane %v133_v13, 2  ;;  %v139_v18 = vsel %vm138_vm0, %v44_v10, %v75_v11 }
  0x2c   :  { %v106_v16 = vadd.f32 %v105_v14, %v104_v12  ;;  %v135_v17 = vadd.f32 %v134_v15, %v133_v13 }
  0x2e   :  { %v136_v19 = vrot.slane %v135_v17, 1  ;;  %v141_v20 = vsel %vm140_vm1, %v139_v18, %v106_v16 }
  0x30   :  { %v137_v21 = vadd.f32 %v136_v19, %v135_v17 }
  0x32   :  { %v143_v22 = vsel %vm142_vm2, %v141_v20, %v137_v21 }
  0x33   :  { %v144_v23 = vmul.f32 0.015625, %v143_v22 }
  0x35   :  { %v145_v24 = vpack.c.bf16 %v144_v23, %v144_v23 }
  0x37   :  { %182 = vmatmul.bf16.vlgmr.msra.gmra.mxu0 %v145_v24 }
  0xb4   :  { %v183_v26 = vpop.f32.mrf.mxu0 }
  0xb5   :  { %v184_v27 = vadd.f32 %v209_v25, %v183_v26 }
  0xb7   :  { %v187_v28 = vmul.f32 %v184_v27, %v184_v27 }
  0xb9   :  { %v189_v29 = vsel %vm188_vm3, %v187_v28, 0.0 }
  0xba   :  { %190 = vadd.xlane.f32.xlu0 %v189_v29 }
  0xbc   :  { %v185_v30 = vpop.f32.mrf.mxu0 }
 0x12d   :  { %v191_v31 = vpop.xlane.xlu0 %190 }
 0x12e   :  { %v192_v32 = vmax.f32 %v191_v31, 1e-24 }
 0x130   :  { %210 = vrsqrt.f32 %v192_v32  ;;  %vm199_vm5 = vweird.f32 %v192_v32 }
 0x136   :  { %v211_v33 = vpop.eup %210 }
 0x137   :  { %v194_v34 = vmul.f32 %v211_v33, %v192_v32  ;;  %vm200_vm4 = vweird.f32 %v211_v33 }
 0x138   :  { %vm201_vm6 = vmor %vm199_vm5, %vm200_vm4 }
 0x139   :  { %v195_v35 = vmul.f32 %v211_v33, %v194_v34 }
 0x13b   :  { %v196_v36 = vmul.f32 0.5, %v195_v35 }
 0x13d   :  { %v197_v37 = vsub.f32 1.5, %v196_v36 }
 0x13f   :  { %v198_v38 = vmul.f32 %v211_v33, %v197_v37 }
 0x141   :  { %v202_v39 = vsel %vm201_vm6, %v211_v33, %v198_v38 }
 0x142   :  { %v203_v40 = vmul.f32 %v202_v39, %v184_v27 }
 0x144   :  { %204 = vst [vmem:[%s445_s3] sm:$0xf] %v203_v40 }

// kernel: moco_forward.22
= control target key start
LH: loop header
LB: loop body
LE: loop exit
PB: predicated region body
PF: predicated region fallthrough
CT: control target
= control target key end

     0   :  { %vm20_vm0 = vcmask 1043456   ;;  %v72_v33 = vlaneseq  ;;  %vm118_vm4 = vcmask 7168   ;;  %vm120_vm5 = vcmask 3072   ;;  %s291_s2 = inlined_call_operand.vmem [shape: f32[128,128], index: 2, kind: input, shape index: {}]   ;;  %s292_s0 = inlined_call_operand.vmem [shape: f32[12,128], index: 0, kind: input, shape index: {}]   ;;  %s293_s1 = inlined_call_operand.vmem [shape: f32[4,128], index: 1, kind: input, shape index: {}]   ;;  %s294_s3 = inlined_call_operand.vmem [shape: f32[3,128], index: 3, kind: output, shape index: {}]  }
   0x1   :  { %v46_v0 = vld [vmem:[%s291_s2 + $0x70] sm:$0xff]  ;;  %v47_v1 = vld [vmem:[%s291_s2 + $0x78] sm:$0xff]  ;;  %v44_v2 = vld [vmem:[%s291_s2 + $0x60] sm:$0xff] }
   0x2   :  { %v55_v3 = vpack.c.bf16 %v47_v1, %v46_v0  ;;  %v45_v4 = vld [vmem:[%s291_s2 + $0x68] sm:$0xff]  ;;  %v42_v6 = vld [vmem:[%s291_s2 + $0x50] sm:$0xff]  ;;  %v43_v7 = vld [vmem:[%s291_s2 + $0x58] sm:$0xff]  ;;  %v73_v34 = vand.u32 127, %v72_v33  ;;  %v282_v1 = vshrl.u32 %v72_v33, 7 }
   0x3   :  { %v54_v5 = vpack.c.bf16 %v45_v4, %v44_v2  ;;  %v53_v8 = vpack.c.bf16 %v43_v7, %v42_v6  ;;  %v40_v9 = vld [vmem:[%s291_s2 + $0x40] sm:$0xff]  ;;  %v41_v10 = vld [vmem:[%s291_s2 + $0x48] sm:$0xff]  ;;  %v38_v12 = vld [vmem:[%s291_s2 + $0x30] sm:$0xff] }
   0x4   :  { %56 = vmatpush.bf16.msra.mxu0 %v55_v3  ;;  %v52_v11 = vpack.c.bf16 %v41_v10, %v40_v9  ;;  %v39_v13 = vld [vmem:[%s291_s2 + $0x38] sm:$0xff]  ;;  %v36_v15 = vld [vmem:[%s291_s2 + $0x20] sm:$0xff]  ;;  %v37_v16 = vld [vmem:[%s291_s2 + $0x28] sm:$0xff]  ;;  %vm74_vm1 = vcmp.lt.s32.totalorder %v73_v34, 32  ;;  %vm134_vm2 = vcmp.ge.s32.totalorder %v282_v1, 4  ;;  %vm114_vm3 = vcmp.lt.s32.totalorder %v282_v1, 4 }
   0x5   :  { %v51_v14 = vpack.c.bf16 %v39_v13, %v38_v12  ;;  %v50_v17 = vpack.c.bf16 %v37_v16, %v36_v15  ;;  %v34_v18 = vld [vmem:[%s291_s2 + $0x10] sm:$0xff]  ;;  %v35_v19 = vld [vmem:[%s291_s2 + $0x18] sm:$0xff]  ;;  %v32_v21 = vld [vmem:[%s291_s2] sm:$0xff]  ;;  %vm175_vm6 = vcmp.eq.s32.totalorder %v282_v1, 1  ;;  %vm174_vm7 = vcmp.eq.s32.totalorder %v282_v1, 0 }
   0x6   :  { %v49_v20 = vpack.c.bf16 %v35_v19, %v34_v18  ;;  %v33_v22 = vld [vmem:[%s291_s2 + $0x8] sm:$0xff]  ;;  %v14_v24 = vld [vmem:[%s292_s0] sm:$0xff] }
   0x7   :  { %v48_v23 = vpack.c.bf16 %v33_v22, %v32_v21  ;;  %v15_v25 = vld [vmem:[%s292_s0 + $0x8] sm:$0xf]  ;;  %v16_v27 = vld [vmem:[%s293_s1] sm:$0xf] }
   0x8   :  { %57 = vmatpush.bf16.msra.mxu0 %v54_v5  ;;  %v31_v26 = vpack.c.bf16 %v15_v25, %v14_v24  ;;  %v18_v28 = vrot.slane %v16_v27, 4  ;;  %v23_v31 = vmul.f32 %v16_v27, %v15_v25 }
   0xa   :  { %v21_v29 = vsel %vm20_vm0, %v16_v27, %v18_v28  ;;  %v26_v32 = vsel %vm20_vm0, %v23_v31, 0.0 }
   0xb   :  { %v22_v30 = vmul.f32 %v21_v29, %v14_v24 }
   0xc   :  { %58 = vmatpush.bf16.msra.mxu0 %v53_v8 }
   0xd   :  { %24 = vadd.xlane.f32.xlu0 %v22_v30 }
  0x10   :  { %59 = vmatpush.bf16.msra.mxu0 %v52_v11 }
  0x14   :  { %60 = vmatpush.bf16.msra.mxu0 %v51_v14 }
  0x15   :  { %27 = vadd.xlane.f32.xlu0 %v26_v32 }
  0x18   :  { %61 = vmatpush.bf16.msra.mxu0 %v50_v17 }
  0x1c   :  { %62 = vmatpush.bf16.msra.mxu0 %v49_v20 }
  0x20   :  { %63 = vmatpush.bf16.msra.mxu0 %v48_v23 }
  0x23   :  { %64 = vmatmul.bf16.vlgmr.msra.gmra.mxu0 %v31_v26 }
  0x80   :  { %v25_v42 = vpop.xlane.xlu0 %24 }
  0x81   :  { %v29_v43 = vmul.f32 10.0, %v25_v42 }
  0x88   :  { %v28_v46 = vpop.xlane.xlu0 %27 }
  0x89   :  { %v30_v49 = vmul.f32 10.0, %v28_v46 }
  0xa0   :  { %v65_v35 = vpop.f32.mrf.mxu0 }
  0xa1   :  { %v70_v36 = vmul.f32 10.0, %v65_v35 }
  0xa3   :  { %v75_v37 = vsel %vm74_vm1, %v70_v36, -1e+30 }
  0xa4   :  { %77 = vmax.xlane.f32.xlu1 %v75_v37 }
  0xa8   :  { %v67_v38 = vpop.f32.mrf.mxu0 }
  0xa9   :  { %v71_v39 = vmul.f32 10.0, %v67_v38 }
  0xab   :  { %v76_v40 = vsel %vm74_vm1, %v71_v39, -1e+30 }
  0xac   :  { %v79_v41 = vsel %vm20_vm0, %v76_v40, -inf }
  0xad   :  { %80 = vmax.xlane.f32.xlu1 %v79_v41 }
 0x117   :  { %v78_v44 = vpop.xlane.xlu1 %77 }
 0x118   :  { %v82_v45 = vmax.f32 %v29_v43, %v78_v44 }
 0x11a   :  { %v90_v47 = vsub.f32 %v75_v37, %v82_v45  ;;  %v84_v57 = vsub.f32 %v29_v43, %v82_v45 }
 0x11c   :  { %v92_v48 = vmul.f32 1.442695, %v90_v47  ;;  %v86_v58 = vmul.f32 1.442695, %v84_v57 }
 0x11e   :  { %189 = vpow2.f32 %v92_v48 }
 0x120   :  { %v81_v50 = vpop.xlane.xlu1 %80 }
 0x121   :  { %v83_v51 = vmax.f32 %v30_v49, %v81_v50 }
 0x123   :  { %v91_v52 = vsub.f32 %v76_v40, %v83_v51  ;;  %v85_v59 = vsub.f32 %v30_v49, %v83_v51 }
 0x124   :  { %v190_v53 = vpop.eup %189 }
 0x125   :  { %v94_v54 = vmul.f32 1.442695, %v91_v52  ;;  %96 = vadd.xlane.f32.xlu2 %v190_v53  ;;  %v88_v61 = vmul.f32 1.442695, %v85_v59 }
 0x127   :  { %191 = vpow2.f32 %v94_v54 }
 0x128   :  { %193 = vpow2.f32 %v86_v58 }
 0x12d   :  { %v192_v55 = vpop.eup %191 }
 0x12e   :  { %v98_v56 = vsel %vm20_vm0, %v192_v55, 0.0  ;;  %v194_v60 = vpop.eup %193 }
 0x12f   :  { %99 = vadd.xlane.f32.xlu2 %v98_v56 }
 0x198   :  { %v97_v62 = vpop.xlane.xlu2 %96 }
 0x199   :  { %v101_v63 = vadd.f32 %v194_v60, %v97_v62 }
 0x19b   :  { %195 = vlog2.f32 %v101_v63 }
 0x19c   :  { %197 = vpow2.f32 %v88_v61 }
 0x1a1   :  { %v196_v0 = vpop.eup %195 }
 0x1a2   :  { %v198_v2 = vpop.eup %197  ;;  %v104_v3 = vmul.f32 0.6931472, %v196_v0  ;;  %v100_v4 = vpop.xlane.xlu2 %99 }
 0x1a3   :  { %v102_v5 = vadd.f32 %v198_v2, %v100_v4 }
 0x1a4   :  { %v107_v6 = vadd.f32 %v104_v3, %v82_v45 }
 0x1a5   :  { %199 = vlog2.f32 %v102_v5 }
 0x1a6   :  { %v109_v7 = vsub.f32 %v107_v6, %v29_v43 }
 0x1a8   :  { %v140_v8 = vsel %vm134_vm2, %v109_v7, 0.0  ;;  %v116_v9 = vsel %vm114_vm3, %v109_v7, 0.0 }
 0x1a9   :  { %v142_v10 = vsel %vm118_vm4, %v140_v8, 0.0  ;;  %v119_v11 = vsel %vm118_vm4, %v116_v9, 0.0 }
 0x1aa   :  { %145 = vadd.xlane.f32.xlu1 %v142_v10  ;;  %123 = vadd.xlane.f32.xlu0 %v119_v11 }
 0x1ab   :  { %v200_v12 = vpop.eup %199 }
 0x1ac   :  { %v106_v13 = vmul.f32 0.6931472, %v200_v12 }
 0x1ae   :  { %v108_v14 = vadd.f32 %v106_v13, %v83_v51 }
 0x1b0   :  { %v110_v15 = vsub.f32 %v108_v14, %v30_v49 }
 0x1b2   :  { %v161_v16 = vsel %vm120_vm5, %v110_v15, 0.0 }
 0x1b3   :  { %163 = vadd.xlane.f32.xlu2 %v161_v16 }
 0x21d   :  { %v146_v17 = vpop.xlane.xlu1 %145  ;;  %v124_v18 = vpop.xlane.xlu0 %123 }
 0x21e   :  { %v147_v19 = vrot.slane %v146_v17, 4  ;;  %v125_v20 = vrot.slane %v124_v18, 4 }
 0x220   :  { %v148_v21 = vadd.f32 %v147_v19, %v146_v17  ;;  %v126_v22 = vadd.f32 %v125_v20, %v124_v18 }
 0x222   :  { %v149_v23 = vrot.slane %v148_v21, 2  ;;  %v127_v24 = vrot.slane %v126_v22, 2 }
 0x224   :  { %v150_v25 = vadd.f32 %v149_v23, %v148_v21  ;;  %v128_v26 = vadd.f32 %v127_v24, %v126_v22 }
 0x226   :  { %v164_v27 = vpop.xlane.xlu2 %163  ;;  %v129_v28 = vrot.slane %v128_v26, 1  ;;  %v151_v29 = vrot.slane %v150_v25, 1 }
 0x227   :  { %v165_v30 = vrot.slane %v164_v27, 4 }
 0x228   :  { %v130_v31 = vadd.f32 %v129_v28, %v128_v26  ;;  %v152_v32 = vadd.f32 %v151_v29, %v150_v25 }
 0x229   :  { %v166_v33 = vadd.f32 %v165_v30, %v164_v27 }
 0x22a   :  { %183 = vpush %v130_v31 }
 0x22b   :  { %v167_v34 = vrot.slane %v166_v33, 2  ;;  %185 = vpush %v152_v32 }
 0x22d   :  { %v168_v35 = vadd.f32 %v167_v34, %v166_v33 }
 0x22f   :  { %v169_v36 = vrot.slane %v168_v35, 1 }
 0x231   :  { %v170_v37 = vadd.f32 %v169_v36, %v168_v35 }
 0x233   :  { %187 = vpush %v170_v37 }
 0x25b   :  { %s184_s0 = spop %183 }
 0x25c   :  { %s186_s1 = spop %185  ;;  %v132_v39 = vstv %s184_s0 }
 0x25d   :  { %v154_v38 = vstv %s186_s1  ;;  %v133_v43 = vmul.f32 0.25, %v132_v39 }
 0x25e   :  { %v155_v41 = vmul.f32 0.25, %v154_v38 }
 0x264   :  { %s188_s2 = spop %187 }
 0x265   :  { %v172_v40 = vstv %s188_s2 }
 0x266   :  { %v173_v42 = vmul.f32 0.25, %v172_v40 }
 0x268   :  { %v176_v44 = vsel %vm175_vm6, %v155_v41, %v173_v42 }
 0x269   :  { %v177_v45 = vsel %vm174_vm7, %v133_v43, %v176_v44 }
 0x26a   :  { %178 = vst [vmem:[%s294_s3] sm:$0x7] %v177_v45 }

// kernel: moco_forward.18
= control target key start
LH: loop header
LB: loop body
LE: loop exit
PB: predicated region body
PF: predicated region fallthrough
CT: control target
= control target key end

     0   :  { %s3067_s18 = smov 0   ;;  %s4276_s0 = inlined_call_operand.vmem [shape: f32[464,8], index: 0, kind: input, shape index: {}]   ;;  %s4277_s1 = inlined_call_operand.vmem [shape: f32[72,128], index: 1, kind: input, shape index: {}]   ;;  %s4278_s2 = inlined_call_operand.vmem [shape: f32[1,128], index: 2, kind: input, shape index: {}]   ;;  %s4279_s3 = inlined_call_operand.vmem [shape: f32[1,128], index: 3, kind: input, shape index: {}]   ;;  %s4280_s4 = inlined_call_operand.vmem [shape: f32[208,1], index: 4, kind: input, shape index: {}]   ;;  %s4281_s5 = inlined_call_operand.vmem [shape: f32[416,128], index: 5, kind: output, shape index: {}]  }
   0x1 LB: > { %s2766_s19 = sadd.s32 4294967295, %s3034_s18   ;;  %p2770_p0 = scmp.ge.s32.totalorder %s3034_s18, 1  ;;  %s3034_s18 = sphi %s3067_s18, %s15_s18  }
   0x2   : > { %p188_p1 = scmp.lt.s32.totalorder %s3034_s18, 3 }
   0x4   : > { %p189_p2 = pnand %p2770_p0, %p188_p1 }
   0x6   : > { %192 = sbr.rel (%p189_p2) target bundleno = 772 (0x304), region = 40 }
   0xb   : > { %v281_v0 = vld [vmem:[%s4277_s1 + $0x8] sm:$0xff]  ;;  %s216_s22 = smul.u32 29, %s2766_s19  ;;  %v655_v1 = vld [vmem:[%s4277_s1 + $0x10] sm:$0xff]  ;;  %v254_v2 = vld [vmem:[%s4277_s1] sm:$0xff]  ;;  %vm282_vm0 = vcmask 64512  }
   0xc   : > { %3009 = vmatpush.msra.mxu1 %v281_v0  ;;  %3010 = vmatpush.msra.mxu2 %v281_v0  ;;  %v1107_v3 = vld [vmem:[%s4277_s1 + $0x20] sm:$0xff]  ;;  %v881_v4 = vld [vmem:[%s4277_s1 + $0x18] sm:$0xff]  ;;  %v1559_v21 = vld [vmem:[%s4277_s1 + $0x30] sm:$0xff] }
   0xd   : > { %p217_p3 = scmp.lt.s32.totalorder %s216_s22, 57  ;;  %376 = vmatpush.msra.mxu0 %v281_v0  ;;  %3011 = vmatpush.msra.mxu3 %v281_v0  ;;  %v1785_v22 = vld [vmem:[%s4277_s1 + $0x38] sm:$0xff]  ;;  %v1333_v23 = vld [vmem:[%s4277_s1 + $0x28] sm:$0xff]  ;;  %v2011_v28 = vld [vmem:[%s4277_s1 + $0x40] sm:$0xff] }
   0xe   : > { %749 = vmatpush.msrb.mxu2 %v655_v1  ;;  %549 = vmatpush.msrb.mxu1 %v254_v2 }
   0xf   : > { %s4341_s22 = smov (!%p217_p3, %s216_s22), 57  ;;  %1201 = vmatpush.msrb.mxu0 %v1107_v3  ;;  %975 = vmatpush.msrb.mxu3 %v881_v4 }
  0x10   : > { %s2771_s6 = sshll.u32 %s4341_s22, 3 }
  0x11   : > { %s3095_s9 = scalar_lea.vmem %s4276_s0, %s2771_s6 }
  0x12   : > { %v262_v5 = vld [vmem:[%s3095_s9 + $0x39] sm:$0xff]  ;;  %v269_v6 = vld [vmem:[%s3095_s9 + $0x71] sm:$0xff]  ;;  %v255_v7 = vld [vmem:[%s3095_s9 + $0x1] sm:$0xff] }
  0x13   : > { %2780 = vmatmul.msk.f32.vlgmr.msra.gmra.mxu1 %vm282_vm0, %v262_v5  ;;  %2787 = vmatmul.msk.f32.vlgmr.msra.gmra.mxu2 %vm282_vm0, %v269_v6  ;;  %v276_v8 = vld [vmem:[%s3095_s9 + $0xa9] sm:$0xff]  ;;  %v263_v9 = vld [vmem:[%s3095_s9 + $0x41] sm:$0xff]  ;;  %v270_v10 = vld [vmem:[%s3095_s9 + $0x79] sm:$0xff] }
  0x14   : > { %2773 = vmatmul.msk.f32.vlgmr.msra.gmra.mxu0 %vm282_vm0, %v255_v7  ;;  %2794 = vmatmul.msk.f32.vlgmr.msra.gmra.mxu3 %vm282_vm0, %v276_v8  ;;  %v256_v11 = vld [vmem:[%s3095_s9 + $0x9] sm:$0xff]  ;;  %v277_v12 = vld [vmem:[%s3095_s9 + $0xb1] sm:$0xff]  ;;  %v271_v14 = vld [vmem:[%s3095_s9 + $0x81] sm:$0xff] }
  0x15   : > { %v264_v13 = vld [vmem:[%s3095_s9 + $0x49] sm:$0xff]  ;;  %v257_v15 = vld [vmem:[%s3095_s9 + $0x11] sm:$0xff]  ;;  %v278_v16 = vld [vmem:[%s3095_s9 + $0xb9] sm:$0xff]  ;;  %1653 = vmatpush.msra.mxu2 %v1559_v21  ;;  %1427 = vmatpush.msra.mxu1 %v1333_v23 }
  0x16   : > { %v265_v17 = vld [vmem:[%s3095_s9 + $0x51] sm:$0xff]  ;;  %v272_v18 = vld [vmem:[%s3095_s9 + $0x89] sm:$0xff]  ;;  %v258_v19 = vld [vmem:[%s3095_s9 + $0x19] sm:$0xff]  ;;  %1879 = vmatpush.msra.mxu3 %v1785_v22  ;;  %2105 = vmatpush.msra.mxu0 %v2011_v28 }
  0x17   : > { %v279_v20 = vld [vmem:[%s3095_s9 + $0xc1] sm:$0xff]  ;;  %v266_v24 = vld [vmem:[%s3095_s9 + $0x59] sm:$0xff]  ;;  %v273_v25 = vld [vmem:[%s3095_s9 + $0x91] sm:$0xff] }
  0x18   : > { %v259_v26 = vld [vmem:[%s3095_s9 + $0x21] sm:$0xff]  ;;  %v280_v27 = vld [vmem:[%s3095_s9 + $0xc9] sm:$0xff]  ;;  %v274_v30 = vld [vmem:[%s3095_s9 + $0x99] sm:$0xff] }
  0x19   : > { %v267_v29 = vld [vmem:[%s3095_s9 + $0x61] sm:$0xff]  ;;  %v260_v31 = vld [vmem:[%s3095_s9 + $0x29] sm:$0xff]  ;;  %v261_v35 = vld [vmem:[%s3095_s9 + $0x31] sm:$0xff] }
  0x1a   : > { %v855_v32 = vld [vmem:[%s3095_s9 + $0xa] sm:$0xff]  ;;  %v275_v34 = vld [vmem:[%s3095_s9 + $0xa1] sm:$0xff]  ;;  %v856_v36 = vld [vmem:[%s3095_s9 + $0x12] sm:$0xff] }
  0x1b   : > { %2781 = vmatmul.msk.f32.gmra.mxu1 %vm282_vm0, %v263_v9  ;;  %2788 = vmatmul.msk.f32.gmra.mxu2 %vm282_vm0, %v270_v10  ;;  %v268_v33 = vld [vmem:[%s3095_s9 + $0x69] sm:$0xff]  ;;  %v228_v37 = vld [vmem:[%s3095_s9] sm:$0xff]  ;;  %v1082_v42 = vld [vmem:[%s3095_s9 + $0x13] sm:$0xff] }
  0x1c   : > { %2774 = vmatmul.msk.f32.gmra.mxu0 %vm282_vm0, %v256_v11  ;;  %2795 = vmatmul.msk.f32.gmra.mxu3 %vm282_vm0, %v277_v12  ;;  %v629_v38 = vld [vmem:[%s3095_s9 + $0x2] sm:$0xff]  ;;  %v1081_v39 = vld [vmem:[%s3095_s9 + $0xb] sm:$0xff]  ;;  %v857_v40 = vld [vmem:[%s3095_s9 + $0x1a] sm:$0xff] }
  0x1d   : > { %v229_v41 = vld [vmem:[%s3095_s9 + $0x8] sm:$0xff]  ;;  %v230_v44 = vld [vmem:[%s3095_s9 + $0x10] sm:$0xff]  ;;  %v1083_v45 = vld [vmem:[%s3095_s9 + $0x1b] sm:$0xff] }
  0x1e   : > { %v858_v43 = vld [vmem:[%s3095_s9 + $0x22] sm:$0xff]  ;;  %v859_v46 = vld [vmem:[%s3095_s9 + $0x2a] sm:$0xff]  ;;  %v231_v47 = vld [vmem:[%s3095_s9 + $0x18] sm:$0xff] }
  0x1f   : > { %v1084_v48 = vld [vmem:[%s3095_s9 + $0x23] sm:$0xff]  ;;  %v860_v49 = vld [vmem:[%s3095_s9 + $0x32] sm:$0xff]  ;;  %v861_v52 = vld [vmem:[%s3095_s9 + $0x3a] sm:$0xff] }
  0x20   : > { %v232_v50 = vld [vmem:[%s3095_s9 + $0x20] sm:$0xff]  ;;  %v1085_v51 = vld [vmem:[%s3095_s9 + $0x2b] sm:$0xff]  ;;  %v1086_v54 = vld [vmem:[%s3095_s9 + $0x33] sm:$0xff] }
  0x21   : > { %v233_v53 = vld [vmem:[%s3095_s9 + $0x28] sm:$0xff]  ;;  %v234_v56 = vld [vmem:[%s3095_s9 + $0x30] sm:$0xff]  ;;  %v1087_v57 = vld [vmem:[%s3095_s9 + $0x3b] sm:$0xff] }
  0x22   : > { %v862_v55 = vld [vmem:[%s3095_s9 + $0x42] sm:$0xff]  ;;  %v863_v58 = vld [vmem:[%s3095_s9 + $0x4a] sm:$0xff]  ;;  %v235_v59 = vld [vmem:[%s3095_s9 + $0x38] sm:$0xff] }
  0x23   : > { %2782 = vmatmul.msk.f32.gmra.mxu1 %vm282_vm0, %v264_v13  ;;  %2789 = vmatmul.msk.f32.gmra.mxu2 %vm282_vm0, %v271_v14  ;;  %v1088_v60 = vld [vmem:[%s3095_s9 + $0x43] sm:$0xff]  ;;  %v864_v61 = vld [vmem:[%s3095_s9 + $0x52] sm:$0xff]  ;;  %v865_v0 = vld [vmem:[%s3095_s9 + $0x5a] sm:$0xff] }
  0x24   : > { %2775 = vmatmul.msk.f32.gmra.mxu0 %vm282_vm0, %v257_v15  ;;  %2796 = vmatmul.msk.f32.gmra.mxu3 %vm282_vm0, %v278_v16  ;;  %v236_v62 = vld [vmem:[%s3095_s9 + $0x40] sm:$0xff]  ;;  %v1089_v63 = vld [vmem:[%s3095_s9 + $0x4b] sm:$0xff]  ;;  %v1090_v4 = vld [vmem:[%s3095_s9 + $0x53] sm:$0xff] }
  0x25   : > { %v237_v2 = vld [vmem:[%s3095_s9 + $0x48] sm:$0xff]  ;;  %v238_v8 = vld [vmem:[%s3095_s9 + $0x50] sm:$0xff]  ;;  %v1091_v11 = vld [vmem:[%s3095_s9 + $0x5b] sm:$0xff] }
  0x26   : > { %v866_v5 = vld [vmem:[%s3095_s9 + $0x62] sm:$0xff]  ;;  %v867_v12 = vld [vmem:[%s3095_s9 + $0x6a] sm:$0xff]  ;;  %v239_v15 = vld [vmem:[%s3095_s9 + $0x58] sm:$0xff] }
  0x27   : > { %v240_v22 = vld [vmem:[%s3095_s9 + $0x60] sm:$0xff] }
  0x2b   : > { %2783 = vmatmul.msk.f32.gmra.mxu1 %vm282_vm0, %v265_v17  ;;  %2790 = vmatmul.msk.f32.gmra.mxu2 %vm282_vm0, %v272_v18  ;;  %v1092_v18 = vld [vmem:[%s3095_s9 + $0x63] sm:$0xff] }
  0x2c   : > { %2776 = vmatmul.msk.f32.gmra.mxu0 %vm282_vm0, %v258_v19  ;;  %2797 = vmatmul.msk.f32.gmra.mxu3 %vm282_vm0, %v279_v20  ;;  %v868_v19 = vld [vmem:[%s3095_s9 + $0x72] sm:$0xff] }
  0x33   : > { %2784 = vmatmul.msk.f32.gmra.mxu1 %vm282_vm0, %v266_v24  ;;  %2791 = vmatmul.msk.f32.gmra.mxu2 %vm282_vm0, %v273_v25  ;;  %v1093_v25 = vld [vmem:[%s3095_s9 + $0x6b] sm:$0xff] }
  0x34   : > { %2777 = vmatmul.msk.f32.gmra.mxu0 %vm282_vm0, %v259_v26  ;;  %2798 = vmatmul.msk.f32.gmra.mxu3 %vm282_vm0, %v280_v27  ;;  %v869_v26 = vld [vmem:[%s3095_s9 + $0x7a] sm:$0xff] }
  0x3b   : > { %2785 = vmatmul.msk.f32.gmra.mxu1 %vm282_vm0, %v267_v29  ;;  %2792 = vmatmul.msk.f32.gmra.mxu2 %vm282_vm0, %v274_v30  ;;  %v241_v29 = vld [vmem:[%s3095_s9 + $0x68] sm:$0xff] }
  0x3c   : > { %2778 = vmatmul.msk.f32.gmra.mxu0 %vm282_vm0, %v260_v31  ;;  %2851 = vmatmul.msk.f32.vlgmr.msrb.gmra.mxu3 %vm282_vm0, %v855_v32 }
  0x43   : > { %2786 = vmatmul.msk.f32.gmra.mxu1 %vm282_vm0, %v268_v33  ;;  %2793 = vmatmul.msk.f32.gmra.mxu2 %vm282_vm0, %v275_v34  ;;  %v870_v33 = vld [vmem:[%s3095_s9 + $0x82] sm:$0xff] }
  0x44   : > { %2779 = vmatmul.msk.f32.gmra.mxu0 %vm282_vm0, %v261_v35  ;;  %2852 = vmatmul.msk.f32.gmra.mxu3 %vm282_vm0, %v856_v36 }
  0x4b   : > { %2799 = vmatmul.msk.f32.vlgmr.msrb.gmra.mxu1 %vm282_vm0, %v228_v37  ;;  %2825 = vmatmul.msk.f32.vlgmr.msrb.gmra.mxu2 %vm282_vm0, %v629_v38 }
  0x4c   : > { %2877 = vmatmul.msk.f32.vlgmr.msrb.gmra.mxu0 %vm282_vm0, %v1081_v39  ;;  %2853 = vmatmul.msk.f32.gmra.mxu3 %vm282_vm0, %v857_v40  ;;  %v1095_v39 = vld [vmem:[%s3095_s9 + $0x7b] sm:$0xff] }
  0x53   : > { %2800 = vmatmul.msk.f32.gmra.mxu1 %vm282_vm0, %v229_v41  ;;  %2826 = vmatmul.msk.f32.gmra.mxu2 %vm282_vm0, %v855_v32  ;;  %v1094_v32 = vld [vmem:[%s3095_s9 + $0x73] sm:$0xff] }
  0x54   : > { %2878 = vmatmul.msk.f32.gmra.mxu0 %vm282_vm0, %v1082_v42  ;;  %2854 = vmatmul.msk.f32.gmra.mxu3 %vm282_vm0, %v858_v43 }
  0x5b   : > { %2801 = vmatmul.msk.f32.gmra.mxu1 %vm282_vm0, %v230_v44  ;;  %2827 = vmatmul.msk.f32.gmra.mxu2 %vm282_vm0, %v856_v36  ;;  %v242_v36 = vld [vmem:[%s3095_s9 + $0x70] sm:$0xff] }
  0x5c   : > { %2879 = vmatmul.msk.f32.gmra.mxu0 %vm282_vm0, %v1083_v45  ;;  %2855 = vmatmul.msk.f32.gmra.mxu3 %vm282_vm0, %v859_v46 }
  0x63   : > { %2802 = vmatmul.msk.f32.gmra.mxu1 %vm282_vm0, %v231_v47  ;;  %2828 = vmatmul.msk.f32.gmra.mxu2 %vm282_vm0, %v857_v40  ;;  %v871_v40 = vld [vmem:[%s3095_s9 + $0x8a] sm:$0xff]  ;;  %v872_v47 = vld [vmem:[%s3095_s9 + $0x92] sm:$0xff] }
  0x64   : > { %2880 = vmatmul.msk.f32.gmra.mxu0 %vm282_vm0, %v1084_v48  ;;  %2856 = vmatmul.msk.f32.gmra.mxu3 %vm282_vm0, %v860_v49 }
  0x6b   : > { %2803 = vmatmul.msk.f32.gmra.mxu1 %vm282_vm0, %v232_v50  ;;  %2829 = vmatmul.msk.f32.gmra.mxu2 %vm282_vm0, %v858_v43  ;;  %v243_v43 = vld [vmem:[%s3095_s9 + $0x78] sm:$0xff]  ;;  %v244_v50 = vld [vmem:[%s3095_s9 + $0x80] sm:$0xff] }
  0x6c   : > { %2881 = vmatmul.msk.f32.gmra.mxu0 %vm282_vm0, %v1085_v51  ;;  %2857 = vmatmul.msk.f32.gmra.mxu3 %vm282_vm0, %v861_v52 }
  0x73   : > { %2804 = vmatmul.msk.f32.gmra.mxu1 %vm282_vm0, %v233_v53  ;;  %2830 = vmatmul.msk.f32.gmra.mxu2 %vm282_vm0, %v859_v46  ;;  %v1096_v46 = vld [vmem:[%s3095_s9 + $0x83] sm:$0xff]  ;;  %v1097_v53 = vld [vmem:[%s3095_s9 + $0x8b] sm:$0xff] }
  0x74   : > { %2882 = vmatmul.msk.f32.gmra.mxu0 %vm282_vm0, %v1086_v54  ;;  %2858 = vmatmul.msk.f32.gmra.mxu3 %vm282_vm0, %v862_v55  ;;  %v873_v54 = vld [vmem:[%s3095_s9 + $0x9a] sm:$0xff] }
  0x7b   : > { %2805 = vmatmul.msk.f32.gmra.mxu1 %vm282_vm0, %v234_v56  ;;  %2831 = vmatmul.msk.f32.gmra.mxu2 %vm282_vm0, %v860_v49 }
  0x7c   : > { %2883 = vmatmul.msk.f32.gmra.mxu0 %vm282_vm0, %v1087_v57  ;;  %2859 = vmatmul.msk.f32.gmra.mxu3 %vm282_vm0, %v863_v58 }
  0x83   : > { %2806 = vmatmul.msk.f32.gmra.mxu1 %vm282_vm0, %v235_v59  ;;  %2832 = vmatmul.msk.f32.gmra.mxu2 %vm282_vm0, %v861_v52  ;;  %v245_v59 = vld [vmem:[%s3095_s9 + $0x88] sm:$0xff] }
  0x84   : > { %2884 = vmatmul.msk.f32.gmra.mxu0 %vm282_vm0, %v1088_v60  ;;  %2860 = vmatmul.msk.f32.gmra.mxu3 %vm282_vm0, %v864_v61 }
  0x8b   : > { %2807 = vmatmul.msk.f32.gmra.mxu1 %vm282_vm0, %v236_v62  ;;  %2833 = vmatmul.msk.f32.gmra.mxu2 %vm282_vm0, %v862_v55 }
  0x8c   : > { %2885 = vmatmul.msk.f32.gmra.mxu0 %vm282_vm0, %v1089_v63  ;;  %2861 = vmatmul.msk.f32.gmra.mxu3 %vm282_vm0, %v865_v0  ;;  %v1098_v63 = vld [vmem:[%s3095_s9 + $0x93] sm:$0xff] }
  0x90   : > { %v3229_v1 = vpop.f32.mrf.mxu1 }
  0x91   : > { %v3232_v3 = vpop.f32.mrf.mxu0 }
  0x93   : > { %2808 = vmatmul.msk.f32.gmra.mxu1 %vm282_vm0, %v237_v2  ;;  %2834 = vmatmul.msk.f32.gmra.mxu2 %vm282_vm0, %v863_v58 }
  0x94   : > { %2886 = vmatmul.msk.f32.gmra.mxu0 %vm282_vm0, %v1090_v4  ;;  %2862 = vmatmul.msk.f32.gmra.mxu3 %vm282_vm0, %v866_v5 }
  0x96   : > { %v3240_v6 = vpop.f32.mrf.mxu2 }
  0x97   : > { %v3245_v9 = vpop.f32.mrf.mxu3 }
  0x98   : > { %v3242_v7 = vpop.f32.mrf.mxu1 }
  0x99   : > { %v3247_v10 = vpop.f32.mrf.mxu0 }
  0x9b   : > { %2809 = vmatmul.msk.f32.gmra.mxu1 %vm282_vm0, %v238_v8  ;;  %2835 = vmatmul.msk.f32.gmra.mxu2 %vm282_vm0, %v864_v61 }
  0x9c   : > { %2887 = vmatmul.msk.f32.gmra.mxu0 %vm282_vm0, %v1091_v11  ;;  %2863 = vmatmul.msk.f32.gmra.mxu3 %vm282_vm0, %v867_v12  ;;  %v246_v11 = vld [vmem:[%s3095_s9 + $0x90] sm:$0xff] }
  0x9e   : > { %v3255_v13 = vpop.f32.mrf.mxu2 }
  0x9f   : > { %v3260_v16 = vpop.f32.mrf.mxu3 }
  0xa0   : > { %v3257_v14 = vpop.f32.mrf.mxu1 }
  0xa1   : > { %v3262_v17 = vpop.f32.mrf.mxu0 }
  0xa3   : > { %2810 = vmatmul.msk.f32.gmra.mxu1 %vm282_vm0, %v239_v15  ;;  %2836 = vmatmul.msk.f32.gmra.mxu2 %vm282_vm0, %v865_v0  ;;  %v874_v0 = vld [vmem:[%s3095_s9 + $0xa2] sm:$0xff] }
  0xa4   : > { %2888 = vmatmul.msk.f32.gmra.mxu0 %vm282_vm0, %v1092_v18  ;;  %2864 = vmatmul.msk.f32.gmra.mxu3 %vm282_vm0, %v868_v19 }
  0xa6   : > { %v3270_v20 = vpop.f32.mrf.mxu2 }
  0xa7   : > { %v3275_v23 = vpop.f32.mrf.mxu3 }
  0xa8   : > { %v3272_v21 = vpop.f32.mrf.mxu1 }
  0xa9   : > { %v3277_v24 = vpop.f32.mrf.mxu0 }
  0xab   : > { %2811 = vmatmul.msk.f32.gmra.mxu1 %vm282_vm0, %v240_v22  ;;  %2837 = vmatmul.msk.f32.gmra.mxu2 %vm282_vm0, %v866_v5  ;;  %v875_v22 = vld [vmem:[%s3095_s9 + $0xaa] sm:$0xff] }
  0xac   : > { %2889 = vmatmul.msk.f32.gmra.mxu0 %vm282_vm0, %v1093_v25  ;;  %2865 = vmatmul.msk.f32.gmra.mxu3 %vm282_vm0, %v869_v26 }
  0xae   : > { %v3285_v27 = vpop.f32.mrf.mxu2 }
  0xaf   : > { %v3290_v30 = vpop.f32.mrf.mxu3 }
  0xb0   : > { %v3287_v28 = vpop.f32.mrf.mxu1 }
  0xb1   : > { %v3292_v31 = vpop.f32.mrf.mxu0 }
  0xb3   : > { %2812 = vmatmul.msk.f32.gmra.mxu1 %vm282_vm0, %v241_v29  ;;  %2838 = vmatmul.msk.f32.gmra.mxu2 %vm282_vm0, %v867_v12 }
  0xb4   : > { %2890 = vmatmul.msk.f32.gmra.mxu0 %vm282_vm0, %v1094_v32  ;;  %2866 = vmatmul.msk.f32.gmra.mxu3 %vm282_vm0, %v870_v33 }
  0xb6   : > { %v3300_v34 = vpop.f32.mrf.mxu2 }
  0xb7   : > { %v3305_v37 = vpop.f32.mrf.mxu3 }
  0xb8   : > { %v3302_v35 = vpop.f32.mrf.mxu1 }
  0xb9   : > { %v3307_v38 = vpop.f32.mrf.mxu0 }
  0xbb   : > { %2813 = vmatmul.msk.f32.gmra.mxu1 %vm282_vm0, %v242_v36  ;;  %2839 = vmatmul.msk.f32.gmra.mxu2 %vm282_vm0, %v868_v19  ;;  %v1099_v19 = vld [vmem:[%s3095_s9 + $0x9b] sm:$0xff] }
  0xbc   : > { %2891 = vmatmul.msk.f32.gmra.mxu0 %vm282_vm0, %v1095_v39  ;;  %2867 = vmatmul.msk.f32.gmra.mxu3 %vm282_vm0, %v871_v40 }
  0xbe   : > { %v3315_v41 = vpop.f32.mrf.mxu2 }
  0xbf   : > { %v977_v44 = vpop.f32.mrf.mxu3 }
  0xc0   : > { %v3317_v42 = vpop.f32.mrf.mxu1 }
  0xc1   : > { %v3320_v45 = vpop.f32.mrf.mxu0 }
  0xc3   : > { %2814 = vmatmul.msk.f32.gmra.mxu1 %vm282_vm0, %v243_v43  ;;  %2840 = vmatmul.msk.f32.gmra.mxu2 %vm282_vm0, %v869_v26  ;;  %v1100_v43 = vld [vmem:[%s3095_s9 + $0xa3] sm:$0xff] }
  0xc4   : > { %2892 = vmatmul.msk.f32.gmra.mxu0 %vm282_vm0, %v1096_v46  ;;  %2868 = vmatmul.msk.f32.gmra.mxu3 %vm282_vm0, %v872_v47 }
  0xc6   : > { %v3328_v48 = vpop.f32.mrf.mxu2 }
  0xc7   : > { %v980_v51 = vpop.f32.mrf.mxu3 }
  0xc8   : > { %v551_v49 = vpop.f32.mrf.mxu1 }
  0xc9   : > { %v1203_v52 = vpop.f32.mrf.mxu0  ;;  %v552_v55 = vadd.f32 %v551_v49, %v3232_v3 }
  0xcb   : > { %2815 = vmatmul.msk.f32.gmra.mxu1 %vm282_vm0, %v244_v50  ;;  %2841 = vmatmul.msk.f32.gmra.mxu2 %vm282_vm0, %v870_v33  ;;  %v247_v33 = vld [vmem:[%s3095_s9 + $0x98] sm:$0xff] }
  0xcc   : > { %2893 = vmatmul.msk.f32.gmra.mxu0 %vm282_vm0, %v1097_v53  ;;  %2869 = vmatmul.msk.f32.gmra.mxu3 %vm282_vm0, %v873_v54 }
  0xce   : > { %v751_v56 = vpop.f32.mrf.mxu2 }
  0xcf   : > { %v829_v57 = vadd.f32 %v751_v56, %v552_v55  ;;  %v983_v60 = vpop.f32.mrf.mxu3  ;;  %v1101_v56 = vld [vmem:[%s3095_s9 + $0xab] sm:$0xff] }
  0xd0   : > { %v554_v58 = vpop.f32.mrf.mxu1 }
  0xd1   : > { %v1055_v61 = vadd.f32 %v977_v44, %v829_v57  ;;  %v1206_v62 = vpop.f32.mrf.mxu0  ;;  %v555_v3 = vadd.f32 %v554_v58, %v3247_v10  ;;  %v876_v44 = vld [vmem:[%s3095_s9 + $0xb2] sm:$0xff]  ;;  %v877_v57 = vld [vmem:[%s3095_s9 + $0xba] sm:$0xff] }
  0xd3   : > { %v3341_v2 = vadd.f32 %v1203_v52, %v1055_v61  ;;  %2816 = vmatmul.msk.f32.gmra.mxu1 %vm282_vm0, %v245_v59  ;;  %2842 = vmatmul.msk.f32.gmra.mxu2 %vm282_vm0, %v871_v40  ;;  %v249_v61 = vld [vmem:[%s3095_s9 + $0xa8] sm:$0xff] }
  0xd4   : > { %2894 = vmatmul.msk.f32.gmra.mxu0 %vm282_vm0, %v1098_v63  ;;  %2870 = vmatmul.msk.f32.gmra.mxu3 %vm282_vm0, %v874_v0 }
  0xd6   : > { %v754_v4 = vpop.f32.mrf.mxu2 }
  0xd7   : > { %v830_v5 = vadd.f32 %v754_v4, %v555_v3  ;;  %v986_v12 = vpop.f32.mrf.mxu3  ;;  %v1102_v4 = vld [vmem:[%s3095_s9 + $0xb3] sm:$0xff] }
  0xd8   : > { %v557_v8 = vpop.f32.mrf.mxu1 }
  0xd9   : > { %v1056_v15 = vadd.f32 %v980_v51, %v830_v5  ;;  %v1209_v18 = vpop.f32.mrf.mxu0  ;;  %v558_v10 = vadd.f32 %v557_v8, %v3262_v17  ;;  %v248_v51 = vld [vmem:[%s3095_s9 + $0xa0] sm:$0xff] }
  0xda   : > { %v878_v5 = vld [vmem:[%s3095_s9 + $0xc2] sm:$0xff] }
  0xdb   : > { %v3351_v25 = vadd.f32 %v1206_v62, %v1056_v15  ;;  %2817 = vmatmul.msk.f32.gmra.mxu1 %vm282_vm0, %v246_v11  ;;  %2843 = vmatmul.msk.f32.gmra.mxu2 %vm282_vm0, %v872_v47  ;;  %v250_v15 = vld [vmem:[%s3095_s9 + $0xb0] sm:$0xff] }
  0xdc   : > { %2895 = vmatmul.msk.f32.gmra.mxu0 %vm282_vm0, %v1099_v19  ;;  %2871 = vmatmul.msk.f32.gmra.mxu3 %vm282_vm0, %v875_v22 }
  0xde   : > { %v757_v26 = vpop.f32.mrf.mxu2 }
  0xdf   : > { %v831_v29 = vadd.f32 %v757_v26, %v558_v10  ;;  %v989_v36 = vpop.f32.mrf.mxu3  ;;  %v1103_v26 = vld [vmem:[%s3095_s9 + $0xbb] sm:$0xff] }
  0xe0   : > { %v560_v32 = vpop.f32.mrf.mxu1 }
  0xe1   : > { %v1057_v39 = vadd.f32 %v983_v60, %v831_v29  ;;  %v1212_v40 = vpop.f32.mrf.mxu0  ;;  %v561_v17 = vadd.f32 %v560_v32, %v3277_v24  ;;  %v879_v29 = vld [vmem:[%s3095_s9 + $0xca] sm:$0xff] }
  0xe3   : > { %v3361_v46 = vadd.f32 %v1209_v18, %v1057_v39  ;;  %2818 = vmatmul.msk.f32.gmra.mxu1 %vm282_vm0, %v247_v33  ;;  %2844 = vmatmul.msk.f32.gmra.mxu2 %vm282_vm0, %v873_v54  ;;  %v251_v39 = vld [vmem:[%s3095_s9 + $0xb8] sm:$0xff] }
  0xe4   : > { %2896 = vmatmul.msk.f32.gmra.mxu0 %vm282_vm0, %v1100_v43  ;;  %2872 = vmatmul.msk.f32.gmra.mxu3 %vm282_vm0, %v876_v44 }
  0xe6   : > { %v760_v47 = vpop.f32.mrf.mxu2 }
  0xe7   : > { %v832_v49 = vadd.f32 %v760_v47, %v561_v17  ;;  %v992_v52 = vpop.f32.mrf.mxu3  ;;  %v1104_v47 = vld [vmem:[%s3095_s9 + $0xc3] sm:$0xff] }
  0xe8   : > { %v563_v50 = vpop.f32.mrf.mxu1 }
  0xe9   : > { %v1058_v53 = vadd.f32 %v986_v12, %v832_v49  ;;  %v1215_v55 = vpop.f32.mrf.mxu0  ;;  %v564_v24 = vadd.f32 %v563_v50, %v3292_v31  ;;  %v880_v49 = vld [vmem:[%s3095_s9 + $0xd2] sm:$0xff] }
  0xeb   : > { %v3371_v58 = vadd.f32 %v1212_v40, %v1058_v53  ;;  %2819 = vmatmul.msk.f32.gmra.mxu1 %vm282_vm0, %v248_v51  ;;  %2845 = vmatmul.msk.f32.gmra.mxu2 %vm282_vm0, %v874_v0  ;;  %v252_v53 = vld [vmem:[%s3095_s9 + $0xc0] sm:$0xff] }
  0xec   : > { %2897 = vmatmul.msk.f32.gmra.mxu0 %vm282_vm0, %v1101_v56  ;;  %2873 = vmatmul.msk.f32.gmra.mxu3 %vm282_vm0, %v877_v57 }
  0xee   : > { %v763_v54 = vpop.f32.mrf.mxu2 }
  0xef   : > { %v833_v59 = vadd.f32 %v763_v54, %v564_v24  ;;  %v995_v62 = vpop.f32.mrf.mxu3  ;;  %v1105_v54 = vld [vmem:[%s3095_s9 + $0xcb] sm:$0xff] }
  0xf0   : > { %v566_v60 = vpop.f32.mrf.mxu1 }
  0xf1   : > { %v1059_v63 = vadd.f32 %v989_v36, %v833_v59  ;;  %v1218_v3 = vpop.f32.mrf.mxu0  ;;  %v567_v31 = vadd.f32 %v566_v60, %v3307_v38  ;;  %v1759_v59 = vld [vmem:[%s3095_s9 + $0x15] sm:$0xff] }
  0xf3   : > { %v3381_v8 = vadd.f32 %v1215_v55, %v1059_v63  ;;  %2820 = vmatmul.msk.f32.gmra.mxu1 %vm282_vm0, %v249_v61  ;;  %2846 = vmatmul.msk.f32.gmra.mxu2 %vm282_vm0, %v875_v22  ;;  %v253_v63 = vld [vmem:[%s3095_s9 + $0xc8] sm:$0xff] }
  0xf4   : > { %2898 = vmatmul.msk.f32.gmra.mxu0 %vm282_vm0, %v1102_v4  ;;  %2874 = vmatmul.msk.f32.gmra.mxu3 %vm282_vm0, %v878_v5 }
  0xf6   : > { %v766_v0 = vpop.f32.mrf.mxu2 }
  0xf7   : > { %v834_v11 = vadd.f32 %v766_v0, %v567_v31  ;;  %v998_v18 = vpop.f32.mrf.mxu3  ;;  %v1106_v0 = vld [vmem:[%s3095_s9 + $0xd3] sm:$0xff] }
  0xf8   : > { %v569_v12 = vpop.f32.mrf.mxu1 }
  0xf9   : > { %v1060_v19 = vadd.f32 %v992_v52, %v834_v11  ;;  %v1221_v10 = vpop.f32.mrf.mxu0  ;;  %v570_v38 = vadd.f32 %v569_v12, %v3320_v45  ;;  %v3036_v11 = vmov 0  }
  0xfa   : > { %3021 = vset.pattern.permute.xlu0 %v3036_v11  ;;  %3022 = vset.pattern.permute.xlu1 %v3036_v11 }
  0xfb   : > { %v3391_v32 = vadd.f32 %v1218_v3, %v1060_v19  ;;  %2821 = vmatmul.msk.f32.gmra.mxu1 %vm282_vm0, %v250_v15  ;;  %2847 = vmatmul.msk.f32.gmra.mxu2 %vm282_vm0, %v876_v44 }
  0xfc   : > { %2899 = vmatmul.msk.f32.gmra.mxu0 %vm282_vm0, %v1103_v26  ;;  %2875 = vmatmul.msk.f32.gmra.mxu3 %vm282_vm0, %v879_v29  ;;  %v1307_v26 = vld [vmem:[%s3095_s9 + $0xc] sm:$0xff] }
  0xfd   : > { %3023 = vset.pattern.permute.xlu2 %v3036_v11 }
  0xfe   : > { %v769_v22 = vpop.f32.mrf.mxu2 }
  0xff   : > { %v835_v33 = vadd.f32 %v769_v22, %v570_v38  ;;  %v1001_v40 = vpop.f32.mrf.mxu3  ;;  %v1533_v38 = vld [vmem:[%s3095_s9 + $0x14] sm:$0xff] }
 0x100   : > { %v572_v36 = vpop.f32.mrf.mxu1 }
 0x101   : > { %v1061_v43 = vadd.f32 %v995_v62, %v835_v33  ;;  %v1224_v17 = vpop.f32.mrf.mxu0  ;;  %v573_v45 = vadd.f32 %v572_v36, %v3229_v1 }
 0x103   : > { %v3401_v50 = vadd.f32 %v1221_v10, %v1061_v43  ;;  %2822 = vmatmul.msk.f32.gmra.mxu1 %vm282_vm0, %v251_v39  ;;  %2848 = vmatmul.msk.f32.gmra.mxu2 %vm282_vm0, %v877_v57  ;;  %v1985_v39 = vld [vmem:[%s3095_s9 + $0x16] sm:$0xff] }
 0x104   : > { %2900 = vmatmul.msk.f32.gmra.mxu0 %vm282_vm0, %v1104_v47  ;;  %2876 = vmatmul.msk.f32.gmra.mxu3 %vm282_vm0, %v880_v49 }
 0x106   : > { %v772_v44 = vpop.f32.mrf.mxu2 }
 0x107   : > { %v836_v51 = vadd.f32 %v772_v44, %v573_v45  ;;  %v1004_v55 = vpop.f32.mrf.mxu3  ;;  %v1534_v45 = vld [vmem:[%s3095_s9 + $0x1c] sm:$0xff] }
 0x108   : > { %v575_v52 = vpop.f32.mrf.mxu1 }
 0x109   : > { %v1062_v56 = vadd.f32 %v998_v18, %v836_v51  ;;  %v1227_v24 = vpop.f32.mrf.mxu0  ;;  %v576_v1 = vadd.f32 %v575_v52, %v3242_v7  ;;  %v1760_v7 = vld [vmem:[%s3095_s9 + $0x1d] sm:$0xff] }
 0x10b   : > { %v3411_v60 = vadd.f32 %v1224_v17, %v1062_v56  ;;  %2823 = vmatmul.msk.f32.gmra.mxu1 %vm282_vm0, %v252_v53  ;;  %2849 = vmatmul.msk.f32.gmra.mxu2 %vm282_vm0, %v878_v5  ;;  %v2211_v5 = vld [vmem:[%s4280_s4] sm:$0xff]  ;;  %v1762_v56 = vld [vmem:[%s3095_s9 + $0x2d] sm:$0xff] }
 0x10c   : > { %2901 = vmatmul.msk.f32.gmra.mxu0 %vm282_vm0, %v1105_v54  ;;  %2955 = vmatmul.msk.f32.vlgmr.msra.gmra.mxu3 %vm282_vm0, %v1759_v59  ;;  %v1986_v53 = vld [vmem:[%s3095_s9 + $0x1e] sm:$0xff] }
 0x10d   : > { %2239 = vperm.xlu0 %3021, %v2211_v5  }
 0x10e   : > { %v775_v57 = vpop.f32.mrf.mxu2 }
 0x10f   : > { %v837_v61 = vadd.f32 %v775_v57, %v576_v1  ;;  %v1007_v3 = vpop.f32.mrf.mxu3  ;;  %v1535_v57 = vld [vmem:[%s3095_s9 + $0x24] sm:$0xff] }
 0x110   : > { %v578_v62 = vpop.f32.mrf.mxu1 }
 0x111   : > { %v1063_v4 = vadd.f32 %v1001_v40, %v837_v61  ;;  %v1230_v31 = vpop.f32.mrf.mxu0  ;;  %v579_v15 = vadd.f32 %v578_v62, %v3257_v14  ;;  %v1761_v40 = vld [vmem:[%s3095_s9 + $0x25] sm:$0xff] }
 0x113   : > { %v3424_v12 = vadd.f32 %v1227_v24, %v1063_v4  ;;  %2824 = vmatmul.msk.f32.gmra.mxu1 %vm282_vm0, %v253_v63  ;;  %2850 = vmatmul.msk.f32.gmra.mxu2 %vm282_vm0, %v879_v29  ;;  %v2212_v29 = vld [vmem:[%s4280_s4 + $0x8] sm:$0xff]  ;;  %v2214_v4 = vld [vmem:[%s4280_s4 + $0x18] sm:$0xff] }
 0x114   : > { %2902 = vmatmul.msk.f32.gmra.mxu0 %vm282_vm0, %v1106_v0  ;;  %2956 = vmatmul.msk.f32.gmra.mxu3 %vm282_vm0, %v1760_v7 }
 0x115   : > { %2244 = vperm.xlu0 %3021, %v2212_v29   ;;  %v1537_v29 = vld [vmem:[%s3095_s9 + $0x34] sm:$0xff] }
 0x116   : > { %v778_v18 = vpop.f32.mrf.mxu2 }
 0x117   : > { %v838_v19 = vadd.f32 %v778_v18, %v579_v15  ;;  %v1010_v22 = vpop.f32.mrf.mxu3  ;;  %v1536_v15 = vld [vmem:[%s3095_s9 + $0x2c] sm:$0xff] }
 0x118   : > { %v581_v10 = vpop.f32.mrf.mxu1 }
 0x119   : > { %v1064_v33 = vadd.f32 %v1004_v55, %v838_v19  ;;  %v1233_v36 = vpop.f32.mrf.mxu0  ;;  %v582_v43 = vadd.f32 %v581_v10, %v3272_v21  ;;  %v2213_v55 = vld [vmem:[%s4280_s4 + $0x10] sm:$0xff] }
 0x11a   : > { %2249 = vperm.xlu1 %3022, %v2213_v55  }
 0x11b   : > { %v3438_v14 = vadd.f32 %v1230_v31, %v1064_v33  ;;  %2903 = vmatmul.msk.f32.vlgmr.msra.gmra.mxu1 %vm282_vm0, %v1307_v26  ;;  %2929 = vmatmul.msk.f32.vlgmr.msra.gmra.mxu2 %vm282_vm0, %v1533_v38  ;;  %v1763_v31 = vld [vmem:[%s3095_s9 + $0x35] sm:$0xff] }
 0x11c   : > { %2981 = vmatmul.msk.f32.vlgmr.msra.gmra.mxu0 %vm282_vm0, %v1985_v39  ;;  %2957 = vmatmul.msk.f32.gmra.mxu3 %vm282_vm0, %v1761_v40  ;;  %v1988_v26 = vld [vmem:[%s3095_s9 + $0x2e] sm:$0xff] }
 0x11e   : > { %v781_v17 = vpop.f32.mrf.mxu2 }
 0x11f   : > { %v839_v47 = vadd.f32 %v781_v17, %v582_v43  ;;  %v1013_v44 = vpop.f32.mrf.mxu3 }
 0x120   : > { %v584_v49 = vpop.f32.mrf.mxu1 }
 0x121   : > { %v1065_v51 = vadd.f32 %v1007_v3, %v839_v47  ;;  %v1236_v52 = vpop.f32.mrf.mxu0  ;;  %v585_v24 = vadd.f32 %v584_v49, %v3287_v28  ;;  %v1987_v3 = vld [vmem:[%s3095_s9 + $0x26] sm:$0xff]  ;;  %v1989_v47 = vld [vmem:[%s3095_s9 + $0x36] sm:$0xff] }
 0x122   : > { %2254 = vperm.xlu1 %3022, %v2214_v4   ;;  %v1765_v49 = vld [vmem:[%s3095_s9 + $0x45] sm:$0xff] }
 0x123   : > { %v3451_v21 = vadd.f32 %v1233_v36, %v1065_v51  ;;  %2904 = vmatmul.msk.f32.gmra.mxu1 %vm282_vm0, %v1533_v38  ;;  %2930 = vmatmul.msk.f32.gmra.mxu2 %vm282_vm0, %v1534_v45  ;;  %v1764_v38 = vld [vmem:[%s3095_s9 + $0x3d] sm:$0xff] }
 0x124   : > { %2982 = vmatmul.msk.f32.gmra.mxu0 %vm282_vm0, %v1986_v53  ;;  %2958 = vmatmul.msk.f32.gmra.mxu3 %vm282_vm0, %v1762_v56  ;;  %v1538_v53 = vld [vmem:[%s3095_s9 + $0x3c] sm:$0xff] }
 0x126   : > { %v784_v54 = vpop.f32.mrf.mxu2 }
 0x127   : > { %v840_v59 = vadd.f32 %v784_v54, %v585_v24  ;;  %v1016_v61 = vpop.f32.mrf.mxu3  ;;  %v1990_v54 = vld [vmem:[%s3095_s9 + $0x3e] sm:$0xff] }
 0x128   : > { %v587_v1 = vpop.f32.mrf.mxu1 }
 0x129   : > { %v1066_v62 = vadd.f32 %v1010_v22, %v840_v59  ;;  %v1239_v63 = vpop.f32.mrf.mxu0  ;;  %v588_v0 = vadd.f32 %v587_v1, %v3302_v35  ;;  %v2217_v59 = vld [vmem:[%s4280_s4 + $0x30] sm:$0xff] }
 0x12a   : > { %v1766_v1 = vld [vmem:[%s3095_s9 + $0x4d] sm:$0xff]  ;;  %2269 = vperm.xlu0 %3021, %v2217_v59  }
 0x12b   : > { %v3464_v28 = vadd.f32 %v1236_v52, %v1066_v62  ;;  %2905 = vmatmul.msk.f32.gmra.mxu1 %vm282_vm0, %v1534_v45  ;;  %2931 = vmatmul.msk.f32.gmra.mxu2 %vm282_vm0, %v1535_v57 }
 0x12c   : > { %2983 = vmatmul.msk.f32.gmra.mxu0 %vm282_vm0, %v1987_v3  ;;  %2959 = vmatmul.msk.f32.gmra.mxu3 %vm282_vm0, %v1763_v31  ;;  %v1539_v3 = vld [vmem:[%s3095_s9 + $0x44] sm:$0xff] }
 0x12e   : > { %v787_v11 = vpop.f32.mrf.mxu2 }
 0x12f   : > { %v841_v5 = vadd.f32 %v787_v11, %v588_v0  ;;  %v1019_v18 = vpop.f32.mrf.mxu3  ;;  %v1991_v11 = vld [vmem:[%s3095_s9 + $0x46] sm:$0xff] }
 0x130   : > { %v590_v7 = vpop.f32.mrf.mxu1 }
 0x131   : > { %v1067_v19 = vadd.f32 %v1013_v44, %v841_v5  ;;  %v1242_v10 = vpop.f32.mrf.mxu0  ;;  %v591_v35 = vadd.f32 %v590_v7, %v3317_v42  ;;  %v2215_v5 = vld [vmem:[%s4280_s4 + $0x20] sm:$0xff]  ;;  %v2218_v7 = vld [vmem:[%s4280_s4 + $0x38] sm:$0xff] }
 0x132   : > { %2259 = vperm.xlu2 %3023, %v2215_v5   ;;  %2274 = vperm.xlu1 %3022, %v2218_v7  }
 0x133   : > { %v3474_v22 = vadd.f32 %v1239_v63, %v1067_v19  ;;  %2906 = vmatmul.msk.f32.gmra.mxu1 %vm282_vm0, %v1535_v57  ;;  %2932 = vmatmul.msk.f32.gmra.mxu2 %vm282_vm0, %v1536_v15 }
 0x134   : > { %2984 = vmatmul.msk.f32.gmra.mxu0 %vm282_vm0, %v1988_v26  ;;  %2960 = vmatmul.msk.f32.gmra.mxu3 %vm282_vm0, %v1764_v38  ;;  %v1540_v38 = vld [vmem:[%s3095_s9 + $0x4c] sm:$0xff] }
 0x136   : > { %v790_v33 = vpop.f32.mrf.mxu2 }
 0x137   : > { %v842_v36 = vadd.f32 %v790_v33, %v591_v35  ;;  %v1022_v40 = vpop.f32.mrf.mxu3 }
 0x138   : > { %v593_v39 = vpop.f32.mrf.mxu1 }
 0x139   : > { %v1068_v43 = vadd.f32 %v1016_v61, %v842_v36  ;;  %v1245_v17 = vpop.f32.mrf.mxu0  ;;  %v594_v42 = vadd.f32 %v593_v39, %v3240_v6  ;;  %v1992_v39 = vld [vmem:[%s3095_s9 + $0x4e] sm:$0xff] }
 0x13b   : > { %v3484_v45 = vadd.f32 %v1242_v10, %v1068_v43  ;;  %2907 = vmatmul.msk.f32.gmra.mxu1 %vm282_vm0, %v1536_v15  ;;  %2933 = vmatmul.msk.f32.gmra.mxu2 %vm282_vm0, %v1537_v29 }
 0x13c   : > { %2985 = vmatmul.msk.f32.gmra.mxu0 %vm282_vm0, %v1989_v47  ;;  %2961 = vmatmul.msk.f32.gmra.mxu3 %vm282_vm0, %v1765_v49 }
 0x13e   : > { %v793_v44 = vpop.f32.mrf.mxu2 }
 0x13f   : > { %v843_v51 = vadd.f32 %v793_v44, %v594_v42  ;;  %v1025_v55 = vpop.f32.mrf.mxu3  ;;  %v1541_v42 = vld [vmem:[%s3095_s9 + $0x54] sm:$0xff] }
 0x140   : > { %v596_v52 = vpop.f32.mrf.mxu1 }
 0x141   : > { %v1069_v56 = vadd.f32 %v1019_v18, %v843_v51  ;;  %v1248_v24 = vpop.f32.mrf.mxu0  ;;  %v597_v6 = vadd.f32 %v596_v52, %v3255_v13  ;;  %v1767_v13 = vld [vmem:[%s3095_s9 + $0x55] sm:$0xff] }
 0x143   : > { %v3497_v57 = vadd.f32 %v1245_v17, %v1069_v56  ;;  %2908 = vmatmul.msk.f32.gmra.mxu1 %vm282_vm0, %v1537_v29  ;;  %2934 = vmatmul.msk.f32.gmra.mxu2 %vm282_vm0, %v1538_v53  ;;  %v2216_v29 = vld [vmem:[%s4280_s4 + $0x28] sm:$0xff] }
 0x144   : > { %2986 = vmatmul.msk.f32.gmra.mxu0 %vm282_vm0, %v1990_v54  ;;  %2962 = vmatmul.msk.f32.gmra.mxu3 %vm282_vm0, %v1766_v1  ;;  %v1769_v56 = vld [vmem:[%s3095_s9 + $0x65] sm:$0xff] }
 0x145   : > { %2264 = vperm.xlu2 %3023, %v2216_v29  }
 0x146   : > { %v796_v61 = vpop.f32.mrf.mxu2 }
 0x147   : > { %v844_v62 = vadd.f32 %v796_v61, %v597_v6  ;;  %v1028_v4 = vpop.f32.mrf.mxu3  ;;  %v1542_v6 = vld [vmem:[%s3095_s9 + $0x5c] sm:$0xff] }
 0x148   : > { %v599_v63 = vpop.f32.mrf.mxu1 }
 0x149   : > { %v1070_v31 = vadd.f32 %v1022_v40, %v844_v62  ;;  %v1251_v0 = vpop.f32.mrf.mxu0  ;;  %v600_v18 = vadd.f32 %v599_v63, %v3270_v20  ;;  %v1768_v40 = vld [vmem:[%s3095_s9 + $0x5d] sm:$0xff] }
 0x14b   : > { %v3513_v15 = vadd.f32 %v1248_v24, %v1070_v31  ;;  %2909 = vmatmul.msk.f32.gmra.mxu1 %vm282_vm0, %v1538_v53  ;;  %2935 = vmatmul.msk.f32.gmra.mxu2 %vm282_vm0, %v1539_v3  ;;  %v1993_v53 = vld [vmem:[%s3095_s9 + $0x56] sm:$0xff]  ;;  %v1770_v31 = vld [vmem:[%s3095_s9 + $0x6d] sm:$0xff] }
 0x14c   : > { %2987 = vmatmul.msk.f32.gmra.mxu0 %vm282_vm0, %v1991_v11  ;;  %2963 = vmatmul.msk.f32.gmra.mxu3 %vm282_vm0, %v1767_v13  ;;  %v1543_v13 = vld [vmem:[%s3095_s9 + $0x64] sm:$0xff] }
 0x14e   : > { %v799_v19 = vpop.f32.mrf.mxu2 }
 0x14f   : > { %v845_v10 = vadd.f32 %v799_v19, %v600_v18  ;;  %v1031_v35 = vpop.f32.mrf.mxu3 }
 0x150   : > { %v602_v26 = vpop.f32.mrf.mxu1 }
 0x151   : > { %v1071_v33 = vadd.f32 %v1025_v55, %v845_v10  ;;  %v1254_v36 = vpop.f32.mrf.mxu0  ;;  %v603_v43 = vadd.f32 %v602_v26, %v3285_v27  ;;  %v2220_v55 = vld [vmem:[%s4280_s4 + $0x48] sm:$0xff] }
 0x152   : > { %2284 = vperm.xlu0 %3021, %v2220_v55   ;;  %v1995_v26 = vld [vmem:[%s3095_s9 + $0x66] sm:$0xff] }
 0x153   : > { %v3526_v20 = vadd.f32 %v1251_v0, %v1071_v33  ;;  %2910 = vmatmul.msk.f32.gmra.mxu1 %vm282_vm0, %v1539_v3  ;;  %2936 = vmatmul.msk.f32.gmra.mxu2 %vm282_vm0, %v1540_v38  ;;  %v1994_v3 = vld [vmem:[%s3095_s9 + $0x5e] sm:$0xff] }
 0x154   : > { %2988 = vmatmul.msk.f32.gmra.mxu0 %vm282_vm0, %v1992_v39  ;;  %2964 = vmatmul.msk.f32.gmra.mxu3 %vm282_vm0, %v1768_v40  ;;  %v1544_v40 = vld [vmem:[%s3095_s9 + $0x6c] sm:$0xff] }
 0x156   : > { %v802_v17 = vpop.f32.mrf.mxu2 }
 0x157   : > { %v846_v47 = vadd.f32 %v802_v17, %v603_v43  ;;  %v1034_v44 = vpop.f32.mrf.mxu3 }
 0x158   : > { %v605_v49 = vpop.f32.mrf.mxu1 }
 0x159   : > { %v1072_v51 = vadd.f32 %v1028_v4, %v846_v47  ;;  %v1257_v52 = vpop.f32.mrf.mxu0  ;;  %v606_v24 = vadd.f32 %v605_v49, %v3300_v34  ;;  %v2221_v4 = vld [vmem:[%s4280_s4 + $0x50] sm:$0xff] }
 0x15a   : > { %2289 = vperm.xlu1 %3022, %v2221_v4   ;;  %v1996_v49 = vld [vmem:[%s3095_s9 + $0x6e] sm:$0xff]  ;;  %v2226_v4 = vld [vmem:[%s4280_s4 + $0x78] sm:$0xff] }
 0x15b   : > { %v3539_v27 = vadd.f32 %v1254_v36, %v1072_v51  ;;  %2911 = vmatmul.msk.f32.gmra.mxu1 %vm282_vm0, %v1540_v38  ;;  %2937 = vmatmul.msk.f32.gmra.mxu2 %vm282_vm0, %v1541_v42  ;;  %v2219_v38 = vld [vmem:[%s4280_s4 + $0x40] sm:$0xff] }
 0x15c   : > { %2989 = vmatmul.msk.f32.gmra.mxu0 %vm282_vm0, %v1993_v53  ;;  %2965 = vmatmul.msk.f32.gmra.mxu3 %vm282_vm0, %v1769_v56  ;;  %v1545_v56 = vld [vmem:[%s3095_s9 + $0x74] sm:$0xff] }
 0x15d   : > { %2279 = vperm.xlu2 %3023, %v2219_v38  }
 0x15e   : > { %v805_v54 = vpop.f32.mrf.mxu2 }
 0x15f   : > { %v847_v59 = vadd.f32 %v805_v54, %v606_v24  ;;  %v1037_v61 = vpop.f32.mrf.mxu3 }
 0x160   : > { %v608_v1 = vpop.f32.mrf.mxu1 }
 0x161   : > { %v1073_v62 = vadd.f32 %v1031_v35, %v847_v59  ;;  %v1260_v63 = vpop.f32.mrf.mxu0  ;;  %v609_v0 = vadd.f32 %v608_v1, %v3315_v41  ;;  %v1771_v35 = vld [vmem:[%s3095_s9 + $0x75] sm:$0xff] }
 0x162   : > { %v1997_v1 = vld [vmem:[%s3095_s9 + $0x76] sm:$0xff] }
 0x163   : > { %v3552_v34 = vadd.f32 %v1257_v52, %v1073_v62  ;;  %2912 = vmatmul.msk.f32.gmra.mxu1 %vm282_vm0, %v1541_v42  ;;  %2938 = vmatmul.msk.f32.gmra.mxu2 %vm282_vm0, %v1542_v6  ;;  %v2223_v42 = vld [vmem:[%s4280_s4 + $0x60] sm:$0xff] }
 0x164   : > { %2990 = vmatmul.msk.f32.gmra.mxu0 %vm282_vm0, %v1994_v3  ;;  %2966 = vmatmul.msk.f32.gmra.mxu3 %vm282_vm0, %v1770_v31 }
 0x165   : > { %2299 = vperm.xlu0 %3021, %v2223_v42  }
 0x166   : > { %v808_v11 = vpop.f32.mrf.mxu2 }
 0x167   : > { %v848_v5 = vadd.f32 %v808_v11, %v609_v0  ;;  %v1040_v18 = vpop.f32.mrf.mxu3  ;;  %v1546_v0 = vld [vmem:[%s3095_s9 + $0x7c] sm:$0xff] }
 0x168   : > { %v611_v7 = vpop.f32.mrf.mxu1 }
 0x169   : > { %v1074_v19 = vadd.f32 %v1034_v44, %v848_v5  ;;  %v1263_v10 = vpop.f32.mrf.mxu0  ;;  %v612_v33 = vadd.f32 %v611_v7, %v3328_v48  ;;  %v1772_v44 = vld [vmem:[%s3095_s9 + $0x7d] sm:$0xff] }
 0x16b   : > { %v3565_v41 = vadd.f32 %v1260_v63, %v1074_v19  ;;  %2913 = vmatmul.msk.f32.gmra.mxu1 %vm282_vm0, %v1542_v6  ;;  %2939 = vmatmul.msk.f32.gmra.mxu2 %vm282_vm0, %v1543_v13  ;;  %v2224_v6 = vld [vmem:[%s4280_s4 + $0x68] sm:$0xff] }
 0x16c   : > { %2991 = vmatmul.msk.f32.gmra.mxu0 %vm282_vm0, %v1995_v26  ;;  %2967 = vmatmul.msk.f32.gmra.mxu3 %vm282_vm0, %v1771_v35  ;;  %v1774_v19 = vld [vmem:[%s3095_s9 + $0x8d] sm:$0xff] }
 0x16d   : > { %2304 = vperm.xlu1 %3022, %v2224_v6   ;;  %2314 = vperm.xlu0 %3021, %v2226_v4  }
 0x16e   : > { %v811_v36 = vpop.f32.mrf.mxu2 }
 0x16f   : > { %v849_v39 = vadd.f32 %v811_v36, %v612_v33  ;;  %v1043_v43 = vpop.f32.mrf.mxu3  ;;  %v2229_v33 = vld [vmem:[%s4280_s4 + $0x90] sm:$0xff] }
 0x170   : > { %v614_v29 = vpop.f32.mrf.mxu1 }
 0x171   : > { %v1075_v17 = vadd.f32 %v1037_v61, %v849_v39  ;;  %v1266_v47 = vpop.f32.mrf.mxu0  ;;  %v615_v51 = vadd.f32 %v614_v29, %v3245_v9  ;;  %v1773_v61 = vld [vmem:[%s3095_s9 + $0x85] sm:$0xff] }
 0x172   : > { %v1547_v39 = vld [vmem:[%s3095_s9 + $0x84] sm:$0xff] }
 0x173   : > { %v3578_v48 = vadd.f32 %v1263_v10, %v1075_v17  ;;  %2914 = vmatmul.msk.f32.gmra.mxu1 %vm282_vm0, %v1543_v13  ;;  %2940 = vmatmul.msk.f32.gmra.mxu2 %vm282_vm0, %v1544_v40  ;;  %v1998_v13 = vld [vmem:[%s3095_s9 + $0x7e] sm:$0xff]  ;;  %v1999_v17 = vld [vmem:[%s3095_s9 + $0x86] sm:$0xff] }
 0x174   : > { %2992 = vmatmul.msk.f32.gmra.mxu0 %vm282_vm0, %v1996_v49  ;;  %2968 = vmatmul.msk.f32.gmra.mxu3 %vm282_vm0, %v1772_v44 }
 0x175   : > { %2329 = vperm.xlu0 %3021, %v2229_v33   ;;  %v1550_v33 = vld [vmem:[%s3095_s9 + $0x9c] sm:$0xff] }
 0x176   : > { %v814_v52 = vpop.f32.mrf.mxu2 }
 0x177   : > { %v850_v53 = vadd.f32 %v814_v52, %v615_v51  ;;  %v1046_v24 = vpop.f32.mrf.mxu3  ;;  %v2232_v52 = vld [vmem:[%s4280_s4 + $0xa8] sm:$0xff] }
 0x178   : > { %v617_v55 = vpop.f32.mrf.mxu1 }
 0x179   : > { %v1076_v54 = vadd.f32 %v1040_v18, %v850_v53  ;;  %v1269_v59 = vpop.f32.mrf.mxu0  ;;  %v618_v9 = vadd.f32 %v617_v55, %v3260_v16  ;;  %v2222_v16 = vld [vmem:[%s4280_s4 + $0x58] sm:$0xff]  ;;  %v2227_v18 = vld [vmem:[%s4280_s4 + $0x80] sm:$0xff]  ;;  %v1548_v55 = vld [vmem:[%s3095_s9 + $0x8c] sm:$0xff] }
 0x17a   : > { %2294 = vperm.xlu2 %3023, %v2222_v16   ;;  %2319 = vperm.xlu1 %3022, %v2227_v18   ;;  %v1777_v16 = vld [vmem:[%s3095_s9 + $0xa5] sm:$0xff] }
 0x17b   : > { %v3591_v62 = vadd.f32 %v1266_v47, %v1076_v54  ;;  %2915 = vmatmul.msk.f32.gmra.mxu1 %vm282_vm0, %v1544_v40  ;;  %2941 = vmatmul.msk.f32.gmra.mxu2 %vm282_vm0, %v1545_v56  ;;  %v1775_v47 = vld [vmem:[%s3095_s9 + $0x95] sm:$0xff] }
 0x17c   : > { %2993 = vmatmul.msk.f32.gmra.mxu0 %vm282_vm0, %v1997_v1  ;;  %2969 = vmatmul.msk.f32.gmra.mxu3 %vm282_vm0, %v1773_v61  ;;  %v1776_v1 = vld [vmem:[%s3095_s9 + $0x9d] sm:$0xff] }
 0x17d   : > { %2344 = vperm.xlu0 %3021, %v2232_v52  }
 0x17e   : > { %v817_v63 = vpop.f32.mrf.mxu2 }
 0x17f   : > { %v851_v3 = vadd.f32 %v817_v63, %v618_v9  ;;  %v1049_v11 = vpop.f32.mrf.mxu3 }
 0x180   : > { %v620_v31 = vpop.f32.mrf.mxu1 }
 0x181   : > { %v1077_v5 = vadd.f32 %v1043_v43, %v851_v3  ;;  %v1272_v7 = vpop.f32.mrf.mxu0  ;;  %v621_v26 = vadd.f32 %v620_v31, %v3275_v23  ;;  %v2230_v23 = vld [vmem:[%s4280_s4 + $0x98] sm:$0xff]  ;;  %v2235_v3 = vld [vmem:[%s4280_s4 + $0xc0] sm:$0xff] }
 0x182   : > { %2334 = vperm.xlu1 %3022, %v2230_v23   ;;  %v1549_v31 = vld [vmem:[%s3095_s9 + $0x94] sm:$0xff]  ;;  %v2228_v23 = vld [vmem:[%s4280_s4 + $0x88] sm:$0xff] }
 0x183   : > { %v3610_v10 = vadd.f32 %v1269_v59, %v1077_v5  ;;  %2916 = vmatmul.msk.f32.gmra.mxu1 %vm282_vm0, %v1545_v56  ;;  %2942 = vmatmul.msk.f32.gmra.mxu2 %vm282_vm0, %v1546_v0  ;;  %v2000_v59 = vld [vmem:[%s3095_s9 + $0x8e] sm:$0xff] }
 0x184   : > { %2994 = vmatmul.msk.f32.gmra.mxu0 %vm282_vm0, %v1998_v13  ;;  %2970 = vmatmul.msk.f32.gmra.mxu3 %vm282_vm0, %v1774_v19  ;;  %v2236_v13 = vld [vmem:[%s4280_s4 + $0xc8] sm:$0xff] }
 0x185   : > { %2359 = vperm.xlu0 %3021, %v2235_v3  }
 0x186   : > { %v820_v38 = vpop.f32.mrf.mxu2 }
 0x187   : > { %v852_v35 = vadd.f32 %v820_v38, %v621_v26  ;;  %v1052_v29 = vpop.f32.mrf.mxu3 }
 0x188   : > { %v623_v36 = vpop.f32.mrf.mxu1 }
 0x189   : > { %v1078_v40 = vadd.f32 %v1046_v24, %v852_v35  ;;  %v1275_v43 = vpop.f32.mrf.mxu0  ;;  %v624_v42 = vadd.f32 %v623_v36, %v3290_v30  ;;  %v2233_v30 = vld [vmem:[%s4280_s4 + $0xb0] sm:$0xff] }
 0x18a   : > { %2349 = vperm.xlu1 %3022, %v2233_v30  }
 0x18b   : > { %v3626_v49 = vadd.f32 %v1272_v7, %v1078_v40  ;;  %2917 = vmatmul.msk.f32.gmra.mxu1 %vm282_vm0, %v1546_v0  ;;  %2943 = vmatmul.msk.f32.gmra.mxu2 %vm282_vm0, %v1547_v39  ;;  %v2001_v7 = vld [vmem:[%s3095_s9 + $0x96] sm:$0xff]  ;;  %v2002_v40 = vld [vmem:[%s3095_s9 + $0x9e] sm:$0xff] }
 0x18c   : > { %2995 = vmatmul.msk.f32.gmra.mxu0 %vm282_vm0, %v1999_v17  ;;  %2971 = vmatmul.msk.f32.gmra.mxu3 %vm282_vm0, %v1775_v47 }
 0x18e   : > { %v823_v44 = vpop.f32.mrf.mxu2 }
 0x18f   : > { %v853_v51 = vadd.f32 %v823_v44, %v624_v42  ;;  %v1881_v56 = vpop.f32.mrf.mxu3 }
 0x190   : > { %v626_v53 = vpop.f32.mrf.mxu1 }
 0x191   : > { %v1079_v24 = vadd.f32 %v1049_v11, %v853_v51  ;;  %v1278_v54 = vpop.f32.mrf.mxu0  ;;  %v627_v61 = vadd.f32 %v626_v53, %v3305_v37  ;;  %v2225_v37 = vld [vmem:[%s4280_s4 + $0x70] sm:$0xff]  ;;  %v1551_v51 = vld [vmem:[%s3095_s9 + $0xa4] sm:$0xff] }
 0x192   : > { %2309 = vperm.xlu2 %3023, %v2225_v37   ;;  %2364 = vperm.xlu1 %3022, %v2236_v13   ;;  %v1553_v13 = vld [vmem:[%s3095_s9 + $0xb4] sm:$0xff] }
 0x193   : > { %v3642_v6 = vadd.f32 %v1275_v43, %v1079_v24  ;;  %2918 = vmatmul.msk.f32.gmra.mxu1 %vm282_vm0, %v1547_v39  ;;  %2944 = vmatmul.msk.f32.gmra.mxu2 %vm282_vm0, %v1548_v55  ;;  %v1778_v43 = vld [vmem:[%s3095_s9 + $0xad] sm:$0xff] }
 0x194   : > { %2996 = vmatmul.msk.f32.gmra.mxu0 %vm282_vm0, %v2000_v59  ;;  %2972 = vmatmul.msk.f32.gmra.mxu3 %vm282_vm0, %v1776_v1  ;;  %v2003_v24 = vld [vmem:[%s3095_s9 + $0xa6] sm:$0xff] }
 0x196   : > { %v826_v9 = vpop.f32.mrf.mxu2 }
 0x197   : > { %v854_v63 = vadd.f32 %v826_v9, %v627_v61  ;;  %v1884_v0 = vpop.f32.mrf.mxu3  ;;  %v1552_v61 = vld [vmem:[%s3095_s9 + $0xac] sm:$0xff] }
 0x198   : > { %v1429_v4 = vpop.f32.mrf.mxu1 }
 0x199   : > { %v1080_v11 = vadd.f32 %v1052_v29, %v854_v63  ;;  %v2107_v5 = vpop.f32.mrf.mxu0  ;;  %v1507_v19 = vadd.f32 %v1429_v4, %v3341_v2 }
 0x19a   : > { %2324 = vperm.xlu2 %3023, %v2228_v23  }
 0x19b   : > { %v3661_v18 = vadd.f32 %v1278_v54, %v1080_v11  ;;  %2919 = vmatmul.msk.f32.gmra.mxu1 %vm282_vm0, %v1548_v55  ;;  %2945 = vmatmul.msk.f32.gmra.mxu2 %vm282_vm0, %v1549_v31  ;;  %v1779_v54 = vld [vmem:[%s3095_s9 + $0xb5] sm:$0xff] }
 0x19c   : > { %2997 = vmatmul.msk.f32.gmra.mxu0 %vm282_vm0, %v2001_v7  ;;  %2973 = vmatmul.msk.f32.gmra.mxu3 %vm282_vm0, %v1777_v16 }
 0x19e   : > { %v1655_v26 = vpop.f32.mrf.mxu2 }
 0x19f   : > { %v1733_v38 = vadd.f32 %v1655_v26, %v1507_v19  ;;  %v1887_v36 = vpop.f32.mrf.mxu3 }
 0x1a0   : > { %v1432_v35 = vpop.f32.mrf.mxu1 }
 0x1a1   : > { %v1959_v39 = vadd.f32 %v1881_v56, %v1733_v38  ;;  %v2110_v29 = vpop.f32.mrf.mxu0  ;;  %v1508_v2 = vadd.f32 %v1432_v35, %v3351_v25  ;;  %v2005_v35 = vld [vmem:[%s3095_s9 + $0xb6] sm:$0xff] }
 0x1a3   : > { %v3671_v17 = vadd.f32 %v2107_v5, %v1959_v39  ;;  %2920 = vmatmul.msk.f32.gmra.mxu1 %vm282_vm0, %v1549_v31  ;;  %2946 = vmatmul.msk.f32.gmra.mxu2 %vm282_vm0, %v1550_v33  ;;  %v2004_v31 = vld [vmem:[%s3095_s9 + $0xae] sm:$0xff] }
 0x1a4   : > { %2998 = vmatmul.msk.f32.gmra.mxu0 %vm282_vm0, %v2002_v40  ;;  %2974 = vmatmul.msk.f32.gmra.mxu3 %vm282_vm0, %v1778_v43 }
 0x1a6   : > { %v1658_v47 = vpop.f32.mrf.mxu2 }
 0x1a7   : > { %v1734_v42 = vadd.f32 %v1658_v47, %v1508_v2  ;;  %v1890_v52 = vpop.f32.mrf.mxu3 }
 0x1a8   : > { %v1435_v44 = vpop.f32.mrf.mxu1 }
 0x1a9   : > { %v1509_v53 = vadd.f32 %v1435_v44, %v3361_v46  ;;  %v1960_v55 = vadd.f32 %v1884_v0, %v1734_v42  ;;  %v2113_v56 = vpop.f32.mrf.mxu0  ;;  %v2231_v46 = vld [vmem:[%s4280_s4 + $0xa0] sm:$0xff]  ;;  %v1782_v44 = vld [vmem:[%s3095_s9 + $0xcd] sm:$0xff] }
 0x1aa   : > { %2339 = vperm.xlu2 %3023, %v2231_v46   ;;  %v1780_v0 = vld [vmem:[%s3095_s9 + $0xbd] sm:$0xff] }
 0x1ab   : > { %v3685_v25 = vadd.f32 %v2110_v29, %v1960_v55  ;;  %2921 = vmatmul.msk.f32.gmra.mxu1 %vm282_vm0, %v1550_v33  ;;  %2947 = vmatmul.msk.f32.gmra.mxu2 %vm282_vm0, %v1551_v51  ;;  %v1781_v33 = vld [vmem:[%s3095_s9 + $0xc5] sm:$0xff] }
 0x1ac   : > { %2999 = vmatmul.msk.f32.gmra.mxu0 %vm282_vm0, %v2003_v24  ;;  %2975 = vmatmul.msk.f32.gmra.mxu3 %vm282_vm0, %v1779_v54  ;;  %v2006_v42 = vld [vmem:[%s3095_s9 + $0xbe] sm:$0xff] }
 0x1ae   : > { %v1661_v59 = vpop.f32.mrf.mxu2 }
 0x1af   : > { %v1735_v30 = vadd.f32 %v1661_v59, %v1509_v53  ;;  %v1893_v9 = vpop.f32.mrf.mxu3  ;;  %v2007_v59 = vld [vmem:[%s3095_s9 + $0xc6] sm:$0xff] }
 0x1b0   : > { %v1438_v1 = vpop.f32.mrf.mxu1 }
 0x1b1   : > { %v1510_v63 = vadd.f32 %v1438_v1, %v3371_v58  ;;  %v1961_v3 = vadd.f32 %v1887_v36, %v1735_v30  ;;  %v2116_v4 = vpop.f32.mrf.mxu0  ;;  %v2234_v58 = vld [vmem:[%s4280_s4 + $0xb8] sm:$0xff] }
 0x1b2   : > { %2354 = vperm.xlu2 %3023, %v2234_v58   ;;  %v1783_v30 = vld [vmem:[%s3095_s9 + $0xd5] sm:$0xff] }
 0x1b3   : > { %v3698_v11 = vadd.f32 %v2113_v56, %v1961_v3  ;;  %2922 = vmatmul.msk.f32.gmra.mxu1 %vm282_vm0, %v1551_v51  ;;  %2948 = vmatmul.msk.f32.gmra.mxu2 %vm282_vm0, %v1552_v61  ;;  %v2008_v58 = vld [vmem:[%s3095_s9 + $0xce] sm:$0xff] }
 0x1b4   : > { %3000 = vmatmul.msk.f32.gmra.mxu0 %vm282_vm0, %v2004_v31  ;;  %2976 = vmatmul.msk.f32.gmra.mxu3 %vm282_vm0, %v1780_v0 }
 0x1b6   : > { %v1664_v5 = vpop.f32.mrf.mxu2 }
 0x1b7   : > { %v1736_v7 = vadd.f32 %v1664_v5, %v1510_v63  ;;  %v1896_v16 = vpop.f32.mrf.mxu3  ;;  %v1784_v5 = vld [vmem:[%s3095_s9 + $0xdd] sm:$0xff] }
 0x1b8   : > { %v1441_v37 = vpop.f32.mrf.mxu1 }
 0x1b9   : > { %v1511_v19 = vadd.f32 %v1441_v37, %v3381_v8  ;;  %v1962_v26 = vadd.f32 %v1890_v52, %v1736_v7  ;;  %v2119_v38 = vpop.f32.mrf.mxu0  ;;  %v1554_v8 = vld [vmem:[%s3095_s9 + $0xbc] sm:$0xff] }
 0x1bb   : > { %v3711_v36 = vadd.f32 %v2116_v4, %v1962_v26  ;;  %2923 = vmatmul.msk.f32.gmra.mxu1 %vm282_vm0, %v1552_v61  ;;  %2949 = vmatmul.msk.f32.gmra.mxu2 %vm282_vm0, %v1553_v13 }
 0x1bc   : > { %3001 = vmatmul.msk.f32.gmra.mxu0 %vm282_vm0, %v2005_v35  ;;  %2977 = vmatmul.msk.f32.gmra.mxu3 %vm282_vm0, %v1781_v33  ;;  %v2009_v33 = vld [vmem:[%s3095_s9 + $0xd6] sm:$0xff] }
 0x1be   : > { %v1667_v39 = vpop.f32.mrf.mxu2 }
 0x1bf   : > { %v1737_v29 = vadd.f32 %v1667_v39, %v1511_v19  ;;  %v1899_v43 = vpop.f32.mrf.mxu3 }
 0x1c0   : > { %v1444_v40 = vpop.f32.mrf.mxu1 }
 0x1c1   : > { %v1512_v2 = vadd.f32 %v1444_v40, %v3391_v32  ;;  %v1963_v23 = vadd.f32 %v1893_v9, %v1737_v29  ;;  %v2122_v47 = vpop.f32.mrf.mxu0  ;;  %v1555_v32 = vld [vmem:[%s3095_s9 + $0xc4] sm:$0xff] }
 0x1c3   : > { %v3721_v51 = vadd.f32 %v2119_v38, %v1963_v23  ;;  %2924 = vmatmul.msk.f32.gmra.mxu1 %vm282_vm0, %v1553_v13  ;;  %2950 = vmatmul.msk.f32.gmra.mxu2 %vm282_vm0, %v1554_v8 }
 0x1c4   : > { %3002 = vmatmul.msk.f32.gmra.mxu0 %vm282_vm0, %v2006_v42  ;;  %2978 = vmatmul.msk.f32.gmra.mxu3 %vm282_vm0, %v1782_v44  ;;  %v2010_v42 = vld [vmem:[%s3095_s9 + $0xde] sm:$0xff] }
 0x1c6   : > { %v1670_v52 = vpop.f32.mrf.mxu2 }
 0x1c7   : > { %v1738_v53 = vadd.f32 %v1670_v52, %v1512_v2  ;;  %v1902_v56 = vpop.f32.mrf.mxu3 }
 0x1c8   : > { %v1447_v55 = vpop.f32.mrf.mxu1 }
 0x1c9   : > { %v1513_v24 = vadd.f32 %v1447_v55, %v3401_v50  ;;  %v1964_v54 = vadd.f32 %v1896_v16, %v1738_v53  ;;  %v2125_v46 = vpop.f32.mrf.mxu0  ;;  %v1556_v50 = vld [vmem:[%s3095_s9 + $0xcc] sm:$0xff] }
 0x1cb   : > { %v3731_v1 = vadd.f32 %v2122_v47, %v1964_v54  ;;  %2925 = vmatmul.msk.f32.gmra.mxu1 %vm282_vm0, %v1554_v8  ;;  %2951 = vmatmul.msk.f32.gmra.mxu2 %vm282_vm0, %v1555_v32 }
 0x1cc   : > { %3003 = vmatmul.msk.f32.gmra.mxu0 %vm282_vm0, %v2007_v59  ;;  %2979 = vmatmul.msk.f32.gmra.mxu3 %vm282_vm0, %v1783_v30 }
 0x1ce   : > { %v1673_v61 = vpop.f32.mrf.mxu2 }
 0x1cf   : > { %v1739_v9 = vadd.f32 %v1673_v61, %v1513_v24  ;;  %v1905_v3 = vpop.f32.mrf.mxu3 }
 0x1d0   : > { %v1450_v63 = vpop.f32.mrf.mxu1 }
 0x1d1   : > { %v1514_v4 = vadd.f32 %v1450_v63, %v3411_v60  ;;  %v1965_v31 = vadd.f32 %v1899_v43, %v1739_v9  ;;  %v2128_v0 = vpop.f32.mrf.mxu0  ;;  %v1557_v60 = vld [vmem:[%s3095_s9 + $0xd4] sm:$0xff]  ;;  %v1558_v43 = vld [vmem:[%s3095_s9 + $0xdc] sm:$0xff]  ;;  %s4107_s9 = smul.u32 26, %s2766_s19 }
 0x1d3   : > { %v3741_v7 = vadd.f32 %v2125_v46, %v1965_v31  ;;  %2926 = vmatmul.msk.f32.gmra.mxu1 %vm282_vm0, %v1555_v32  ;;  %2952 = vmatmul.msk.f32.gmra.mxu2 %vm282_vm0, %v1556_v50  ;;  %p223_p4 = scmp.lt.s32.totalorder %s4107_s9, 51 }
 0x1d4   : > { %3004 = vmatmul.msk.f32.gmra.mxu0 %vm282_vm0, %v2008_v58  ;;  %2980 = vmatmul.msk.f32.gmra.mxu3 %vm282_vm0, %v1784_v5 }
 0x1d5   : > { %s4343_s9 = smov (!%p223_p4, %s4107_s9), 51 }
 0x1d6   : > { %v1676_v37 = vpop.f32.mrf.mxu2  ;;  %s2772_s6 = sshll.u32 %s4343_s9, 3 }
 0x1d7   : > { %v1740_v13 = vadd.f32 %v1676_v37, %v1514_v4  ;;  %v1908_v19 = vpop.f32.mrf.mxu3  ;;  %s4186_s10 = scalar_lea.vmem %s4281_s5, %s2772_s6 }
 0x1d8   : > { %v1453_v16 = vpop.f32.mrf.mxu1 }
 0x1d9   : > { %v1515_v26 = vadd.f32 %v1453_v16, %v3424_v12  ;;  %v1966_v38 = vadd.f32 %v1902_v56, %v1740_v13  ;;  %v2131_v35 = vpop.f32.mrf.mxu0 }
 0x1db   : > { %v3750_v39 = vadd.f32 %v2128_v0, %v1966_v38  ;;  %2927 = vmatmul.msk.f32.gmra.mxu1 %vm282_vm0, %v1556_v50  ;;  %2953 = vmatmul.msk.f32.gmra.mxu2 %vm282_vm0, %v1557_v60 }
 0x1dc   : > { %3005 = vmatmul.msk.f32.gmra.mxu0 %vm282_vm0, %v2009_v33 }
 0x1de   : > { %v1679_v29 = vpop.f32.mrf.mxu2 }
 0x1df   : > { %v1741_v40 = vadd.f32 %v1679_v29, %v1515_v26  ;;  %v1911_v2 = vpop.f32.mrf.mxu3 }
 0x1e0   : > { %v1456_v8 = vpop.f32.mrf.mxu1 }
 0x1e1   : > { %v1516_v23 = vadd.f32 %v1456_v8, %v3438_v14  ;;  %v1967_v12 = vadd.f32 %v1905_v3, %v1741_v40  ;;  %v2134_v47 = vpop.f32.mrf.mxu0 }
 0x1e3   : > { %v3758_v44 = vadd.f32 %v2131_v35, %v1967_v12  ;;  %2928 = vmatmul.msk.f32.gmra.mxu1 %vm282_vm0, %v1557_v60  ;;  %2954 = vmatmul.msk.f32.gmra.mxu2 %vm282_vm0, %v1558_v43 }
 0x1e4   : > { %3006 = vmatmul.msk.f32.gmra.mxu0 %vm282_vm0, %v2010_v42 }
 0x1e5   : > { %4306 = vst [vmem:[#allocation2_spill] sm:$0xff] %v3758_v44 }
 0x1e6   : > { %v1682_v52 = vpop.f32.mrf.mxu2 }
 0x1e7   : > { %v1742_v53 = vadd.f32 %v1682_v52, %v1516_v23  ;;  %v1914_v32 = vpop.f32.mrf.mxu3  ;;  %v3782_v52 = vpop.permute.xlu1 %2249 }
 0x1e8   : > { %v1459_v55 = vpop.f32.mrf.mxu1  ;;  %4307 = vst [vmem:[#allocation3_spill] sm:$0xff] %v3782_v52 }
 0x1e9   : > { %v1517_v56 = vadd.f32 %v1459_v55, %v3451_v21  ;;  %v1968_v24 = vadd.f32 %v1908_v19, %v1742_v53  ;;  %v2137_v54 = vpop.f32.mrf.mxu0 }
 0x1eb   : > { %v3764_v14 = vadd.f32 %v2134_v47, %v1968_v24  ;;  %v3780_v47 = vpop.permute.xlu0 %2239  ;;  %v3788_v24 = vpop.permute.xlu2 %2259 }
 0x1ec   : > { %4308 = vst [vmem:[#allocation4_spill] sm:$0xff] %v3788_v24 }
 0x1ee   : > { %v1685_v46 = vpop.f32.mrf.mxu2 }
 0x1ef   : > { %v1743_v59 = vadd.f32 %v1685_v46, %v1517_v56  ;;  %v1917_v61 = vpop.f32.mrf.mxu3 }
 0x1f0   : > { %v1462_v30 = vpop.f32.mrf.mxu1 }
 0x1f1   : > { %v1518_v9 = vadd.f32 %v1462_v30, %v3464_v28  ;;  %v1969_v63 = vadd.f32 %v1911_v2, %v1743_v59  ;;  %v2140_v50 = vpop.f32.mrf.mxu0 }
 0x1f3   : > { %v3767_v3 = vadd.f32 %v2137_v54, %v1969_v63  ;;  %v3792_v46 = vpop.permute.xlu0 %2244  ;;  %v3800_v63 = vpop.permute.xlu2 %2264 }
 0x1f4   : > { %4310 = vst [vmem:[#allocation6_spill] sm:$0xff] %v3800_v63 }
 0x1f6   : > { %v1688_v4 = vpop.f32.mrf.mxu2 }
 0x1f7   : > { %v1744_v31 = vadd.f32 %v1688_v4, %v1518_v9  ;;  %v1920_v58 = vpop.f32.mrf.mxu3  ;;  %v3798_v9 = vpop.permute.xlu1 %2254 }
 0x1f8   : > { %v1465_v0 = vpop.f32.mrf.mxu1  ;;  %4309 = vst [vmem:[#allocation5_spill] sm:$0xff] %v3798_v9 }
 0x1f9   : > { %v1519_v21 = vadd.f32 %v1465_v0, %v3474_v22  ;;  %v1970_v5 = vadd.f32 %v1914_v32, %v1744_v31  ;;  %v2143_v37 = vpop.f32.mrf.mxu0 }
 0x1fb   : > { %v3770_v13 = vadd.f32 %v2140_v50, %v1970_v5  ;;  %v3802_v4 = vpop.permute.xlu0 %2269 }
 0x1fc   : > { %4311 = vst [vmem:[#allocation7_spill] sm:$0xff] %v3802_v4 }
 0x1fe   : > { %v1691_v16 = vpop.f32.mrf.mxu2 }
 0x1ff   : > { %v1745_v60 = vadd.f32 %v1691_v16, %v1519_v21  ;;  %v1923_v26 = vpop.f32.mrf.mxu3  ;;  %v2368_v21 = vmul.f32 %v3792_v46, %v3685_v25  ;;  %v3810_v5 = vpop.permute.xlu1 %2274  ;;  %v2369_v16 = vmul.f32 %v3782_v52, %v3698_v11 }
 0x200   : > { %v1468_v19 = vpop.f32.mrf.mxu1  ;;  %4312 = vst [vmem:[#allocation8_spill] sm:$0xff] %v3810_v5 }
 0x201   : > { %v1520_v28 = vadd.f32 %v1468_v19, %v3484_v45  ;;  %v1971_v38 = vadd.f32 %v1917_v61, %v1745_v60  ;;  %v2146_v35 = vpop.f32.mrf.mxu0  ;;  %v3816_v60 = vpop.permute.xlu2 %2279 }
 0x202   : > { %4313 = vst [vmem:[#allocation9_spill] sm:$0xff] %v3816_v60 }
 0x203   : > { %v3773_v33 = vadd.f32 %v2143_v37, %v1971_v38  ;;  %v2367_v37 = vmul.f32 %v3780_v47, %v3671_v17 }
 0x205   : > { %v2393_v19 = vadd.f32 %v2368_v21, %v2367_v37 }
 0x206   : > { %v1694_v29 = vpop.f32.mrf.mxu2 }
 0x207   : > { %v1746_v40 = vadd.f32 %v1694_v29, %v1520_v28  ;;  %v3775_v43 = vpop.f32.mrf.mxu3  ;;  %v2394_v38 = vadd.f32 %v2393_v19, %v2369_v16  ;;  %v3822_v29 = vpop.permute.xlu0 %2284  ;;  %v2374_v16 = vmul.f32 %v3810_v5, %v3750_v39 }
 0x208   : > { %v1471_v8 = vpop.f32.mrf.mxu1  ;;  %4314 = vst [vmem:[#allocation10_spill] sm:$0xff] %v3822_v29 }
 0x209   : > { %v1521_v22 = vadd.f32 %v1471_v8, %v3497_v57  ;;  %v1972_v2 = vadd.f32 %v1920_v58, %v1746_v40  ;;  %v2149_v23 = vpop.f32.mrf.mxu0  ;;  %v3832_v21 = vpop.permute.xlu2 %2294 }
 0x20b   : > { %v3778_v12 = vadd.f32 %v2146_v35, %v1972_v2  ;;  %v2371_v35 = vmul.f32 %v3788_v24, %v3721_v51  ;;  %v2372_v2 = vmul.f32 %v3800_v63, %v3731_v1 }
 0x20e   : > { %v1697_v42 = vpop.f32.mrf.mxu2 }
 0x20f   : > { %v1747_v45 = vadd.f32 %v1697_v42, %v1521_v22  ;;  %v3784_v55 = vpop.f32.mrf.mxu3 }
 0x210   : > { %v1474_v53 = vpop.f32.mrf.mxu1 }
 0x211   : > { %v1973_v32 = vadd.f32 %v1923_v26, %v1747_v45  ;;  %v3786_v56 = vpop.f32.mrf.mxu0  ;;  %v2370_v26 = vmul.f32 %v3798_v9, %v3711_v36  ;;  %v1522_v9 = vadd.f32 %v1474_v53, %v3513_v15 }
 0x213   : > { %v3790_v54 = vadd.f32 %v2149_v23, %v1973_v32  ;;  %v2395_v22 = vadd.f32 %v2394_v38, %v2370_v26  ;;  %v3828_v23 = vpop.permute.xlu1 %2289  ;;  %v2373_v32 = vmul.f32 %v3802_v4, %v3741_v7  ;;  %v2375_v26 = vmul.f32 %v3816_v60, %v3758_v44  ;;  %v3838_v38 = vpop.permute.xlu0 %2299 }
 0x214   : > { %v2376_v4 = vmul.f32 %v3822_v29, %v3764_v14  ;;  %v3848_v60 = vpop.permute.xlu2 %2309 }
 0x215   : > { %v2396_v45 = vadd.f32 %v2395_v22, %v2371_v35  ;;  %4316 = vst [vmem:[#allocation12_spill] sm:$0xff] %v3848_v60 }
 0x216   : > { %v1700_v57 = vpop.f32.mrf.mxu2 }
 0x217   : > { %v3794_v30 = vpop.f32.mrf.mxu3  ;;  %v2397_v37 = vadd.f32 %v2396_v45, %v2372_v2  ;;  %v1748_v2 = vadd.f32 %v1700_v57, %v1522_v9  ;;  %v2379_v9 = vmul.f32 %v3838_v38, %v3773_v33 }
 0x218   : > { %v1477_v59 = vpop.f32.mrf.mxu1 }
 0x219   : > { %v3796_v61 = vpop.f32.mrf.mxu0  ;;  %v2398_v24 = vadd.f32 %v2397_v37, %v2373_v32  ;;  %v1523_v45 = vadd.f32 %v1477_v59, %v3526_v20  ;;  %v2377_v32 = vmul.f32 %v3828_v23, %v3767_v3  ;;  %v1974_v29 = vadd.f32 %v3775_v43, %v1748_v2 }
 0x21b   : > { %v2399_v22 = vadd.f32 %v2398_v24, %v2374_v16  ;;  %v3843_v52 = vpop.permute.xlu1 %2304  ;;  %v2378_v24 = vmul.f32 %v3832_v21, %v3770_v13 }
 0x21c   : > { %4315 = vst [vmem:[#allocation11_spill] sm:$0xff] %v3843_v52  ;;  %v2380_v43 = vmul.f32 %v3843_v52, %v3778_v12 }
 0x21d   : > { %v2400_v5 = vadd.f32 %v2399_v22, %v2375_v26  ;;  %v3857_v26 = vpop.permute.xlu0 %2314 }
 0x21e   : > { %v1703_v50 = vpop.f32.mrf.mxu2 }
 0x21f   : > { %v3804_v0 = vpop.f32.mrf.mxu3  ;;  %v1749_v44 = vadd.f32 %v1703_v50, %v1523_v45  ;;  %v2401_v53 = vadd.f32 %v2400_v5, %v2376_v4 }
 0x220   : > { %v1480_v31 = vpop.f32.mrf.mxu1 }
 0x221   : > { %v3806_v58 = vpop.f32.mrf.mxu0  ;;  %v1524_v15 = vadd.f32 %v1480_v31, %v3539_v27  ;;  %v2402_v59 = vadd.f32 %v2401_v53, %v2377_v32  ;;  %v1975_v50 = vadd.f32 %v3784_v55, %v1749_v44  ;;  %v2381_v44 = vmul.f32 %v3848_v60, %v3790_v54  ;;  %v3871_v55 = vpop.permute.xlu2 %2324 }
 0x223   : > { %v2403_v5 = vadd.f32 %v2402_v59, %v2378_v24  ;;  %v3867_v45 = vpop.permute.xlu1 %2319 }
 0x225   : > { %v2404_v2 = vadd.f32 %v2403_v5, %v2379_v9  ;;  %v3888_v59 = vpop.permute.xlu0 %2329 }
 0x226   : > { %v1706_v28 = vpop.f32.mrf.mxu2  ;;  %4317 = vst [vmem:[#allocation13_spill] sm:$0xff] %v3888_v59 }
 0x227   : > { %v1938_v42 = vpop.f32.mrf.mxu3  ;;  %v1750_v57 = vadd.f32 %v1706_v28, %v1524_v15  ;;  %v3864_v28 = vadd.f32 %v3786_v56, %v1974_v29  ;;  %v2405_v56 = vadd.f32 %v2404_v2, %v2380_v43 }
 0x228   : > { %v1483_v40 = vpop.f32.mrf.mxu1 }
 0x229   : > { %v3824_v8 = vpop.f32.mrf.mxu0  ;;  %v1525_v20 = vadd.f32 %v1483_v40, %v3552_v34  ;;  %v1976_v34 = vadd.f32 %v3794_v30, %v1750_v57  ;;  %v2382_v30 = vmul.f32 %v3857_v26, %v3864_v28  ;;  %v2406_v57 = vadd.f32 %v2405_v56, %v2381_v44  ;;  %v3901_v5 = vpop.permute.xlu2 %2339 }
 0x22a   : > { %4319 = vst [vmem:[#allocation15_spill] sm:$0xff] %v3901_v5 }
 0x22b   : > { %v3881_v15 = vadd.f32 %v3806_v58, %v1976_v34  ;;  %v2407_v9 = vadd.f32 %v2406_v57, %v2382_v30 }
 0x22e   : > { %v1709_v19 = vpop.f32.mrf.mxu2 }
 0x22f   : > { %v1941_v37 = vpop.f32.mrf.mxu3  ;;  %v1751_v27 = vadd.f32 %v1709_v19, %v1525_v20 }
 0x230   : > { %v1486_v63 = vpop.f32.mrf.mxu1 }
 0x231   : > { %v2164_v35 = vpop.f32.mrf.mxu0  ;;  %v1526_v4 = vadd.f32 %v1486_v63, %v3565_v41  ;;  %v3874_v41 = vadd.f32 %v3796_v61, %v1975_v50  ;;  %v1977_v63 = vadd.f32 %v3804_v0, %v1751_v27 }
 0x233   : > { %v2383_v61 = vmul.f32 %v3867_v45, %v3874_v41  ;;  %v3886_v0 = vadd.f32 %v3824_v8, %v1977_v63  ;;  %v3899_v8 = vpop.permute.xlu1 %2334 }
 0x234   : > { %4318 = vst [vmem:[#allocation14_spill] sm:$0xff] %v3899_v8 }
 0x235   : > { %v2385_v50 = vmul.f32 %v3888_v59, %v3886_v0 }
 0x236   : > { %v1712_v16 = vpop.f32.mrf.mxu2 }
 0x237   : > { %v1752_v40 = vadd.f32 %v1712_v16, %v1526_v4  ;;  %v1944_v32 = vpop.f32.mrf.mxu3 }
 0x238   : > { %v1489_v22 = vpop.f32.mrf.mxu1 }
 0x239   : > { %v2167_v31 = vpop.f32.mrf.mxu0  ;;  %v1527_v19 = vadd.f32 %v1489_v22, %v3578_v48  ;;  %v1978_v53 = vadd.f32 %v1938_v42, %v1752_v40  ;;  %v2384_v22 = vmul.f32 %v3871_v55, %v3881_v15  ;;  %v2408_v42 = vadd.f32 %v2407_v9, %v2383_v61 }
 0x23b   : > { %v3892_v58 = vadd.f32 %v2164_v35, %v1978_v53  ;;  %v2409_v43 = vadd.f32 %v2408_v42, %v2384_v22 }
 0x23d   : > { %v2386_v34 = vmul.f32 %v3899_v8, %v3892_v58  ;;  %v2410_v44 = vadd.f32 %v2409_v43, %v2385_v50  ;;  %v3911_v50 = vpop.permute.xlu1 %2349 }
 0x23e   : > { %v1715_v29 = vpop.f32.mrf.mxu2  ;;  %4321 = vst [vmem:[#allocation17_spill] sm:$0xff] %v3911_v50 }
 0x23f   : > { %v1753_v24 = vadd.f32 %v1715_v29, %v1527_v19  ;;  %v1947_v2 = vpop.f32.mrf.mxu3  ;;  %v3907_v29 = vpop.permute.xlu0 %2344 }
 0x240   : > { %v1492_v16 = vpop.f32.mrf.mxu1  ;;  %4320 = vst [vmem:[#allocation16_spill] sm:$0xff] %v3907_v29 }
 0x241   : > { %v1979_v48 = vadd.f32 %v1941_v37, %v1753_v24  ;;  %v2170_v20 = vpop.f32.mrf.mxu0  ;;  %v1528_v27 = vadd.f32 %v1492_v16, %v3591_v62 }
 0x243   : > { %v3897_v4 = vadd.f32 %v2167_v31, %v1979_v48  ;;  %v2411_v31 = vadd.f32 %v2410_v44, %v2386_v34  ;;  %v3915_v44 = vpop.permute.xlu2 %2354 }
 0x245   : > { %v2387_v63 = vmul.f32 %v3901_v5, %v3897_v4 }
 0x246   : > { %v1718_v37 = vpop.f32.mrf.mxu2 }
 0x247   : > { %v1754_v40 = vadd.f32 %v1718_v37, %v1528_v27  ;;  %v2412_v30 = vadd.f32 %v2411_v31, %v2387_v63  ;;  %v1950_v22 = vpop.f32.mrf.mxu3 }
 0x248   : > { %v1495_v35 = vpop.f32.mrf.mxu1 }
 0x249   : > { %v1980_v19 = vadd.f32 %v1944_v32, %v1754_v40  ;;  %v2173_v62 = vpop.f32.mrf.mxu0  ;;  %v1529_v53 = vadd.f32 %v1495_v35, %v3610_v10 }
 0x24b   : > { %v2206_v56 = vadd.f32 %v2170_v20, %v1980_v19 }
 0x24d   : > { %v2388_v24 = vmul.f32 %v3907_v29, %v2206_v56 }
 0x24e   : > { %v1721_v16 = vpop.f32.mrf.mxu2 }
 0x24f   : > { %v2413_v57 = vadd.f32 %v2412_v30, %v2388_v24  ;;  %v1755_v61 = vadd.f32 %v1721_v16, %v1529_v53  ;;  %v1953_v63 = vpop.f32.mrf.mxu3 }
 0x250   : > { %v1498_v48 = vpop.f32.mrf.mxu1 }
 0x251   : > { %v1981_v9 = vadd.f32 %v1947_v2, %v1755_v61  ;;  %v2176_v32 = vpop.f32.mrf.mxu0  ;;  %v1530_v27 = vadd.f32 %v1498_v48, %v3626_v49  ;;  %v3919_v61 = vpop.permute.xlu0 %2359 }
 0x253   : > { %v2207_v42 = vadd.f32 %v2173_v62, %v1981_v9 }
 0x255   : > { %v2389_v20 = vmul.f32 %v3911_v50, %v2207_v42 }
 0x256   : > { %v1724_v37 = vpop.f32.mrf.mxu2 }
 0x257   : > { %v2414_v43 = vadd.f32 %v2413_v57, %v2389_v20  ;;  %v1756_v34 = vadd.f32 %v1724_v37, %v1530_v27 }
 0x258   : > { %v1501_v10 = vpop.f32.mrf.mxu1 }
 0x259   : > { %v1982_v40 = vadd.f32 %v1950_v22, %v1756_v34  ;;  %v1531_v2 = vadd.f32 %v1501_v10, %v3642_v6  ;;  %v2179_v31 = vpop.f32.mrf.mxu0  ;;  %v1956_v22 = vpop.f32.mrf.mxu3 }
 0x25a   : > { %v3923_v34 = vpop.permute.xlu1 %2364 }
 0x25b   : > { %v2208_v35 = vadd.f32 %v2176_v32, %v1982_v40 }
 0x25d   : > { %v2390_v19 = vmul.f32 %v3915_v44, %v2208_v35 }
 0x25e   : > { %v1727_v62 = vpop.f32.mrf.mxu2 }
 0x25f   : > { %v2415_v30 = vadd.f32 %v2414_v43, %v2390_v19  ;;  %v1757_v53 = vadd.f32 %v1727_v62, %v1531_v2 }
 0x260   : > { %v1504_v24 = vpop.f32.mrf.mxu1 }
 0x261   : > { %v1983_v49 = vadd.f32 %v1953_v63, %v1757_v53  ;;  %v1532_v57 = vadd.f32 %v1504_v24, %v3661_v18  ;;  %v2182_v6 = vpop.f32.mrf.mxu0 }
 0x263   : > { %v2209_v16 = vadd.f32 %v2179_v31, %v1983_v49 }
 0x265   : > { %v2391_v48 = vmul.f32 %v3919_v61, %v2209_v16 }
 0x266   : > { %v1730_v9 = vpop.f32.mrf.mxu2 }
 0x267   : > { %v2416_v32 = vadd.f32 %v2415_v30, %v2391_v48  ;;  %v1758_v27 = vadd.f32 %v1730_v9, %v1532_v57 }
 0x269   : > { %v1984_v20 = vadd.f32 %v1956_v22, %v1758_v27 }
 0x26b   : > { %v2210_v37 = vadd.f32 %v2182_v6, %v1984_v20  ;;  %v4322_v6 = vld [vmem:[#allocation3_spill] sm:$0xff] }
 0x26d   : > { %v2392_v43 = vmul.f32 %v3923_v34, %v2210_v37 }
 0x26f   : > { %v2417_v10 = vadd.f32 %v2416_v32, %v2392_v43 }
 0x271   : > { %v2418_v40 = vrot.slane %v2417_v10, 4 }
 0x273   : > { %v2419_v63 = vadd.f32 %v2418_v40, %v2417_v10  ;;  %v4323_v10 = vld [vmem:[#allocation5_spill] sm:$0xff] }
 0x275   : > { %v2420_v2 = vrot.slane %v2419_v63, 2 }
 0x277   : > { %v2421_v19 = vadd.f32 %v2420_v2, %v2419_v63  ;;  %v4324_v2 = vld [vmem:[#allocation2_spill] sm:$0xff] }
 0x279   : > { %v2422_v62 = vrot.slane %v2421_v19, 1 }
 0x27b   : > { %v2423_v18 = vadd.f32 %v2422_v62, %v2421_v19  ;;  %v4325_v62 = vld [vmem:[#allocation4_spill] sm:$0xff] }
 0x27d   : > { %v3926_v31 = vmul.f32 0.0078125, %v2423_v18 }
 0x27f   : > { %v3930_v30 = vsub.f32 %v3897_v4, %v3926_v31  ;;  %v3933_v53 = vsub.f32 %v2206_v56, %v3926_v31  ;;  %v3936_v49 = vsub.f32 %v2207_v42, %v3926_v31  ;;  %v3939_v24 = vsub.f32 %v2208_v35, %v3926_v31 }
 0x280   : > { %v3942_v57 = vsub.f32 %v2209_v16, %v3926_v31  ;;  %v3945_v48 = vsub.f32 %v2210_v37, %v3926_v31  ;;  %v3949_v9 = vsub.f32 %v3671_v17, %v3926_v31  ;;  %v3953_v4 = vsub.f32 %v3685_v25, %v3926_v31 }
 0x281   : > { %v3957_v56 = vsub.f32 %v3698_v11, %v3926_v31  ;;  %v3965_v16 = vsub.f32 %v3711_v36, %v3926_v31  ;;  %v3969_v17 = vsub.f32 %v3721_v51, %v3926_v31  ;;  %v3977_v32 = vsub.f32 %v3731_v1, %v3926_v31 }
 0x282   : > { %v2451_v42 = vmul.f32 %v3949_v9, %v3949_v9  ;;  %v2452_v35 = vmul.f32 %v3953_v4, %v3953_v4  ;;  %v3983_v36 = vsub.f32 %v3741_v7, %v3926_v31  ;;  %v3990_v43 = vsub.f32 %v3750_v39, %v3926_v31 }
 0x283   : > { %v2453_v25 = vmul.f32 %v3957_v56, %v3957_v56  ;;  %v2454_v27 = vmul.f32 %v3965_v16, %v3965_v16  ;;  %v2455_v51 = vmul.f32 %v3969_v17, %v3969_v17  ;;  %v2456_v1 = vmul.f32 %v3977_v32, %v3977_v32 }
 0x284   : > { %v2477_v11 = vmul.f32 %v2451_v42, %v3780_v47  ;;  %v2478_v22 = vmul.f32 %v2452_v35, %v3792_v46  ;;  %v3997_v7 = vsub.f32 %v4324_v2, %v3926_v31  ;;  %v2457_v19 = vmul.f32 %v3983_v36, %v3983_v36  ;;  %v4328_v2 = vld [vmem:[#allocation8_spill] sm:$0xff] }
 0x285   : > { %v2479_v20 = vmul.f32 %v2453_v25, %v4322_v6  ;;  %v2480_v40 = vmul.f32 %v2454_v27, %v4323_v10  ;;  %v2481_v18 = vmul.f32 %v2455_v51, %v4325_v62  ;;  %v4004_v39 = vsub.f32 %v3764_v14, %v3926_v31  ;;  %v4326_v25 = vld [vmem:[#allocation6_spill] sm:$0xff] }
 0x286   : > { %v2503_v37 = vadd.f32 %v2478_v22, %v2477_v11  ;;  %v2458_v35 = vmul.f32 %v3990_v43, %v3990_v43  ;;  %v2482_v11 = vmul.f32 %v2456_v1, %v4326_v25  ;;  %v4011_v27 = vsub.f32 %v3767_v3, %v3926_v31  ;;  %v4329_v25 = vld [vmem:[#allocation9_spill] sm:$0xff] }
 0x287   : > { %v4018_v14 = vsub.f32 %v3770_v13, %v3926_v31  ;;  %v4025_v3 = vsub.f32 %v3773_v33, %v3926_v31  ;;  %v4032_v13 = vsub.f32 %v3778_v12, %v3926_v31  ;;  %v4039_v33 = vsub.f32 %v3790_v54, %v3926_v31 }
 0x288   : > { %v2504_v63 = vadd.f32 %v2503_v37, %v2479_v20  ;;  %v2459_v20 = vmul.f32 %v3997_v7, %v3997_v7  ;;  %v4327_v37 = vld [vmem:[#allocation7_spill] sm:$0xff]  ;;  %v2484_v1 = vmul.f32 %v2458_v35, %v4328_v2  ;;  %v4046_v12 = vsub.f32 %v3864_v28, %v3926_v31 }
 0x289   : > { %v2483_v51 = vmul.f32 %v2457_v19, %v4327_v37  ;;  %v4330_v37 = vld [vmem:[#allocation10_spill] sm:$0xff]  ;;  %v4053_v54 = vsub.f32 %v3874_v41, %v3926_v31  ;;  %v4060_v28 = vsub.f32 %v3881_v15, %v3926_v31  ;;  %v4067_v41 = vsub.f32 %v3886_v0, %v3926_v31 }
 0x28a   : > { %v2505_v42 = vadd.f32 %v2504_v63, %v2480_v40  ;;  %v2460_v63 = vmul.f32 %v4004_v39, %v4004_v39  ;;  %v2485_v19 = vmul.f32 %v2459_v20, %v4329_v25  ;;  %v4074_v15 = vsub.f32 %v3892_v58, %v3926_v31 }
 0x28b   : > { %v2469_v0 = vmul.f32 %v4067_v41, %v4067_v41  ;;  %v2471_v58 = vmul.f32 %v3930_v30, %v3930_v30 }
 0x28c   : > { %v2506_v22 = vadd.f32 %v2505_v42, %v2481_v18  ;;  %v2461_v42 = vmul.f32 %v4011_v27, %v4011_v27  ;;  %v2486_v35 = vmul.f32 %v2460_v63, %v4330_v37 }
 0x28d   : > { %v2495_v31 = vmul.f32 %v2469_v0, %v3888_v59  ;;  %v2475_v0 = vmul.f32 %v3942_v57, %v3942_v57 }
 0x28e   : > { %v2507_v40 = vadd.f32 %v2506_v22, %v2482_v11  ;;  %v2462_v22 = vmul.f32 %v4018_v14, %v4018_v14  ;;  %v2487_v20 = vmul.f32 %v2461_v42, %v3828_v23 }
 0x290   : > { %v2508_v18 = vadd.f32 %v2507_v40, %v2483_v51  ;;  %v2463_v40 = vmul.f32 %v4025_v3, %v4025_v3  ;;  %v2488_v63 = vmul.f32 %v2462_v22, %v3832_v21 }
 0x292   : > { %v2509_v11 = vadd.f32 %v2508_v18, %v2484_v1  ;;  %v2464_v18 = vmul.f32 %v4032_v13, %v4032_v13  ;;  %v2489_v42 = vmul.f32 %v2463_v40, %v3838_v38 }
 0x294   : > { %v2510_v51 = vadd.f32 %v2509_v11, %v2485_v19  ;;  %v2465_v11 = vmul.f32 %v4039_v33, %v4039_v33  ;;  %v2490_v22 = vmul.f32 %v2464_v18, %v3843_v52 }
 0x296   : > { %v2511_v1 = vadd.f32 %v2510_v51, %v2486_v35  ;;  %v2466_v51 = vmul.f32 %v4046_v12, %v4046_v12  ;;  %v2491_v40 = vmul.f32 %v2465_v11, %v3848_v60  ;;  %v2470_v11 = vmul.f32 %v4074_v15, %v4074_v15 }
 0x298   : > { %v2512_v19 = vadd.f32 %v2511_v1, %v2487_v20  ;;  %v2467_v1 = vmul.f32 %v4053_v54, %v4053_v54  ;;  %v2492_v18 = vmul.f32 %v2466_v51, %v3857_v26  ;;  %v2472_v51 = vmul.f32 %v3933_v53, %v3933_v53 }
 0x29a   : > { %v2513_v35 = vadd.f32 %v2512_v19, %v2488_v63  ;;  %v2468_v19 = vmul.f32 %v4060_v28, %v4060_v28 }
 0x29c   : > { %v2514_v20 = vadd.f32 %v2513_v35, %v2489_v42  ;;  %v2493_v35 = vmul.f32 %v2467_v1, %v3867_v45  ;;  %v2473_v1 = vmul.f32 %v3936_v49, %v3936_v49 }
 0x29e   : > { %v2515_v63 = vadd.f32 %v2514_v20, %v2490_v22  ;;  %v2494_v22 = vmul.f32 %v2468_v19, %v3871_v55  ;;  %v2498_v19 = vmul.f32 %v2472_v51, %v3907_v29 }
 0x2a0   : > { %v2516_v42 = vadd.f32 %v2515_v63, %v2491_v40  ;;  %v2496_v40 = vmul.f32 %v2470_v11, %v3899_v8 }
 0x2a2   : > { %v2517_v52 = vadd.f32 %v2516_v42, %v2492_v18  ;;  %v2497_v18 = vmul.f32 %v2471_v58, %v3901_v5  ;;  %v2501_v58 = vmul.f32 %v2475_v0, %v3919_v61 }
 0x2a4   : > { %v2518_v20 = vadd.f32 %v2517_v52, %v2493_v35  ;;  %v2474_v52 = vmul.f32 %v3939_v24, %v3939_v24 }
 0x2a6   : > { %v2519_v60 = vadd.f32 %v2518_v20, %v2494_v22  ;;  %v2499_v22 = vmul.f32 %v2473_v1, %v3911_v50  ;;  %v2500_v11 = vmul.f32 %v2474_v52, %v3915_v44 }
 0x2a8   : > { %v2520_v63 = vadd.f32 %v2519_v60, %v2495_v31  ;;  %v2476_v60 = vmul.f32 %v3945_v48, %v3945_v48 }
 0x2aa   : > { %v2521_v42 = vadd.f32 %v2520_v63, %v2496_v40  ;;  %v2502_v63 = vmul.f32 %v2476_v60, %v3923_v34 }
 0x2ac   : > { %v2522_v35 = vadd.f32 %v2521_v42, %v2497_v18 }
 0x2ae   : > { %v2523_v20 = vadd.f32 %v2522_v35, %v2498_v19 }
 0x2b0   : > { %v2524_v31 = vadd.f32 %v2523_v20, %v2499_v22 }
 0x2b2   : > { %v2525_v40 = vadd.f32 %v2524_v31, %v2500_v11  ;;  %v4115_v31 = vld [vmem:[%s4278_s2] ss:$0 sm:$0xff] }
 0x2b4   : > { %v2526_v5 = vadd.f32 %v2525_v40, %v2501_v58 }
 0x2b6   : > { %v2527_v51 = vadd.f32 %v2526_v5, %v2502_v63 }
 0x2b8   : > { %v2528_v18 = vrot.slane %v2527_v51, 4 }
 0x2ba   : > { %v2529_v42 = vadd.f32 %v2528_v18, %v2527_v51 }
 0x2bc   : > { %v2530_v29 = vrot.slane %v2529_v42, 2 }
 0x2be   : > { %v2531_v8 = vadd.f32 %v2530_v29, %v2529_v42 }
 0x2c0   : > { %v2532_v1 = vrot.slane %v2531_v8, 1 }
 0x2c2   : > { %v2533_v19 = vadd.f32 %v2532_v1, %v2531_v8 }
 0x2c4   : > { %v2534_v35 = vmul.f32 0.0078125, %v2533_v19 }
 0x2c6   : > { %v2535_v50 = vadd.f32 1e-05, %v2534_v35 }
 0x2c8   : > { %3026 = vrsqrt.f32 %v2535_v50  ;;  %vm2542_vm2 = vweird.f32 %v2535_v50 }
 0x2ce   : > { %v3027_v59 = vpop.eup %3026 }
 0x2cf   : > { %v2537_v52 = vmul.f32 %v3027_v59, %v2535_v50  ;;  %vm2543_vm1 = vweird.f32 %v3027_v59 }
 0x2d0   : > { %vm2544_vm3 = vmor %vm2542_vm2, %vm2543_vm1 }
 0x2d1   : > { %v2538_v22 = vmul.f32 %v3027_v59, %v2537_v52 }
 0x2d3   : > { %v2539_v20 = vmul.f32 0.5, %v2538_v22 }
 0x2d5   : > { %v2540_v0 = vsub.f32 1.5, %v2539_v20 }
 0x2d7   : > { %v2541_v11 = vmul.f32 %v3027_v59, %v2540_v0 }
 0x2d9   : > { %v2545_v5 = vsel %vm2544_vm3, %v3027_v59, %v2541_v11 }
 0x2da   : > { %v2546_v29 = vmul.f32 %v2545_v5, %v3949_v9  ;;  %v2547_v8 = vmul.f32 %v2545_v5, %v3953_v4  ;;  %v2548_v60 = vmul.f32 %v2545_v5, %v3957_v56  ;;  %v2549_v58 = vmul.f32 %v2545_v5, %v3965_v16 }
 0x2db   : > { %v2550_v50 = vmul.f32 %v2545_v5, %v3969_v17  ;;  %v2551_v59 = vmul.f32 %v2545_v5, %v3977_v32  ;;  %v2552_v40 = vmul.f32 %v2545_v5, %v3983_v36  ;;  %v2553_v63 = vmul.f32 %v2545_v5, %v3990_v43  ;;  %v4132_v32 = vld [vmem:[%s4279_s3] ss:$0 sm:$0xff] }
 0x2dc   : > { %v2554_v9 = vmul.f32 %v2545_v5, %v3997_v7  ;;  %v2555_v4 = vmul.f32 %v2545_v5, %v4004_v39  ;;  %v2556_v56 = vmul.f32 %v2545_v5, %v4011_v27  ;;  %v2576_v51 = vmul.f32 %v4115_v31, %v2546_v29 }
 0x2dd   : > { %v2577_v16 = vmul.f32 %v4115_v31, %v2547_v8  ;;  %v2578_v17 = vmul.f32 %v4115_v31, %v2548_v60  ;;  %v2557_v36 = vmul.f32 %v2545_v5, %v4018_v14  ;;  %v2558_v43 = vmul.f32 %v2545_v5, %v4025_v3 }
 0x2de   : > { %v2559_v7 = vmul.f32 %v2545_v5, %v4032_v13  ;;  %v2579_v39 = vmul.f32 %v4115_v31, %v2549_v58  ;;  %v2560_v27 = vmul.f32 %v2545_v5, %v4039_v33  ;;  %v2561_v18 = vmul.f32 %v2545_v5, %v4046_v12 }
 0x2df   : > { %v2562_v42 = vmul.f32 %v2545_v5, %v4053_v54  ;;  %v2580_v1 = vmul.f32 %v4115_v31, %v2550_v50  ;;  %v2563_v19 = vmul.f32 %v2545_v5, %v4060_v28  ;;  %v2564_v35 = vmul.f32 %v2545_v5, %v4067_v41 }
 0x2e0   : > { %v2565_v14 = vmul.f32 %v2545_v5, %v4074_v15  ;;  %v2581_v3 = vmul.f32 %v4115_v31, %v2551_v59  ;;  %v2582_v13 = vmul.f32 %v4115_v31, %v2552_v40  ;;  %v2606_v33 = vadd.f32 %v4132_v32, %v2576_v51 }
 0x2e1   : > { %v2607_v12 = vadd.f32 %v4132_v32, %v2577_v16  ;;  %v2608_v54 = vadd.f32 %v4132_v32, %v2578_v17  ;;  %v2566_v28 = vmul.f32 %v2545_v5, %v3930_v30  ;;  %v2567_v41 = vmul.f32 %v2545_v5, %v3933_v53 }
 0x2e2   : > { %v2583_v15 = vmul.f32 %v4115_v31, %v2553_v63  ;;  %v2609_v52 = vadd.f32 %v4132_v32, %v2579_v39  ;;  %v4160_v22 = vmul.f32 %v2545_v5, %v3936_v49  ;;  %v4163_v20 = vmul.f32 %v2545_v5, %v3939_v24 }
 0x2e3   : > { %v2584_v0 = vmul.f32 %v4115_v31, %v2554_v9  ;;  %v2610_v11 = vadd.f32 %v4132_v32, %v2580_v1  ;;  %v4168_v29 = vmul.f32 %v2545_v5, %v3942_v57  ;;  %v2585_v30 = vmul.f32 %v4115_v31, %v2555_v4 }
 0x2e4   : > { %v2586_v53 = vmul.f32 %v4115_v31, %v2556_v56  ;;  %v2611_v8 = vadd.f32 %v4132_v32, %v2581_v3  ;;  %v2612_v49 = vadd.f32 %v4132_v32, %v2582_v13  ;;  %v2632_v60 = vmax.f32 %v2606_v33, 0.0 }
 0x2e5   : > { %v2633_v58 = vmax.f32 %v2607_v12, 0.0  ;;  %v2634_v24 = vmax.f32 %v2608_v54, 0.0  ;;  %v4176_v50 = vmul.f32 %v2545_v5, %v3945_v48  ;;  %v2587_v59 = vmul.f32 %v4115_v31, %v2557_v36  ;;  %v4331_v54 = vld [vmem:[#allocation6_spill] sm:$0xff] }
 0x2e6   : > { %v2613_v57 = vadd.f32 %v4132_v32, %v2583_v15  ;;  %v2635_v40 = vmax.f32 %v2609_v52, 0.0  ;;  %v2588_v63 = vmul.f32 %v4115_v31, %v2558_v43  ;;  %v2589_v9 = vmul.f32 %v4115_v31, %v2559_v7 }
 0x2e7   : > { %v2614_v4 = vadd.f32 %v4132_v32, %v2584_v0  ;;  %v2636_v56 = vmax.f32 %v2610_v11, 0.0  ;;  %v2590_v48 = vmul.f32 %v4115_v31, %v2560_v27  ;;  %v2615_v5 = vadd.f32 %v4132_v32, %v2585_v30  ;;  %v4332_v0 = vld [vmem:[#allocation7_spill] sm:$0xff] }
 0x2e8   : > { %v2616_v51 = vadd.f32 %v4132_v32, %v2586_v53  ;;  %v2637_v16 = vmax.f32 %v2611_v8, 0.0  ;;  %v2638_v17 = vmax.f32 %v2612_v49, 0.0  ;;  %v2658_v36 = vmul.f32 %v2632_v60, %v3780_v47 }
 0x2e9   : > { %v2659_v43 = vmul.f32 %v2633_v58, %v3792_v46  ;;  %v2660_v7 = vmul.f32 %v2634_v24, %v4322_v6  ;;  %v2591_v39 = vmul.f32 %v4115_v31, %v2561_v18  ;;  %v2617_v1 = vadd.f32 %v4132_v32, %v2587_v59 }
 0x2ea   : > { %v2639_v3 = vmax.f32 %v2613_v57, 0.0  ;;  %v2661_v27 = vmul.f32 %v2635_v40, %v4323_v10  ;;  %v2592_v13 = vmul.f32 %v4115_v31, %v2562_v42  ;;  %v2618_v33 = vadd.f32 %v4132_v32, %v2588_v63  ;;  %2684 = vst [vmem:[%s4186_s10] sm:$0xff] %v2658_v36 }
 0x2eb   : > { %v2640_v12 = vmax.f32 %v2614_v4, 0.0  ;;  %v2662_v47 = vmul.f32 %v2636_v56, %v4325_v62  ;;  %v2593_v46 = vmul.f32 %v4115_v31, %v2563_v19  ;;  %v2619_v6 = vadd.f32 %v4132_v32, %v2589_v9  ;;  %2685 = vst [vmem:[%s4186_s10 + $0x8] sm:$0xff] %v2659_v43 }
 0x2ec   : > { %v2641_v18 = vmax.f32 %v2615_v5, 0.0  ;;  %v2663_v15 = vmul.f32 %v2637_v16, %v4331_v54  ;;  %v2594_v10 = vmul.f32 %v4115_v31, %v2564_v35  ;;  %v2620_v42 = vadd.f32 %v4132_v32, %v2590_v48  ;;  %2686 = vst [vmem:[%s4186_s10 + $0x10] sm:$0xff] %v2660_v7  ;;  %v4333_v5 = vld [vmem:[#allocation11_spill] sm:$0xff]  ;;  %v4334_v16 = vld [vmem:[#allocation12_spill] sm:$0xff]  ;;  %v4339_v54 = vld [vmem:[#allocation17_spill] sm:$0xff] }
 0x2ed   : > { %v2642_v52 = vmax.f32 %v2616_v51, 0.0  ;;  %v2664_v11 = vmul.f32 %v2638_v17, %v4332_v0  ;;  %v2595_v62 = vmul.f32 %v4115_v31, %v2565_v14  ;;  %v2621_v19 = vadd.f32 %v4132_v32, %v2591_v39  ;;  %2687 = vst [vmem:[%s4186_s10 + $0x18] sm:$0xff] %v2661_v27 }
 0x2ee   : > { %v2643_v30 = vmax.f32 %v2617_v1, 0.0  ;;  %v2665_v53 = vmul.f32 %v2639_v3, %v4328_v2  ;;  %v2596_v8 = vmul.f32 %v4115_v31, %v2566_v28  ;;  %v2622_v35 = vadd.f32 %v4132_v32, %v2592_v13  ;;  %2688 = vst [vmem:[%s4186_s10 + $0x20] sm:$0xff] %v2662_v47  ;;  %v4335_v13 = vld [vmem:[#allocation13_spill] sm:$0xff] }
 0x2ef   : > { %v2644_v49 = vmax.f32 %v2618_v33, 0.0  ;;  %v2666_v60 = vmul.f32 %v2640_v12, %v4329_v25  ;;  %v2597_v58 = vmul.f32 %v4115_v31, %v2567_v41  ;;  %v2623_v14 = vadd.f32 %v4132_v32, %v2593_v46  ;;  %2689 = vst [vmem:[%s4186_s10 + $0x28] sm:$0xff] %v2663_v15  ;;  %v4336_v12 = vld [vmem:[#allocation14_spill] sm:$0xff] }
 0x2f0   : > { %v2645_v24 = vmax.f32 %v2619_v6, 0.0  ;;  %v2667_v59 = vmul.f32 %v2641_v18, %v4330_v37  ;;  %v2598_v2 = vmul.f32 %v4115_v31, %v4160_v22  ;;  %v2624_v28 = vadd.f32 %v4132_v32, %v2594_v10  ;;  %2690 = vst [vmem:[%s4186_s10 + $0x30] sm:$0xff] %v2664_v11  ;;  %v4338_v6 = vld [vmem:[#allocation16_spill] sm:$0xff] }
 0x2f1   : > { %v2646_v57 = vmax.f32 %v2620_v42, 0.0  ;;  %v2668_v40 = vmul.f32 %v2642_v52, %v3828_v23  ;;  %v2599_v25 = vmul.f32 %v4115_v31, %v4163_v20  ;;  %v2625_v41 = vadd.f32 %v4132_v32, %v2595_v62  ;;  %2691 = vst [vmem:[%s4186_s10 + $0x38] sm:$0xff] %v2665_v53 }
 0x2f2   : > { %v2647_v63 = vmax.f32 %v2621_v19, 0.0  ;;  %v2669_v37 = vmul.f32 %v2643_v30, %v3832_v21  ;;  %v2600_v22 = vmul.f32 %v4115_v31, %v4168_v29  ;;  %v2626_v9 = vadd.f32 %v4132_v32, %v2596_v8  ;;  %2692 = vst [vmem:[%s4186_s10 + $0x40] sm:$0xff] %v2666_v60 }
 0x2f3   : > { %v2648_v4 = vmax.f32 %v2622_v35, 0.0  ;;  %v2670_v23 = vmul.f32 %v2644_v49, %v3838_v38  ;;  %v2601_v20 = vmul.f32 %v4115_v31, %v4176_v50  ;;  %v2627_v56 = vadd.f32 %v4132_v32, %v2597_v58  ;;  %2693 = vst [vmem:[%s4186_s10 + $0x48] sm:$0xff] %v2667_v59 }
 0x2f4   : > { %v2649_v48 = vmax.f32 %v2623_v14, 0.0  ;;  %v2671_v21 = vmul.f32 %v2645_v24, %v4333_v5  ;;  %v2628_v29 = vadd.f32 %v4132_v32, %v2598_v2  ;;  %v2650_v51 = vmax.f32 %v2624_v28, 0.0  ;;  %2694 = vst [vmem:[%s4186_s10 + $0x50] sm:$0xff] %v2668_v40 }
 0x2f5   : > { %v2672_v17 = vmul.f32 %v2646_v57, %v4334_v16  ;;  %v2629_v38 = vadd.f32 %v4132_v32, %v2599_v25  ;;  %v2651_v36 = vmax.f32 %v2625_v41, 0.0  ;;  %v2673_v31 = vmul.f32 %v2647_v63, %v3857_v26  ;;  %2695 = vst [vmem:[%s4186_s10 + $0x58] sm:$0xff] %v2669_v37 }
 0x2f6   : > { %v2630_v50 = vadd.f32 %v4132_v32, %v2600_v22  ;;  %v2652_v43 = vmax.f32 %v2626_v9, 0.0  ;;  %v2674_v7 = vmul.f32 %v2648_v4, %v3867_v45  ;;  %2696 = vst [vmem:[%s4186_s10 + $0x60] sm:$0xff] %v2670_v23  ;;  %v2631_v39 = vadd.f32 %v4132_v32, %v2601_v20  ;;  %v4337_v32 = vld [vmem:[#allocation15_spill] sm:$0xff] }
 0x2f7   : > { %v2653_v1 = vmax.f32 %v2627_v56, 0.0  ;;  %v2675_v3 = vmul.f32 %v2649_v48, %v3871_v55  ;;  %2697 = vst [vmem:[%s4186_s10 + $0x68] sm:$0xff] %v2671_v21  ;;  %v2654_v27 = vmax.f32 %v2628_v29, 0.0  ;;  %v2676_v26 = vmul.f32 %v2650_v51, %v4335_v13 }
 0x2f8   : > { %2698 = vst [vmem:[%s4186_s10 + $0x70] sm:$0xff] %v2672_v17  ;;  %v2655_v33 = vmax.f32 %v2629_v38, 0.0  ;;  %v2677_v47 = vmul.f32 %v2651_v36, %v4336_v12  ;;  %v2656_v45 = vmax.f32 %v2630_v50, 0.0  ;;  %v2678_v46 = vmul.f32 %v2652_v43, %v4337_v32 }
 0x2f9   : > { %2699 = vst [vmem:[%s4186_s10 + $0x78] sm:$0xff] %v2673_v31  ;;  %v2657_v55 = vmax.f32 %v2631_v39, 0.0  ;;  %v2679_v18 = vmul.f32 %v2653_v1, %v4338_v6  ;;  %v2680_v15 = vmul.f32 %v2654_v27, %v4339_v54 }
 0x2fa   : > { %2700 = vst [vmem:[%s4186_s10 + $0x80] sm:$0xff] %v2674_v7  ;;  %v2681_v10 = vmul.f32 %v2655_v33, %v3915_v44  ;;  %v2682_v42 = vmul.f32 %v2656_v45, %v3919_v61 }
 0x2fb   : > { %2701 = vst [vmem:[%s4186_s10 + $0x88] sm:$0xff] %v2675_v3  ;;  %v2683_v52 = vmul.f32 %v2657_v55, %v3923_v34 }
 0x2fc   : > { %2702 = vst [vmem:[%s4186_s10 + $0x90] sm:$0xff] %v2676_v26 }
 0x2fd   : > { %2703 = vst [vmem:[%s4186_s10 + $0x98] sm:$0xff] %v2677_v47 }
 0x2fe   : > { %2704 = vst [vmem:[%s4186_s10 + $0xa0] sm:$0xff] %v2678_v46 }
 0x2ff   : > { %2705 = vst [vmem:[%s4186_s10 + $0xa8] sm:$0xff] %v2679_v18 }
 0x300   : > { %2706 = vst [vmem:[%s4186_s10 + $0xb0] sm:$0xff] %v2680_v15 }
 0x301   : > { %2707 = vst [vmem:[%s4186_s10 + $0xb8] sm:$0xff] %v2681_v10 }
 0x302   : > { %2708 = vst [vmem:[%s4186_s10 + $0xc0] sm:$0xff] %v2682_v42 }
 0x303   : > { %2709 = vst [vmem:[%s4186_s10 + $0xc8] sm:$0xff] %v2683_v52 }
 0x304 PF: > { %s15_s18 = sadd.s32 1, %s3034_s18  }
 0x305   : > { %p12_p5 = scmp.ge.s32.totalorder %s15_s18, 4  }
 0x307   :  { %14 = sbr.rel (!%p12_p5) target bundleno = 1 (0x1), region = 70 }

</bundles_post_ra>
